<compile_context>
chip_gen: v7x
topology: tpu7x:2x2x1
jax: 0.10.0
libtpu: 0.0.40
codegen_flags: <defaults>
</compile_context>

<pallas_src>
import jax
import jax.numpy as jnp
from jax import lax
from jax.experimental import pallas as pl
from jax.experimental.pallas import tpu as pltpu


# ----------------------------------------------------------------------------
# helpers
# ----------------------------------------------------------------------------
def _round_up(x, m):
    return (x + m - 1) // m * m


def _pad_to(x, axis, target):
    pad = target - x.shape[axis]
    if pad == 0:
        return x
    widths = [(0, 0)] * x.ndim
    widths[axis] = (0, pad)
    return jnp.pad(x, widths)


# ----------------------------------------------------------------------------
# Fused kernel: GRU question encoder + (collapsed) UpDn head + classifier.
# ----------------------------------------------------------------------------
def updn_fused_kernel(x_ref,                                    # [S, TB, EP] bf16
                      wihr_ref, wihz_ref, wihn_ref,             # [EP, HP] bf16
                      whhr_ref, whhz_ref, whhn_ref,             # [HP, HP] bf16
                      br_ref, bz_ref, bni_ref, bnh_ref,         # [1, HP] f32
                      wq_ref, bq_ref, bgv_ref,                  # q_net / gv_net bias
                      w1_ref, b1_ref, w2_ref, b2_ref,           # classifier
                      logits_ref,                               # [TB, AP] f32
                      gi_r_ref, gi_z_ref, gi_n_ref):            # VMEM scratch [S,TB,HP] f32
    S, TB, EP = x_ref.shape
    HP = whhr_ref.shape[0]

    # ---- hoisted GRU input projection: one big matmul per gate ----
    x2 = x_ref[...].reshape(S * TB, EP)                         # bf16

    def proj(w_ref, b_ref):
        y = jnp.dot(x2, w_ref[...], preferred_element_type=jnp.float32)
        return (y + b_ref[...]).reshape(S, TB, HP)

    gi_r_ref[...] = proj(wihr_ref, br_ref)     # b_ir + b_hr pre-folded
    gi_z_ref[...] = proj(wihz_ref, bz_ref)     # b_iz + b_hz pre-folded
    gi_n_ref[...] = proj(wihn_ref, bni_ref)    # b_in only

    whh_r = whhr_ref[...]
    whh_z = whhz_ref[...]
    whh_n = whhn_ref[...]
    # hoist the [1,HP]->[TB,HP] broadcast out of the timestep loop
    bnh = jnp.broadcast_to(bnh_ref[...], (TB, HP))

    # ---- recurrence: only [TB,HP]x[HP,HP] matmuls on the serial path ----
    def step(t, h):
        hb = h.astype(jnp.bfloat16)
        gh_r = jnp.dot(hb, whh_r, preferred_element_type=jnp.float32)
        gh_z = jnp.dot(hb, whh_z, preferred_element_type=jnp.float32)
        gh_n = jnp.dot(hb, whh_n, preferred_element_type=jnp.float32)
        r = jax.nn.sigmoid(gi_r_ref[t] + gh_r)
        z = jax.nn.sigmoid(gi_z_ref[t] + gh_z)
        n = jnp.tanh(gi_n_ref[t] + r * (gh_n + bnh))
        return (1.0 - z) * n + z * h

    h = lax.fori_loop(0, S, step, jnp.zeros((TB, HP), jnp.float32), unroll=True)

    # ---- UpDn head with gv == 0 (forced by the module) ----
    # gv_emb = sum_k(att * 0) = 0  ->  gv_repr = relu(0 @ Wgv + bgv) = relu(bgv)
    gv_repr = jnp.maximum(bgv_ref[...], 0.0)                    # [1, HP]

    # q_net (FCNet: Linear + ReLU) and joint fusion
    q_repr = jnp.maximum(
        jnp.dot(h.astype(jnp.bfloat16), wq_ref[...],
                preferred_element_type=jnp.float32) + bq_ref[...], 0.0)
    joint = q_repr * gv_repr                                    # [TB, HP]

    # SimpleClassifier: Linear -> ReLU -> (dropout) -> Linear
    h1 = jnp.maximum(
        jnp.dot(joint.astype(jnp.bfloat16), w1_ref[...],
                preferred_element_type=jnp.float32) + b1_ref[...], 0.0)
    logits_ref[...] = (jnp.dot(h1.astype(jnp.bfloat16), w2_ref[...],
                               preferred_element_type=jnp.float32) + b2_ref[...])


# ----------------------------------------------------------------------------
# Wrapper
# ----------------------------------------------------------------------------
def _cost_estimate(S, BP, EP, HP, H1P, AP):
    flops = int(
        3 * 2 * (S * BP) * EP * HP          # hoisted per-gate input projections
        + S * 3 * 2 * BP * HP * HP          # recurrent matmuls
        + 12 * S * BP * HP                  # gate elementwise
        + 2 * BP * HP * HP                  # q_net
        + 2 * BP * HP * H1P                 # classifier fc1
        + 2 * BP * H1P * AP)                # classifier fc2
    transcendentals = int(3 * S * BP * HP)  # 2 sigmoids + 1 tanh per timestep
    bytes_accessed = int(
        2 * (S * BP * EP                    # x (bf16)
             + 3 * EP * HP + 3 * HP * HP    # GRU weights (bf16)
             + HP * HP + HP * H1P + H1P * AP)   # head weights (bf16)
        + 4 * (8 * HP + H1P + AP            # f32 biases
               + BP * AP))                  # logits out
    return pl.CostEstimate(flops=flops, transcendentals=transcendentals,
                           bytes_accessed=bytes_accessed)


def run_updn_fused(w_emb_t, params):
    """w_emb_t: [S, B, E] time-major word embeddings -> logits [B, A]."""
    S, B, E = w_emb_t.shape
    H = params['gru_whh'].shape[0]
    H1 = params['w1'].shape[1]
    A = params['w2'].shape[1]

    # padded / tiled sizes (lane dims -> x128, batch -> x16 for bf16 sublanes)
    TB = min(128, _round_up(B, 16))
    BP = _round_up(B, TB)
    EP = _round_up(E, 128)
    HP = _round_up(H, 128)
    H1P = _round_up(H1, 128)
    AP = _round_up(A, 128)

    bf16, f32 = jnp.bfloat16, jnp.float32

    def pad2(x, r, c, dt):
        return _pad_to(_pad_to(x, 0, r), 1, c).astype(dt)

    # GRU weights split per gate (PyTorch gate order r|z|n); bf16 operands.
    wih, whh = params['gru_wih'], params['gru_whh']
    bih, bhh = params['gru_bih'], params['gru_bhh']
    wih_r = pad2(wih[:, 0:H],       EP, HP, bf16)
    wih_z = pad2(wih[:, H:2 * H],   EP, HP, bf16)
    wih_n = pad2(wih[:, 2 * H:3 * H], EP, HP, bf16)
    whh_r = pad2(whh[:, 0:H],       HP, HP, bf16)
    whh_z = pad2(whh[:, H:2 * H],   HP, HP, bf16)
    whh_n = pad2(whh[:, 2 * H:3 * H], HP, HP, bf16)
    br = pad2(bih[:, 0:H] + bhh[:, 0:H],             1, HP, f32)
    bz = pad2(bih[:, H:2 * H] + bhh[:, H:2 * H],     1, HP, f32)
    bni = pad2(bih[:, 2 * H:3 * H],                  1, HP, f32)
    bnh = pad2(bhh[:, 2 * H:3 * H],                  1, HP, f32)

    wq = pad2(params['qnet_w'], HP, HP, bf16)
    bq = pad2(params['qnet_b'], 1, HP, f32)
    bgv = pad2(params['gvnet_b'], 1, HP, f32)
    w1 = pad2(params['w1'], HP, H1P, bf16)
    b1 = pad2(params['b1'], 1, H1P, f32)
    w2 = pad2(params['w2'], H1P, AP, bf16)
    b2 = pad2(params['b2'], 1, AP, f32)

    # kernel input: [S, BP, EP] bf16, batch padded with zero rows
    x = _pad_to(_pad_to(w_emb_t, 1, BP), 2, EP).astype(bf16)

    nbt = BP // TB

    def resident(shape):
        return pl.BlockSpec(shape, lambda i: (0, 0))

    grid_spec = pltpu.PrefetchScalarGridSpec(
        num_scalar_prefetch=0,
        grid=(nbt,),
        in_specs=[
            pl.BlockSpec((S, TB, EP), lambda i: (0, i, 0)),      # x: batch-tiled
            resident((EP, HP)), resident((EP, HP)), resident((EP, HP)),   # wih r/z/n
            resident((HP, HP)), resident((HP, HP)), resident((HP, HP)),   # whh r/z/n
            resident((1, HP)), resident((1, HP)),                          # br, bz
            resident((1, HP)), resident((1, HP)),                          # bni, bnh
            resident((HP, HP)), resident((1, HP)), resident((1, HP)),      # wq, bq, bgv
            resident((HP, H1P)), resident((1, H1P)),                       # w1, b1
            resident((H1P, AP)), resident((1, AP)),                        # w2, b2
        ],
        out_specs=pl.BlockSpec((TB, AP), lambda i: (i, 0)),
        scratch_shapes=[pltpu.VMEM((S, TB, HP), jnp.float32)] * 3,
    )

    logits_p = pl.pallas_call(
        updn_fused_kernel,
        out_shape=jax.ShapeDtypeStruct((BP, AP), jnp.float32),
        grid_spec=grid_spec,
        compiler_params=pltpu.CompilerParams(
            dimension_semantics=("parallel",),
            vmem_limit_bytes=32 * 1024 * 1024),
        cost_estimate=_cost_estimate(S, BP, EP, HP, H1P, AP),
    )(x,
      wih_r, wih_z, wih_n, whh_r, whh_z, whh_n,
      br, bz, bni, bnh,
      wq, bq, bgv,
      w1, b1, w2, b2)

    return logits_p[:B, :A]


def init_params(key, *, ntokens, emb_dim, num_hid, full_v_dim, num_ans):
    ks = jax.random.split(key, 20)
    s = 0.05

    def w(k, shape):
        return (s * jax.random.normal(k, shape)).astype(jnp.float32)

    emb_table = w(ks[0], (ntokens + 1, emb_dim))
    emb_table = emb_table.at[ntokens].set(0.0)      # padding_idx = ntokens

    params = {
        'emb_table': emb_table,
        # GRU (in_dim=300 -> num_hid); stored pre-transposed [E,3H]/[H,3H], gate order r|z|n.
        'gru_wih': w(ks[1], (emb_dim, 3 * num_hid)),
        'gru_whh': w(ks[2], (num_hid, 3 * num_hid)),
        'gru_bih': w(ks[3], (1, 3 * num_hid)),
        'gru_bhh': w(ks[4], (1, 3 * num_hid)),
        # UpDnAttention_ramen — mathematically dead at runtime because the module
        # zeroes gv (attention over zeros == 1/K); kept for parameter-set fidelity.
        'att_wv': w(ks[5], (full_v_dim, num_hid)),
        'att_bv': w(ks[6], (1, num_hid)),
        'att_wq': w(ks[7], (num_hid, num_hid)),
        'att_bq': w(ks[8], (1, num_hid)),
        'att_wl': w(ks[9], (num_hid, 1)),
        'att_bl': w(ks[10], (1, 1)),
        # q_net / gv_net (FCNet: Linear + ReLU). gv_net weight is dead (gv==0); bias is live.
        'qnet_w': w(ks[11], (num_hid, num_hid)),
        'qnet_b': w(ks[12], (1, num_hid)),
        'gvnet_w': w(ks[13], (full_v_dim, num_hid)),
        'gvnet_b': w(ks[14], (1, num_hid)),
        # SimpleClassifier
        'w1': w(ks[15], (num_hid, 2 * num_hid)),
        'b1': w(ks[16], (1, 2 * num_hid)),
        'w2': w(ks[17], (2 * num_hid, num_ans)),
        'b2': w(ks[18], (1, num_ans)),
    }
    return params


@jax.jit
def updn_ramen_forward(params, q, gv):
    # The module does `gv = torch.zeros(gv.size())`; the zeroing is folded into the
    # fused kernel math (att = 1/K, gv_emb = 0), so gv is only used for its shape.
    B = q.shape[0]
    K = gv.shape[1]
    # word embedding lookup, gathered directly in time-major order for the kernel
    w_emb_t = params['emb_table'][q.T]                       # [S, B, 300]
    w_emb = jnp.transpose(w_emb_t, (1, 0, 2))                # [B, S, 300] (module output)
    # fused GRU encoder + attention head + q_net/gv_net + classifier (Pallas)
    logits = run_updn_fused(w_emb_t, params)                 # [B, A]
    # attention over zeroed gv is exactly uniform -> constant, emitted in the wrapper
    att_gv = jnp.full((B, K, 1), 1.0 / K, dtype=jnp.float32)
    # TODO(synk): descending argsort has no clean Pallas equivalent; plain JAX.
    ansidx = jnp.argsort(-logits, axis=1)
    return w_emb, logits, att_gv, ansidx


if __name__ == "__main__":
    B, S = 2, 8            # batch, question length
    NTOKENS = 50
    EMB = 300              # GloVe dim fixed by the module
    H = 32                 # num_hid
    K = 8                  # number of objects
    V = 64                 # full_v_dim
    A = 16                 # num answer candidates

    key = jax.random.PRNGKey(0)
    kp, kq, kg = jax.random.split(key, 3)

    params = init_params(kp, ntokens=NTOKENS, emb_dim=EMB, num_hid=H,
                         full_v_dim=V, num_ans=A)
    q = jax.random.randint(kq, (B, S), 0, NTOKENS, dtype=jnp.int32)
    gv = jax.random.normal(kg, (B, K, V), dtype=jnp.float32)

    w_emb, logits, att_gv, ansidx = updn_ramen_forward(params, q, gv)
    jax.block_until_ready((w_emb, logits, att_gv, ansidx))

    assert w_emb.shape == (B, S, EMB)
    assert logits.shape == (B, A)
    assert att_gv.shape == (B, K, 1)
    assert ansidx.shape == (B, A)
    assert bool(jnp.all(jnp.isfinite(logits)))
    # attention over zeroed gv must be exactly uniform
    assert bool(jnp.allclose(att_gv, 1.0 / K))
    print("KERNEL_OK")
</pallas_src>

<mosaic_0001>
module attributes {stable_mosaic.version = 11 : i64} {
  func.func @updn_fused_kernel(%arg0: i32, %arg1: memref<8x16x384xbf16, #tpu.memory_space<vmem>>, %arg2: memref<384x128xbf16, #tpu.memory_space<vmem>>, %arg3: memref<384x128xbf16, #tpu.memory_space<vmem>>, %arg4: memref<384x128xbf16, #tpu.memory_space<vmem>>, %arg5: memref<128x128xbf16, #tpu.memory_space<vmem>>, %arg6: memref<128x128xbf16, #tpu.memory_space<vmem>>, %arg7: memref<128x128xbf16, #tpu.memory_space<vmem>>, %arg8: memref<1x128xf32, #tpu.memory_space<vmem>>, %arg9: memref<1x128xf32, #tpu.memory_space<vmem>>, %arg10: memref<1x128xf32, #tpu.memory_space<vmem>>, %arg11: memref<1x128xf32, #tpu.memory_space<vmem>>, %arg12: memref<128x128xbf16, #tpu.memory_space<vmem>>, %arg13: memref<1x128xf32, #tpu.memory_space<vmem>>, %arg14: memref<1x128xf32, #tpu.memory_space<vmem>>, %arg15: memref<128x128xbf16, #tpu.memory_space<vmem>>, %arg16: memref<1x128xf32, #tpu.memory_space<vmem>>, %arg17: memref<128x128xbf16, #tpu.memory_space<vmem>>, %arg18: memref<1x128xf32, #tpu.memory_space<vmem>>, %arg19: memref<16x128xf32, #tpu.memory_space<vmem>>, %arg20: memref<8x16x128xf32, #tpu.memory_space<vmem>>, %arg21: memref<8x16x128xf32, #tpu.memory_space<vmem>>, %arg22: memref<8x16x128xf32, #tpu.memory_space<vmem>>) attributes {dimension_semantics = [#tpu.dimension_semantics<parallel>], iteration_bounds = array<i64: 1>, scalar_prefetch = 0 : i64, scratch_operands = 3 : i64, tpu.core_type = #tpu.core_type<tc>, window_params = [{transform_indices = @transform_0, window_bounds = array<i64: 8, 16, 384>}, {pipeline_mode = #tpu.pipeline_mode<synchronous>, transform_indices = @transform_1, window_bounds = array<i64: 384, 128>}, {pipeline_mode = #tpu.pipeline_mode<synchronous>, transform_indices = @transform_2, window_bounds = array<i64: 384, 128>}, {pipeline_mode = #tpu.pipeline_mode<synchronous>, transform_indices = @transform_3, window_bounds = array<i64: 384, 128>}, {pipeline_mode = #tpu.pipeline_mode<synchronous>, transform_indices = @transform_4, window_bounds = array<i64: 128, 128>}, {pipeline_mode = #tpu.pipeline_mode<synchronous>, transform_indices = @transform_5, window_bounds = array<i64: 128, 128>}, {pipeline_mode = #tpu.pipeline_mode<synchronous>, transform_indices = @transform_6, window_bounds = array<i64: 128, 128>}, {pipeline_mode = #tpu.pipeline_mode<synchronous>, transform_indices = @transform_7, window_bounds = array<i64: 1, 128>}, {pipeline_mode = #tpu.pipeline_mode<synchronous>, transform_indices = @transform_8, window_bounds = array<i64: 1, 128>}, {pipeline_mode = #tpu.pipeline_mode<synchronous>, transform_indices = @transform_9, window_bounds = array<i64: 1, 128>}, {pipeline_mode = #tpu.pipeline_mode<synchronous>, transform_indices = @transform_10, window_bounds = array<i64: 1, 128>}, {pipeline_mode = #tpu.pipeline_mode<synchronous>, transform_indices = @transform_11, window_bounds = array<i64: 128, 128>}, {pipeline_mode = #tpu.pipeline_mode<synchronous>, transform_indices = @transform_12, window_bounds = array<i64: 1, 128>}, {pipeline_mode = #tpu.pipeline_mode<synchronous>, transform_indices = @transform_13, window_bounds = array<i64: 1, 128>}, {pipeline_mode = #tpu.pipeline_mode<synchronous>, transform_indices = @transform_14, window_bounds = array<i64: 128, 128>}, {pipeline_mode = #tpu.pipeline_mode<synchronous>, transform_indices = @transform_15, window_bounds = array<i64: 1, 128>}, {pipeline_mode = #tpu.pipeline_mode<synchronous>, transform_indices = @transform_16, window_bounds = array<i64: 128, 128>}, {pipeline_mode = #tpu.pipeline_mode<synchronous>, transform_indices = @transform_17, window_bounds = array<i64: 1, 128>}, {transform_indices = @transform_18, window_bounds = array<i64: 16, 128>}]} {
    %c0 = arith.constant 0 : index
    %c0_0 = arith.constant 0 : index
    %c0_1 = arith.constant 0 : index
    %0 = vector.load %arg1[%c0, %c0_0, %c0_1] : memref<8x16x384xbf16, #tpu.memory_space<vmem>>, vector<8x16x384xbf16>
    %1 = vector.shape_cast %0 : vector<8x16x384xbf16> to vector<128x384xbf16>
    %c0_2 = arith.constant 0 : index
    %c0_3 = arith.constant 0 : index
    %2 = vector.load %arg2[%c0_2, %c0_3] : memref<384x128xbf16, #tpu.memory_space<vmem>>, vector<384x128xbf16>
    %cst = arith.constant dense<0.000000e+00> : vector<128x128xf32>
    %3 = tpu.matmul %1, %2, %cst {dimension_numbers = #tpu.dot_dimension_numbers<[1], [0], [0], [1], [0, 0, 1, 1], [], []>} : vector<128x384xbf16>, vector<384x128xbf16>, vector<128x128xf32> -> vector<128x128xf32>
    %c0_4 = arith.constant 0 : index
    %c0_5 = arith.constant 0 : index
    %4 = vector.load %arg8[%c0_4, %c0_5] : memref<1x128xf32, #tpu.memory_space<vmem>>, vector<1x128xf32>
    %5 = vector.broadcast %4 : vector<1x128xf32> to vector<128x128xf32>
    %6 = arith.addf %3, %5 : vector<128x128xf32>
    %7 = vector.shape_cast %6 : vector<128x128xf32> to vector<8x16x128xf32>
    %c0_6 = arith.constant 0 : index
    %c0_7 = arith.constant 0 : index
    %c0_8 = arith.constant 0 : index
    %8 = vector.load %arg20[%c0_6, %c0_7, %c0_8] : memref<8x16x128xf32, #tpu.memory_space<vmem>>, vector<8x16x128xf32>
    tpu.vector_store %arg20[%c0_6, %c0_7, %c0_8], %7 {strides = array<i32>} : memref<8x16x128xf32, #tpu.memory_space<vmem>>, vector<8x16x128xf32>,
    %c0_9 = arith.constant 0 : index
    %c0_10 = arith.constant 0 : index
    %9 = vector.load %arg3[%c0_9, %c0_10] : memref<384x128xbf16, #tpu.memory_space<vmem>>, vector<384x128xbf16>
    %cst_11 = arith.constant dense<0.000000e+00> : vector<128x128xf32>
    %10 = tpu.matmul %1, %9, %cst_11 {dimension_numbers = #tpu.dot_dimension_numbers<[1], [0], [0], [1], [0, 0, 1, 1], [], []>} : vector<128x384xbf16>, vector<384x128xbf16>, vector<128x128xf32> -> vector<128x128xf32>
    %c0_12 = arith.constant 0 : index
    %c0_13 = arith.constant 0 : index
    %11 = vector.load %arg9[%c0_12, %c0_13] : memref<1x128xf32, #tpu.memory_space<vmem>>, vector<1x128xf32>
    %12 = vector.broadcast %11 : vector<1x128xf32> to vector<128x128xf32>
    %13 = arith.addf %10, %12 : vector<128x128xf32>
    %14 = vector.shape_cast %13 : vector<128x128xf32> to vector<8x16x128xf32>
    %c0_14 = arith.constant 0 : index
    %c0_15 = arith.constant 0 : index
    %c0_16 = arith.constant 0 : index
    %15 = vector.load %arg21[%c0_14, %c0_15, %c0_16] : memref<8x16x128xf32, #tpu.memory_space<vmem>>, vector<8x16x128xf32>
    tpu.vector_store %arg21[%c0_14, %c0_15, %c0_16], %14 {strides = array<i32>} : memref<8x16x128xf32, #tpu.memory_space<vmem>>, vector<8x16x128xf32>,
    %c0_17 = arith.constant 0 : index
    %c0_18 = arith.constant 0 : index
    %16 = vector.load %arg4[%c0_17, %c0_18] : memref<384x128xbf16, #tpu.memory_space<vmem>>, vector<384x128xbf16>
    %cst_19 = arith.constant dense<0.000000e+00> : vector<128x128xf32>
    %17 = tpu.matmul %1, %16, %cst_19 {dimension_numbers = #tpu.dot_dimension_numbers<[1], [0], [0], [1], [0, 0, 1, 1], [], []>} : vector<128x384xbf16>, vector<384x128xbf16>, vector<128x128xf32> -> vector<128x128xf32>
    %c0_20 = arith.constant 0 : index
    %c0_21 = arith.constant 0 : index
    %18 = vector.load %arg10[%c0_20, %c0_21] : memref<1x128xf32, #tpu.memory_space<vmem>>, vector<1x128xf32>
    %19 = vector.broadcast %18 : vector<1x128xf32> to vector<128x128xf32>
    %20 = arith.addf %17, %19 : vector<128x128xf32>
    %21 = vector.shape_cast %20 : vector<128x128xf32> to vector<8x16x128xf32>
    %c0_22 = arith.constant 0 : index
    %c0_23 = arith.constant 0 : index
    %c0_24 = arith.constant 0 : index
    %22 = vector.load %arg22[%c0_22, %c0_23, %c0_24] : memref<8x16x128xf32, #tpu.memory_space<vmem>>, vector<8x16x128xf32>
    tpu.vector_store %arg22[%c0_22, %c0_23, %c0_24], %21 {strides = array<i32>} : memref<8x16x128xf32, #tpu.memory_space<vmem>>, vector<8x16x128xf32>,
    %c0_25 = arith.constant 0 : index
    %c0_26 = arith.constant 0 : index
    %23 = vector.load %arg5[%c0_25, %c0_26] : memref<128x128xbf16, #tpu.memory_space<vmem>>, vector<128x128xbf16>
    %c0_27 = arith.constant 0 : index
    %c0_28 = arith.constant 0 : index
    %24 = vector.load %arg6[%c0_27, %c0_28] : memref<128x128xbf16, #tpu.memory_space<vmem>>, vector<128x128xbf16>
    %c0_29 = arith.constant 0 : index
    %c0_30 = arith.constant 0 : index
    %25 = vector.load %arg7[%c0_29, %c0_30] : memref<128x128xbf16, #tpu.memory_space<vmem>>, vector<128x128xbf16>
    %c0_31 = arith.constant 0 : index
    %c0_32 = arith.constant 0 : index
    %26 = vector.load %arg11[%c0_31, %c0_32] : memref<1x128xf32, #tpu.memory_space<vmem>>, vector<1x128xf32>
    %27 = vector.shape_cast %26 : vector<1x128xf32> to vector<1x128xf32>
    %28 = vector.broadcast %27 : vector<1x128xf32> to vector<16x128xf32>
    %cst_33 = arith.constant 0.000000e+00 : f32
    %29 = vector.broadcast %cst_33 : f32 to vector<16x128xf32>
    %c0_i32 = arith.constant 0 : i32
    %30 = arith.truncf %29 : vector<16x128xf32> to vector<16x128xbf16>
    %cst_34 = arith.constant dense<0.000000e+00> : vector<16x128xf32>
    %31 = tpu.matmul %30, %23, %cst_34 {dimension_numbers = #tpu.dot_dimension_numbers<[1], [0], [0], [1], [0, 0, 1, 1], [], []>} : vector<16x128xbf16>, vector<128x128xbf16>, vector<16x128xf32> -> vector<16x128xf32>
    %cst_35 = arith.constant dense<0.000000e+00> : vector<16x128xf32>
    %32 = tpu.matmul %30, %24, %cst_35 {dimension_numbers = #tpu.dot_dimension_numbers<[1], [0], [0], [1], [0, 0, 1, 1], [], []>} : vector<16x128xbf16>, vector<128x128xbf16>, vector<16x128xf32> -> vector<16x128xf32>
    %cst_36 = arith.constant dense<0.000000e+00> : vector<16x128xf32>
    %33 = tpu.matmul %30, %25, %cst_36 {dimension_numbers = #tpu.dot_dimension_numbers<[1], [0], [0], [1], [0, 0, 1, 1], [], []>} : vector<16x128xbf16>, vector<128x128xbf16>, vector<16x128xf32> -> vector<16x128xf32>
    %34 = arith.index_cast %c0_i32 : i32 to index
    %c0_37 = arith.constant 0 : index
    %c0_38 = arith.constant 0 : index
    %35 = vector.load %arg20[%34, %c0_37, %c0_38] : memref<8x16x128xf32, #tpu.memory_space<vmem>>, vector<1x16x128xf32>
    %36 = vector.shape_cast %35 : vector<1x16x128xf32> to vector<16x128xf32>
    %37 = arith.addf %36, %31 : vector<16x128xf32>
    %38 = arith.negf %37 : vector<16x128xf32>
    %39 = math.exp %38 : vector<16x128xf32>
    %cst_39 = arith.constant 1.000000e+00 : f32
    %40 = vector.broadcast %cst_39 : f32 to vector<16x128xf32>
    %41 = arith.addf %40, %39 : vector<16x128xf32>
    %42 = arith.divf %40, %41 : vector<16x128xf32>
    %43 = arith.index_cast %c0_i32 : i32 to index
    %c0_40 = arith.constant 0 : index
    %c0_41 = arith.constant 0 : index
    %44 = vector.load %arg21[%43, %c0_40, %c0_41] : memref<8x16x128xf32, #tpu.memory_space<vmem>>, vector<1x16x128xf32>
    %45 = vector.shape_cast %44 : vector<1x16x128xf32> to vector<16x128xf32>
    %46 = arith.addf %45, %32 : vector<16x128xf32>
    %47 = arith.negf %46 : vector<16x128xf32>
    %48 = math.exp %47 : vector<16x128xf32>
    %cst_42 = arith.constant 1.000000e+00 : f32
    %49 = vector.broadcast %cst_42 : f32 to vector<16x128xf32>
    %50 = arith.addf %49, %48 : vector<16x128xf32>
    %51 = arith.divf %49, %50 : vector<16x128xf32>
    %52 = arith.index_cast %c0_i32 : i32 to index
    %c0_43 = arith.constant 0 : index
    %c0_44 = arith.constant 0 : index
    %53 = vector.load %arg22[%52, %c0_43, %c0_44] : memref<8x16x128xf32, #tpu.memory_space<vmem>>, vector<1x16x128xf32>
    %54 = vector.shape_cast %53 : vector<1x16x128xf32> to vector<16x128xf32>
    %55 = arith.addf %33, %28 : vector<16x128xf32>
    %56 = arith.mulf %42, %55 : vector<16x128xf32>
    %57 = arith.addf %54, %56 : vector<16x128xf32>
    %58 = math.tanh %57 : vector<16x128xf32>
    %cst_45 = arith.constant 1.000000e+00 : f32
    %59 = vector.broadcast %cst_45 : f32 to vector<16x128xf32>
    %60 = arith.subf %59, %51 : vector<16x128xf32>
    %61 = arith.mulf %60, %58 : vector<16x128xf32>
    %62 = arith.mulf %51, %29 : vector<16x128xf32>
    %63 = arith.addf %61, %62 : vector<16x128xf32>
    %c1_i32 = arith.constant 1 : i32
    %64 = arith.truncf %63 : vector<16x128xf32> to vector<16x128xbf16>
    %cst_46 = arith.constant dense<0.000000e+00> : vector<16x128xf32>
    %65 = tpu.matmul %64, %23, %cst_46 {dimension_numbers = #tpu.dot_dimension_numbers<[1], [0], [0], [1], [0, 0, 1, 1], [], []>} : vector<16x128xbf16>, vector<128x128xbf16>, vector<16x128xf32> -> vector<16x128xf32>
    %cst_47 = arith.constant dense<0.000000e+00> : vector<16x128xf32>
    %66 = tpu.matmul %64, %24, %cst_47 {dimension_numbers = #tpu.dot_dimension_numbers<[1], [0], [0], [1], [0, 0, 1, 1], [], []>} : vector<16x128xbf16>, vector<128x128xbf16>, vector<16x128xf32> -> vector<16x128xf32>
    %cst_48 = arith.constant dense<0.000000e+00> : vector<16x128xf32>
    %67 = tpu.matmul %64, %25, %cst_48 {dimension_numbers = #tpu.dot_dimension_numbers<[1], [0], [0], [1], [0, 0, 1, 1], [], []>} : vector<16x128xbf16>, vector<128x128xbf16>, vector<16x128xf32> -> vector<16x128xf32>
    %68 = arith.index_cast %c1_i32 : i32 to index
    %c0_49 = arith.constant 0 : index
    %c0_50 = arith.constant 0 : index
    %69 = vector.load %arg20[%68, %c0_49, %c0_50] : memref<8x16x128xf32, #tpu.memory_space<vmem>>, vector<1x16x128xf32>
    %70 = vector.shape_cast %69 : vector<1x16x128xf32> to vector<16x128xf32>
    %71 = arith.addf %70, %65 : vector<16x128xf32>
    %72 = arith.negf %71 : vector<16x128xf32>
    %73 = math.exp %72 : vector<16x128xf32>
    %cst_51 = arith.constant 1.000000e+00 : f32
    %74 = vector.broadcast %cst_51 : f32 to vector<16x128xf32>
    %75 = arith.addf %74, %73 : vector<16x128xf32>
    %76 = arith.divf %74, %75 : vector<16x128xf32>
    %77 = arith.index_cast %c1_i32 : i32 to index
    %c0_52 = arith.constant 0 : index
    %c0_53 = arith.constant 0 : index
    %78 = vector.load %arg21[%77, %c0_52, %c0_53] : memref<8x16x128xf32, #tpu.memory_space<vmem>>, vector<1x16x128xf32>
    %79 = vector.shape_cast %78 : vector<1x16x128xf32> to vector<16x128xf32>
    %80 = arith.addf %79, %66 : vector<16x128xf32>
    %81 = arith.negf %80 : vector<16x128xf32>
    %82 = math.exp %81 : vector<16x128xf32>
    %cst_54 = arith.constant 1.000000e+00 : f32
    %83 = vector.broadcast %cst_54 : f32 to vector<16x128xf32>
    %84 = arith.addf %83, %82 : vector<16x128xf32>
    %85 = arith.divf %83, %84 : vector<16x128xf32>
    %86 = arith.index_cast %c1_i32 : i32 to index
    %c0_55 = arith.constant 0 : index
    %c0_56 = arith.constant 0 : index
    %87 = vector.load %arg22[%86, %c0_55, %c0_56] : memref<8x16x128xf32, #tpu.memory_space<vmem>>, vector<1x16x128xf32>
    %88 = vector.shape_cast %87 : vector<1x16x128xf32> to vector<16x128xf32>
    %89 = arith.addf %67, %28 : vector<16x128xf32>
    %90 = arith.mulf %76, %89 : vector<16x128xf32>
    %91 = arith.addf %88, %90 : vector<16x128xf32>
    %92 = math.tanh %91 : vector<16x128xf32>
    %cst_57 = arith.constant 1.000000e+00 : f32
    %93 = vector.broadcast %cst_57 : f32 to vector<16x128xf32>
    %94 = arith.subf %93, %85 : vector<16x128xf32>
    %95 = arith.mulf %94, %92 : vector<16x128xf32>
    %96 = arith.mulf %85, %63 : vector<16x128xf32>
    %97 = arith.addf %95, %96 : vector<16x128xf32>
    %c2_i32 = arith.constant 2 : i32
    %98 = arith.truncf %97 : vector<16x128xf32> to vector<16x128xbf16>
    %cst_58 = arith.constant dense<0.000000e+00> : vector<16x128xf32>
    %99 = tpu.matmul %98, %23, %cst_58 {dimension_numbers = #tpu.dot_dimension_numbers<[1], [0], [0], [1], [0, 0, 1, 1], [], []>} : vector<16x128xbf16>, vector<128x128xbf16>, vector<16x128xf32> -> vector<16x128xf32>
    %cst_59 = arith.constant dense<0.000000e+00> : vector<16x128xf32>
    %100 = tpu.matmul %98, %24, %cst_59 {dimension_numbers = #tpu.dot_dimension_numbers<[1], [0], [0], [1], [0, 0, 1, 1], [], []>} : vector<16x128xbf16>, vector<128x128xbf16>, vector<16x128xf32> -> vector<16x128xf32>
    %cst_60 = arith.constant dense<0.000000e+00> : vector<16x128xf32>
    %101 = tpu.matmul %98, %25, %cst_60 {dimension_numbers = #tpu.dot_dimension_numbers<[1], [0], [0], [1], [0, 0, 1, 1], [], []>} : vector<16x128xbf16>, vector<128x128xbf16>, vector<16x128xf32> -> vector<16x128xf32>
    %102 = arith.index_cast %c2_i32 : i32 to index
    %c0_61 = arith.constant 0 : index
    %c0_62 = arith.constant 0 : index
    %103 = vector.load %arg20[%102, %c0_61, %c0_62] : memref<8x16x128xf32, #tpu.memory_space<vmem>>, vector<1x16x128xf32>
    %104 = vector.shape_cast %103 : vector<1x16x128xf32> to vector<16x128xf32>
    %105 = arith.addf %104, %99 : vector<16x128xf32>
    %106 = arith.negf %105 : vector<16x128xf32>
    %107 = math.exp %106 : vector<16x128xf32>
    %cst_63 = arith.constant 1.000000e+00 : f32
    %108 = vector.broadcast %cst_63 : f32 to vector<16x128xf32>
    %109 = arith.addf %108, %107 : vector<16x128xf32>
    %110 = arith.divf %108, %109 : vector<16x128xf32>
    %111 = arith.index_cast %c2_i32 : i32 to index
    %c0_64 = arith.constant 0 : index
    %c0_65 = arith.constant 0 : index
    %112 = vector.load %arg21[%111, %c0_64, %c0_65] : memref<8x16x128xf32, #tpu.memory_space<vmem>>, vector<1x16x128xf32>
    %113 = vector.shape_cast %112 : vector<1x16x128xf32> to vector<16x128xf32>
    %114 = arith.addf %113, %100 : vector<16x128xf32>
    %115 = arith.negf %114 : vector<16x128xf32>
    %116 = math.exp %115 : vector<16x128xf32>
    %cst_66 = arith.constant 1.000000e+00 : f32
    %117 = vector.broadcast %cst_66 : f32 to vector<16x128xf32>
    %118 = arith.addf %117, %116 : vector<16x128xf32>
    %119 = arith.divf %117, %118 : vector<16x128xf32>
    %120 = arith.index_cast %c2_i32 : i32 to index
    %c0_67 = arith.constant 0 : index
    %c0_68 = arith.constant 0 : index
    %121 = vector.load %arg22[%120, %c0_67, %c0_68] : memref<8x16x128xf32, #tpu.memory_space<vmem>>, vector<1x16x128xf32>
    %122 = vector.shape_cast %121 : vector<1x16x128xf32> to vector<16x128xf32>
    %123 = arith.addf %101, %28 : vector<16x128xf32>
    %124 = arith.mulf %110, %123 : vector<16x128xf32>
    %125 = arith.addf %122, %124 : vector<16x128xf32>
    %126 = math.tanh %125 : vector<16x128xf32>
    %cst_69 = arith.constant 1.000000e+00 : f32
    %127 = vector.broadcast %cst_69 : f32 to vector<16x128xf32>
    %128 = arith.subf %127, %119 : vector<16x128xf32>
    %129 = arith.mulf %128, %126 : vector<16x128xf32>
    %130 = arith.mulf %119, %97 : vector<16x128xf32>
    %131 = arith.addf %129, %130 : vector<16x128xf32>
    %c3_i32 = arith.constant 3 : i32
    %132 = arith.truncf %131 : vector<16x128xf32> to vector<16x128xbf16>
    %cst_70 = arith.constant dense<0.000000e+00> : vector<16x128xf32>
    %133 = tpu.matmul %132, %23, %cst_70 {dimension_numbers = #tpu.dot_dimension_numbers<[1], [0], [0], [1], [0, 0, 1, 1], [], []>} : vector<16x128xbf16>, vector<128x128xbf16>, vector<16x128xf32> -> vector<16x128xf32>
    %cst_71 = arith.constant dense<0.000000e+00> : vector<16x128xf32>
    %134 = tpu.matmul %132, %24, %cst_71 {dimension_numbers = #tpu.dot_dimension_numbers<[1], [0], [0], [1], [0, 0, 1, 1], [], []>} : vector<16x128xbf16>, vector<128x128xbf16>, vector<16x128xf32> -> vector<16x128xf32>
    %cst_72 = arith.constant dense<0.000000e+00> : vector<16x128xf32>
    %135 = tpu.matmul %132, %25, %cst_72 {dimension_numbers = #tpu.dot_dimension_numbers<[1], [0], [0], [1], [0, 0, 1, 1], [], []>} : vector<16x128xbf16>, vector<128x128xbf16>, vector<16x128xf32> -> vector<16x128xf32>
    %136 = arith.index_cast %c3_i32 : i32 to index
    %c0_73 = arith.constant 0 : index
    %c0_74 = arith.constant 0 : index
    %137 = vector.load %arg20[%136, %c0_73, %c0_74] : memref<8x16x128xf32, #tpu.memory_space<vmem>>, vector<1x16x128xf32>
    %138 = vector.shape_cast %137 : vector<1x16x128xf32> to vector<16x128xf32>
    %139 = arith.addf %138, %133 : vector<16x128xf32>
    %140 = arith.negf %139 : vector<16x128xf32>
    %141 = math.exp %140 : vector<16x128xf32>
    %cst_75 = arith.constant 1.000000e+00 : f32
    %142 = vector.broadcast %cst_75 : f32 to vector<16x128xf32>
    %143 = arith.addf %142, %141 : vector<16x128xf32>
    %144 = arith.divf %142, %143 : vector<16x128xf32>
    %145 = arith.index_cast %c3_i32 : i32 to index
    %c0_76 = arith.constant 0 : index
    %c0_77 = arith.constant 0 : index
    %146 = vector.load %arg21[%145, %c0_76, %c0_77] : memref<8x16x128xf32, #tpu.memory_space<vmem>>, vector<1x16x128xf32>
    %147 = vector.shape_cast %146 : vector<1x16x128xf32> to vector<16x128xf32>
    %148 = arith.addf %147, %134 : vector<16x128xf32>
    %149 = arith.negf %148 : vector<16x128xf32>
    %150 = math.exp %149 : vector<16x128xf32>
    %cst_78 = arith.constant 1.000000e+00 : f32
    %151 = vector.broadcast %cst_78 : f32 to vector<16x128xf32>
    %152 = arith.addf %151, %150 : vector<16x128xf32>
    %153 = arith.divf %151, %152 : vector<16x128xf32>
    %154 = arith.index_cast %c3_i32 : i32 to index
    %c0_79 = arith.constant 0 : index
    %c0_80 = arith.constant 0 : index
    %155 = vector.load %arg22[%154, %c0_79, %c0_80] : memref<8x16x128xf32, #tpu.memory_space<vmem>>, vector<1x16x128xf32>
    %156 = vector.shape_cast %155 : vector<1x16x128xf32> to vector<16x128xf32>
    %157 = arith.addf %135, %28 : vector<16x128xf32>
    %158 = arith.mulf %144, %157 : vector<16x128xf32>
    %159 = arith.addf %156, %158 : vector<16x128xf32>
    %160 = math.tanh %159 : vector<16x128xf32>
    %cst_81 = arith.constant 1.000000e+00 : f32
    %161 = vector.broadcast %cst_81 : f32 to vector<16x128xf32>
    %162 = arith.subf %161, %153 : vector<16x128xf32>
    %163 = arith.mulf %162, %160 : vector<16x128xf32>
    %164 = arith.mulf %153, %131 : vector<16x128xf32>
    %165 = arith.addf %163, %164 : vector<16x128xf32>
    %c4_i32 = arith.constant 4 : i32
    %166 = arith.truncf %165 : vector<16x128xf32> to vector<16x128xbf16>
    %cst_82 = arith.constant dense<0.000000e+00> : vector<16x128xf32>
    %167 = tpu.matmul %166, %23, %cst_82 {dimension_numbers = #tpu.dot_dimension_numbers<[1], [0], [0], [1], [0, 0, 1, 1], [], []>} : vector<16x128xbf16>, vector<128x128xbf16>, vector<16x128xf32> -> vector<16x128xf32>
    %cst_83 = arith.constant dense<0.000000e+00> : vector<16x128xf32>
    %168 = tpu.matmul %166, %24, %cst_83 {dimension_numbers = #tpu.dot_dimension_numbers<[1], [0], [0], [1], [0, 0, 1, 1], [], []>} : vector<16x128xbf16>, vector<128x128xbf16>, vector<16x128xf32> -> vector<16x128xf32>
    %cst_84 = arith.constant dense<0.000000e+00> : vector<16x128xf32>
    %169 = tpu.matmul %166, %25, %cst_84 {dimension_numbers = #tpu.dot_dimension_numbers<[1], [0], [0], [1], [0, 0, 1, 1], [], []>} : vector<16x128xbf16>, vector<128x128xbf16>, vector<16x128xf32> -> vector<16x128xf32>
    %170 = arith.index_cast %c4_i32 : i32 to index
    %c0_85 = arith.constant 0 : index
    %c0_86 = arith.constant 0 : index
    %171 = vector.load %arg20[%170, %c0_85, %c0_86] : memref<8x16x128xf32, #tpu.memory_space<vmem>>, vector<1x16x128xf32>
    %172 = vector.shape_cast %171 : vector<1x16x128xf32> to vector<16x128xf32>
    %173 = arith.addf %172, %167 : vector<16x128xf32>
    %174 = arith.negf %173 : vector<16x128xf32>
    %175 = math.exp %174 : vector<16x128xf32>
    %cst_87 = arith.constant 1.000000e+00 : f32
    %176 = vector.broadcast %cst_87 : f32 to vector<16x128xf32>
    %177 = arith.addf %176, %175 : vector<16x128xf32>
    %178 = arith.divf %176, %177 : vector<16x128xf32>
    %179 = arith.index_cast %c4_i32 : i32 to index
    %c0_88 = arith.constant 0 : index
    %c0_89 = arith.constant 0 : index
    %180 = vector.load %arg21[%179, %c0_88, %c0_89] : memref<8x16x128xf32, #tpu.memory_space<vmem>>, vector<1x16x128xf32>
    %181 = vector.shape_cast %180 : vector<1x16x128xf32> to vector<16x128xf32>
    %182 = arith.addf %181, %168 : vector<16x128xf32>
    %183 = arith.negf %182 : vector<16x128xf32>
    %184 = math.exp %183 : vector<16x128xf32>
    %cst_90 = arith.constant 1.000000e+00 : f32
    %185 = vector.broadcast %cst_90 : f32 to vector<16x128xf32>
    %186 = arith.addf %185, %184 : vector<16x128xf32>
    %187 = arith.divf %185, %186 : vector<16x128xf32>
    %188 = arith.index_cast %c4_i32 : i32 to index
    %c0_91 = arith.constant 0 : index
    %c0_92 = arith.constant 0 : index
    %189 = vector.load %arg22[%188, %c0_91, %c0_92] : memref<8x16x128xf32, #tpu.memory_space<vmem>>, vector<1x16x128xf32>
    %190 = vector.shape_cast %189 : vector<1x16x128xf32> to vector<16x128xf32>
    %191 = arith.addf %169, %28 : vector<16x128xf32>
    %192 = arith.mulf %178, %191 : vector<16x128xf32>
    %193 = arith.addf %190, %192 : vector<16x128xf32>
    %194 = math.tanh %193 : vector<16x128xf32>
    %cst_93 = arith.constant 1.000000e+00 : f32
    %195 = vector.broadcast %cst_93 : f32 to vector<16x128xf32>
    %196 = arith.subf %195, %187 : vector<16x128xf32>
    %197 = arith.mulf %196, %194 : vector<16x128xf32>
    %198 = arith.mulf %187, %165 : vector<16x128xf32>
    %199 = arith.addf %197, %198 : vector<16x128xf32>
    %c5_i32 = arith.constant 5 : i32
    %200 = arith.truncf %199 : vector<16x128xf32> to vector<16x128xbf16>
    %cst_94 = arith.constant dense<0.000000e+00> : vector<16x128xf32>
    %201 = tpu.matmul %200, %23, %cst_94 {dimension_numbers = #tpu.dot_dimension_numbers<[1], [0], [0], [1], [0, 0, 1, 1], [], []>} : vector<16x128xbf16>, vector<128x128xbf16>, vector<16x128xf32> -> vector<16x128xf32>
    %cst_95 = arith.constant dense<0.000000e+00> : vector<16x128xf32>
    %202 = tpu.matmul %200, %24, %cst_95 {dimension_numbers = #tpu.dot_dimension_numbers<[1], [0], [0], [1], [0, 0, 1, 1], [], []>} : vector<16x128xbf16>, vector<128x128xbf16>, vector<16x128xf32> -> vector<16x128xf32>
    %cst_96 = arith.constant dense<0.000000e+00> : vector<16x128xf32>
    %203 = tpu.matmul %200, %25, %cst_96 {dimension_numbers = #tpu.dot_dimension_numbers<[1], [0], [0], [1], [0, 0, 1, 1], [], []>} : vector<16x128xbf16>, vector<128x128xbf16>, vector<16x128xf32> -> vector<16x128xf32>
    %204 = arith.index_cast %c5_i32 : i32 to index
    %c0_97 = arith.constant 0 : index
    %c0_98 = arith.constant 0 : index
    %205 = vector.load %arg20[%204, %c0_97, %c0_98] : memref<8x16x128xf32, #tpu.memory_space<vmem>>, vector<1x16x128xf32>
    %206 = vector.shape_cast %205 : vector<1x16x128xf32> to vector<16x128xf32>
    %207 = arith.addf %206, %201 : vector<16x128xf32>
    %208 = arith.negf %207 : vector<16x128xf32>
    %209 = math.exp %208 : vector<16x128xf32>
    %cst_99 = arith.constant 1.000000e+00 : f32
    %210 = vector.broadcast %cst_99 : f32 to vector<16x128xf32>
    %211 = arith.addf %210, %209 : vector<16x128xf32>
    %212 = arith.divf %210, %211 : vector<16x128xf32>
    %213 = arith.index_cast %c5_i32 : i32 to index
    %c0_100 = arith.constant 0 : index
    %c0_101 = arith.constant 0 : index
    %214 = vector.load %arg21[%213, %c0_100, %c0_101] : memref<8x16x128xf32, #tpu.memory_space<vmem>>, vector<1x16x128xf32>
    %215 = vector.shape_cast %214 : vector<1x16x128xf32> to vector<16x128xf32>
    %216 = arith.addf %215, %202 : vector<16x128xf32>
    %217 = arith.negf %216 : vector<16x128xf32>
    %218 = math.exp %217 : vector<16x128xf32>
    %cst_102 = arith.constant 1.000000e+00 : f32
    %219 = vector.broadcast %cst_102 : f32 to vector<16x128xf32>
    %220 = arith.addf %219, %218 : vector<16x128xf32>
    %221 = arith.divf %219, %220 : vector<16x128xf32>
    %222 = arith.index_cast %c5_i32 : i32 to index
    %c0_103 = arith.constant 0 : index
    %c0_104 = arith.constant 0 : index
    %223 = vector.load %arg22[%222, %c0_103, %c0_104] : memref<8x16x128xf32, #tpu.memory_space<vmem>>, vector<1x16x128xf32>
    %224 = vector.shape_cast %223 : vector<1x16x128xf32> to vector<16x128xf32>
    %225 = arith.addf %203, %28 : vector<16x128xf32>
    %226 = arith.mulf %212, %225 : vector<16x128xf32>
    %227 = arith.addf %224, %226 : vector<16x128xf32>
    %228 = math.tanh %227 : vector<16x128xf32>
    %cst_105 = arith.constant 1.000000e+00 : f32
    %229 = vector.broadcast %cst_105 : f32 to vector<16x128xf32>
    %230 = arith.subf %229, %221 : vector<16x128xf32>
    %231 = arith.mulf %230, %228 : vector<16x128xf32>
    %232 = arith.mulf %221, %199 : vector<16x128xf32>
    %233 = arith.addf %231, %232 : vector<16x128xf32>
    %c6_i32 = arith.constant 6 : i32
    %234 = arith.truncf %233 : vector<16x128xf32> to vector<16x128xbf16>
    %cst_106 = arith.constant dense<0.000000e+00> : vector<16x128xf32>
    %235 = tpu.matmul %234, %23, %cst_106 {dimension_numbers = #tpu.dot_dimension_numbers<[1], [0], [0], [1], [0, 0, 1, 1], [], []>} : vector<16x128xbf16>, vector<128x128xbf16>, vector<16x128xf32> -> vector<16x128xf32>
    %cst_107 = arith.constant dense<0.000000e+00> : vector<16x128xf32>
    %236 = tpu.matmul %234, %24, %cst_107 {dimension_numbers = #tpu.dot_dimension_numbers<[1], [0], [0], [1], [0, 0, 1, 1], [], []>} : vector<16x128xbf16>, vector<128x128xbf16>, vector<16x128xf32> -> vector<16x128xf32>
    %cst_108 = arith.constant dense<0.000000e+00> : vector<16x128xf32>
    %237 = tpu.matmul %234, %25, %cst_108 {dimension_numbers = #tpu.dot_dimension_numbers<[1], [0], [0], [1], [0, 0, 1, 1], [], []>} : vector<16x128xbf16>, vector<128x128xbf16>, vector<16x128xf32> -> vector<16x128xf32>
    %238 = arith.index_cast %c6_i32 : i32 to index
    %c0_109 = arith.constant 0 : index
    %c0_110 = arith.constant 0 : index
    %239 = vector.load %arg20[%238, %c0_109, %c0_110] : memref<8x16x128xf32, #tpu.memory_space<vmem>>, vector<1x16x128xf32>
    %240 = vector.shape_cast %239 : vector<1x16x128xf32> to vector<16x128xf32>
    %241 = arith.addf %240, %235 : vector<16x128xf32>
    %242 = arith.negf %241 : vector<16x128xf32>
    %243 = math.exp %242 : vector<16x128xf32>
    %cst_111 = arith.constant 1.000000e+00 : f32
    %244 = vector.broadcast %cst_111 : f32 to vector<16x128xf32>
    %245 = arith.addf %244, %243 : vector<16x128xf32>
    %246 = arith.divf %244, %245 : vector<16x128xf32>
    %247 = arith.index_cast %c6_i32 : i32 to index
    %c0_112 = arith.constant 0 : index
    %c0_113 = arith.constant 0 : index
    %248 = vector.load %arg21[%247, %c0_112, %c0_113] : memref<8x16x128xf32, #tpu.memory_space<vmem>>, vector<1x16x128xf32>
    %249 = vector.shape_cast %248 : vector<1x16x128xf32> to vector<16x128xf32>
    %250 = arith.addf %249, %236 : vector<16x128xf32>
    %251 = arith.negf %250 : vector<16x128xf32>
    %252 = math.exp %251 : vector<16x128xf32>
    %cst_114 = arith.constant 1.000000e+00 : f32
    %253 = vector.broadcast %cst_114 : f32 to vector<16x128xf32>
    %254 = arith.addf %253, %252 : vector<16x128xf32>
    %255 = arith.divf %253, %254 : vector<16x128xf32>
    %256 = arith.index_cast %c6_i32 : i32 to index
    %c0_115 = arith.constant 0 : index
    %c0_116 = arith.constant 0 : index
    %257 = vector.load %arg22[%256, %c0_115, %c0_116] : memref<8x16x128xf32, #tpu.memory_space<vmem>>, vector<1x16x128xf32>
    %258 = vector.shape_cast %257 : vector<1x16x128xf32> to vector<16x128xf32>
    %259 = arith.addf %237, %28 : vector<16x128xf32>
    %260 = arith.mulf %246, %259 : vector<16x128xf32>
    %261 = arith.addf %258, %260 : vector<16x128xf32>
    %262 = math.tanh %261 : vector<16x128xf32>
    %cst_117 = arith.constant 1.000000e+00 : f32
    %263 = vector.broadcast %cst_117 : f32 to vector<16x128xf32>
    %264 = arith.subf %263, %255 : vector<16x128xf32>
    %265 = arith.mulf %264, %262 : vector<16x128xf32>
    %266 = arith.mulf %255, %233 : vector<16x128xf32>
    %267 = arith.addf %265, %266 : vector<16x128xf32>
    %c7_i32 = arith.constant 7 : i32
    %268 = arith.truncf %267 : vector<16x128xf32> to vector<16x128xbf16>
    %cst_118 = arith.constant dense<0.000000e+00> : vector<16x128xf32>
    %269 = tpu.matmul %268, %23, %cst_118 {dimension_numbers = #tpu.dot_dimension_numbers<[1], [0], [0], [1], [0, 0, 1, 1], [], []>} : vector<16x128xbf16>, vector<128x128xbf16>, vector<16x128xf32> -> vector<16x128xf32>
    %cst_119 = arith.constant dense<0.000000e+00> : vector<16x128xf32>
    %270 = tpu.matmul %268, %24, %cst_119 {dimension_numbers = #tpu.dot_dimension_numbers<[1], [0], [0], [1], [0, 0, 1, 1], [], []>} : vector<16x128xbf16>, vector<128x128xbf16>, vector<16x128xf32> -> vector<16x128xf32>
    %cst_120 = arith.constant dense<0.000000e+00> : vector<16x128xf32>
    %271 = tpu.matmul %268, %25, %cst_120 {dimension_numbers = #tpu.dot_dimension_numbers<[1], [0], [0], [1], [0, 0, 1, 1], [], []>} : vector<16x128xbf16>, vector<128x128xbf16>, vector<16x128xf32> -> vector<16x128xf32>
    %272 = arith.index_cast %c7_i32 : i32 to index
    %c0_121 = arith.constant 0 : index
    %c0_122 = arith.constant 0 : index
    %273 = vector.load %arg20[%272, %c0_121, %c0_122] : memref<8x16x128xf32, #tpu.memory_space<vmem>>, vector<1x16x128xf32>
    %274 = vector.shape_cast %273 : vector<1x16x128xf32> to vector<16x128xf32>
    %275 = arith.addf %274, %269 : vector<16x128xf32>
    %276 = arith.negf %275 : vector<16x128xf32>
    %277 = math.exp %276 : vector<16x128xf32>
    %cst_123 = arith.constant 1.000000e+00 : f32
    %278 = vector.broadcast %cst_123 : f32 to vector<16x128xf32>
    %279 = arith.addf %278, %277 : vector<16x128xf32>
    %280 = arith.divf %278, %279 : vector<16x128xf32>
    %281 = arith.index_cast %c7_i32 : i32 to index
    %c0_124 = arith.constant 0 : index
    %c0_125 = arith.constant 0 : index
    %282 = vector.load %arg21[%281, %c0_124, %c0_125] : memref<8x16x128xf32, #tpu.memory_space<vmem>>, vector<1x16x128xf32>
    %283 = vector.shape_cast %282 : vector<1x16x128xf32> to vector<16x128xf32>
    %284 = arith.addf %283, %270 : vector<16x128xf32>
    %285 = arith.negf %284 : vector<16x128xf32>
    %286 = math.exp %285 : vector<16x128xf32>
    %cst_126 = arith.constant 1.000000e+00 : f32
    %287 = vector.broadcast %cst_126 : f32 to vector<16x128xf32>
    %288 = arith.addf %287, %286 : vector<16x128xf32>
    %289 = arith.divf %287, %288 : vector<16x128xf32>
    %290 = arith.index_cast %c7_i32 : i32 to index
    %c0_127 = arith.constant 0 : index
    %c0_128 = arith.constant 0 : index
    %291 = vector.load %arg22[%290, %c0_127, %c0_128] : memref<8x16x128xf32, #tpu.memory_space<vmem>>, vector<1x16x128xf32>
    %292 = vector.shape_cast %291 : vector<1x16x128xf32> to vector<16x128xf32>
    %293 = arith.addf %271, %28 : vector<16x128xf32>
    %294 = arith.mulf %280, %293 : vector<16x128xf32>
    %295 = arith.addf %292, %294 : vector<16x128xf32>
    %296 = math.tanh %295 : vector<16x128xf32>
    %cst_129 = arith.constant 1.000000e+00 : f32
    %297 = vector.broadcast %cst_129 : f32 to vector<16x128xf32>
    %298 = arith.subf %297, %289 : vector<16x128xf32>
    %299 = arith.mulf %298, %296 : vector<16x128xf32>
    %300 = arith.mulf %289, %267 : vector<16x128xf32>
    %301 = arith.addf %299, %300 : vector<16x128xf32>
    %c8_i32 = arith.constant 8 : i32
    %c0_130 = arith.constant 0 : index
    %c0_131 = arith.constant 0 : index
    %302 = vector.load %arg14[%c0_130, %c0_131] : memref<1x128xf32, #tpu.memory_space<vmem>>, vector<1x128xf32>
    %cst_132 = arith.constant 0.000000e+00 : f32
    %303 = vector.broadcast %cst_132 : f32 to vector<1x128xf32>
    %304 = arith.maximumf %302, %303 : vector<1x128xf32>
    %305 = arith.truncf %301 : vector<16x128xf32> to vector<16x128xbf16>
    %c0_133 = arith.constant 0 : index
    %c0_134 = arith.constant 0 : index
    %306 = vector.load %arg12[%c0_133, %c0_134] : memref<128x128xbf16, #tpu.memory_space<vmem>>, vector<128x128xbf16>
    %cst_135 = arith.constant dense<0.000000e+00> : vector<16x128xf32>
    %307 = tpu.matmul %305, %306, %cst_135 {dimension_numbers = #tpu.dot_dimension_numbers<[1], [0], [0], [1], [0, 0, 1, 1], [], []>} : vector<16x128xbf16>, vector<128x128xbf16>, vector<16x128xf32> -> vector<16x128xf32>
    %c0_136 = arith.constant 0 : index
    %c0_137 = arith.constant 0 : index
    %308 = vector.load %arg13[%c0_136, %c0_137] : memref<1x128xf32, #tpu.memory_space<vmem>>, vector<1x128xf32>
    %309 = vector.broadcast %308 : vector<1x128xf32> to vector<16x128xf32>
    %310 = arith.addf %307, %309 : vector<16x128xf32>
    %cst_138 = arith.constant 0.000000e+00 : f32
    %311 = vector.broadcast %cst_138 : f32 to vector<16x128xf32>
    %312 = arith.maximumf %310, %311 : vector<16x128xf32>
    %313 = vector.broadcast %304 : vector<1x128xf32> to vector<16x128xf32>
    %314 = arith.mulf %312, %313 : vector<16x128xf32>
    %315 = arith.truncf %314 : vector<16x128xf32> to vector<16x128xbf16>
    %c0_139 = arith.constant 0 : index
    %c0_140 = arith.constant 0 : index
    %316 = vector.load %arg15[%c0_139, %c0_140] : memref<128x128xbf16, #tpu.memory_space<vmem>>, vector<128x128xbf16>
    %cst_141 = arith.constant dense<0.000000e+00> : vector<16x128xf32>
    %317 = tpu.matmul %315, %316, %cst_141 {dimension_numbers = #tpu.dot_dimension_numbers<[1], [0], [0], [1], [0, 0, 1, 1], [], []>} : vector<16x128xbf16>, vector<128x128xbf16>, vector<16x128xf32> -> vector<16x128xf32>
    %c0_142 = arith.constant 0 : index
    %c0_143 = arith.constant 0 : index
    %318 = vector.load %arg16[%c0_142, %c0_143] : memref<1x128xf32, #tpu.memory_space<vmem>>, vector<1x128xf32>
    %319 = vector.broadcast %318 : vector<1x128xf32> to vector<16x128xf32>
    %320 = arith.addf %317, %319 : vector<16x128xf32>
    %cst_144 = arith.constant 0.000000e+00 : f32
    %321 = vector.broadcast %cst_144 : f32 to vector<16x128xf32>
    %322 = arith.maximumf %320, %321 : vector<16x128xf32>
    %323 = arith.truncf %322 : vector<16x128xf32> to vector<16x128xbf16>
    %c0_145 = arith.constant 0 : index
    %c0_146 = arith.constant 0 : index
    %324 = vector.load %arg17[%c0_145, %c0_146] : memref<128x128xbf16, #tpu.memory_space<vmem>>, vector<128x128xbf16>
    %cst_147 = arith.constant dense<0.000000e+00> : vector<16x128xf32>
    %325 = tpu.matmul %323, %324, %cst_147 {dimension_numbers = #tpu.dot_dimension_numbers<[1], [0], [0], [1], [0, 0, 1, 1], [], []>} : vector<16x128xbf16>, vector<128x128xbf16>, vector<16x128xf32> -> vector<16x128xf32>
    %c0_148 = arith.constant 0 : index
    %c0_149 = arith.constant 0 : index
    %326 = vector.load %arg18[%c0_148, %c0_149] : memref<1x128xf32, #tpu.memory_space<vmem>>, vector<1x128xf32>
    %327 = vector.broadcast %326 : vector<1x128xf32> to vector<16x128xf32>
    %328 = arith.addf %325, %327 : vector<16x128xf32>
    %c0_150 = arith.constant 0 : index
    %c0_151 = arith.constant 0 : index
    %329 = vector.load %arg19[%c0_150, %c0_151] : memref<16x128xf32, #tpu.memory_space<vmem>>, vector<16x128xf32>
    tpu.vector_store %arg19[%c0_150, %c0_151], %328 {strides = array<i32>} : memref<16x128xf32, #tpu.memory_space<vmem>>, vector<16x128xf32>,
    return
  }
  func.func @transform_0(%arg0: i32) -> (i32, i32, i32) {
    %c0_i32 = arith.constant 0 : i32
    %c0_i32_0 = arith.constant 0 : i32
    %c0_i32_1 = arith.constant 0 : i32
    return %c0_i32, %arg0, %c0_i32_0 : i32, i32, i32
  }
  func.func @transform_1(%arg0: i32) -> (i32, i32) {
    %c0_i32 = arith.constant 0 : i32
    %c0_i32_0 = arith.constant 0 : i32
    %c0_i32_1 = arith.constant 0 : i32
    return %c0_i32, %c0_i32_0 : i32, i32
  }
  func.func @transform_2(%arg0: i32) -> (i32, i32) {
    %c0_i32 = arith.constant 0 : i32
    %c0_i32_0 = arith.constant 0 : i32
    %c0_i32_1 = arith.constant 0 : i32
    return %c0_i32, %c0_i32_0 : i32, i32
  }
  func.func @transform_3(%arg0: i32) -> (i32, i32) {
    %c0_i32 = arith.constant 0 : i32
    %c0_i32_0 = arith.constant 0 : i32
    %c0_i32_1 = arith.constant 0 : i32
    return %c0_i32, %c0_i32_0 : i32, i32
  }
  func.func @transform_4(%arg0: i32) -> (i32, i32) {
    %c0_i32 = arith.constant 0 : i32
    %c0_i32_0 = arith.constant 0 : i32
    %c0_i32_1 = arith.constant 0 : i32
    return %c0_i32, %c0_i32_0 : i32, i32
  }
  func.func @transform_5(%arg0: i32) -> (i32, i32) {
    %c0_i32 = arith.constant 0 : i32
    %c0_i32_0 = arith.constant 0 : i32
    %c0_i32_1 = arith.constant 0 : i32
    return %c0_i32, %c0_i32_0 : i32, i32
  }
  func.func @transform_6(%arg0: i32) -> (i32, i32) {
    %c0_i32 = arith.constant 0 : i32
    %c0_i32_0 = arith.constant 0 : i32
    %c0_i32_1 = arith.constant 0 : i32
    return %c0_i32, %c0_i32_0 : i32, i32
  }
  func.func @transform_7(%arg0: i32) -> (i32, i32) {
    %c0_i32 = arith.constant 0 : i32
    %c0_i32_0 = arith.constant 0 : i32
    %c0_i32_1 = arith.constant 0 : i32
    return %c0_i32, %c0_i32_0 : i32, i32
  }
  func.func @transform_8(%arg0: i32) -> (i32, i32) {
    %c0_i32 = arith.constant 0 : i32
    %c0_i32_0 = arith.constant 0 : i32
    %c0_i32_1 = arith.constant 0 : i32
    return %c0_i32, %c0_i32_0 : i32, i32
  }
  func.func @transform_9(%arg0: i32) -> (i32, i32) {
    %c0_i32 = arith.constant 0 : i32
    %c0_i32_0 = arith.constant 0 : i32
    %c0_i32_1 = arith.constant 0 : i32
    return %c0_i32, %c0_i32_0 : i32, i32
  }
  func.func @transform_10(%arg0: i32) -> (i32, i32) {
    %c0_i32 = arith.constant 0 : i32
    %c0_i32_0 = arith.constant 0 : i32
    %c0_i32_1 = arith.constant 0 : i32
    return %c0_i32, %c0_i32_0 : i32, i32
  }
  func.func @transform_11(%arg0: i32) -> (i32, i32) {
    %c0_i32 = arith.constant 0 : i32
    %c0_i32_0 = arith.constant 0 : i32
    %c0_i32_1 = arith.constant 0 : i32
    return %c0_i32, %c0_i32_0 : i32, i32
  }
  func.func @transform_12(%arg0: i32) -> (i32, i32) {
    %c0_i32 = arith.constant 0 : i32
    %c0_i32_0 = arith.constant 0 : i32
    %c0_i32_1 = arith.constant 0 : i32
    return %c0_i32, %c0_i32_0 : i32, i32
  }
  func.func @transform_13(%arg0: i32) -> (i32, i32) {
    %c0_i32 = arith.constant 0 : i32
    %c0_i32_0 = arith.constant 0 : i32
    %c0_i32_1 = arith.constant 0 : i32
    return %c0_i32, %c0_i32_0 : i32, i32
  }
  func.func @transform_14(%arg0: i32) -> (i32, i32) {
    %c0_i32 = arith.constant 0 : i32
    %c0_i32_0 = arith.constant 0 : i32
    %c0_i32_1 = arith.constant 0 : i32
    return %c0_i32, %c0_i32_0 : i32, i32
  }
  func.func @transform_15(%arg0: i32) -> (i32, i32) {
    %c0_i32 = arith.constant 0 : i32
    %c0_i32_0 = arith.constant 0 : i32
    %c0_i32_1 = arith.constant 0 : i32
    return %c0_i32, %c0_i32_0 : i32, i32
  }
  func.func @transform_16(%arg0: i32) -> (i32, i32) {
    %c0_i32 = arith.constant 0 : i32
    %c0_i32_0 = arith.constant 0 : i32
    %c0_i32_1 = arith.constant 0 : i32
    return %c0_i32, %c0_i32_0 : i32, i32
  }
  func.func @transform_17(%arg0: i32) -> (i32, i32) {
    %c0_i32 = arith.constant 0 : i32
    %c0_i32_0 = arith.constant 0 : i32
    %c0_i32_1 = arith.constant 0 : i32
    return %c0_i32, %c0_i32_0 : i32, i32
  }
  func.func @transform_18(%arg0: i32) -> (i32, i32) {
    %c0_i32 = arith.constant 0 : i32
    %c0_i32_0 = arith.constant 0 : i32
    return %arg0, %c0_i32 : i32, i32
  }
}

</mosaic_0001>

<bundles_post_ra>
// kernel: updn_ramen_forward.1
= control target key start
LH: loop header
LB: loop body
LE: loop exit
PB: predicated region body
PF: predicated region fallthrough
CT: control target
= control target key end

     0   :  { %vm5055_vm0 = vmmov 0   ;;  %s6684_s1 = inlined_call_operand.vmem [shape: bf16[384,128], index: 1, kind: input, shape index: {}]   ;;  %s6685_s0 = inlined_call_operand.vmem [shape: bf16[8,16,384], index: 0, kind: input, shape index: {}]   ;;  %s6686_s2 = inlined_call_operand.vmem [shape: bf16[384,128], index: 2, kind: input, shape index: {}]   ;;  %s6687_s3 = inlined_call_operand.vmem [shape: bf16[384,128], index: 3, kind: input, shape index: {}]   ;;  %s6688_s4 = inlined_call_operand.vmem [shape: bf16[128,128], index: 4, kind: input, shape index: {}]   ;;  %s6689_s5 = inlined_call_operand.vmem [shape: bf16[128,128], index: 5, kind: input, shape index: {}]   ;;  %s6690_s6 = inlined_call_operand.vmem [shape: bf16[128,128], index: 6, kind: input, shape index: {}]   ;;  %s6691_s7 = inlined_call_operand.vmem [shape: f32[1,128], index: 7, kind: input, shape index: {}]   ;;  %s6692_s8 = inlined_call_operand.vmem [shape: f32[1,128], index: 8, kind: input, shape index: {}]   ;;  %s6693_s9 = inlined_call_operand.vmem [shape: f32[1,128], index: 9, kind: input, shape index: {}]   ;;  %s6694_s10 = inlined_call_operand.vmem [shape: f32[1,128], index: 10, kind: input, shape index: {}]   ;;  %s6695_s11 = inlined_call_operand.vmem [shape: bf16[128,128], index: 11, kind: input, shape index: {}]   ;;  %s6696_s14 = inlined_call_operand.vmem [shape: bf16[128,128], index: 14, kind: input, shape index: {}]   ;;  %s6697_s16 = inlined_call_operand.vmem [shape: bf16[128,128], index: 16, kind: input, shape index: {}]   ;;  %s6698_s13 = inlined_call_operand.vmem [shape: f32[1,128], index: 13, kind: input, shape index: {}]   ;;  %s6699_s12 = inlined_call_operand.vmem [shape: f32[1,128], index: 12, kind: input, shape index: {}]   ;;  %s6700_s15 = inlined_call_operand.vmem [shape: f32[1,128], index: 15, kind: input, shape index: {}]   ;;  %s6701_s17 = inlined_call_operand.vmem [shape: f32[1,128], index: 17, kind: input, shape index: {}]   ;;  %s6702_s18 = inlined_call_operand.vmem [shape: f32[16,128], index: 18, kind: output, shape index: {}]  }
   0x1   :  { %6708 = sst [smem:[#allocation29_spill]] %s6684_s1  ;;  %v4778_v63 = vld [vmem:[%s6687_s3 + $0x80] sm:$0xff]  }
   0x2   :  { %6709 = sst [smem:[#allocation30_spill]] %s6685_s0  ;;  %s6711_s29 = sld [smem:[#allocation29_spill]] }
   0x3   :  { %6710 = sst [smem:[#allocation31_spill]] %s6686_s2  ;;  %s6712_s20 = sld [smem:[#allocation30_spill]] }
   0x4   :  { %s6713_s26 = sld [smem:[#allocation31_spill]] }
   0x8   :  { %v4706_v0 = vld [vmem:[%s6711_s29 + $0x40] sm:$0xff]   ;;  %v4709_v3 = vld [vmem:[%s6711_s29 + $0x48] sm:$0xff]   ;;  %v4712_v6 = vld [vmem:[%s6711_s29 + $0x50] sm:$0xff]  }
   0x9   :  { %v4707_v1 = vld [vmem:[%s6711_s29 + $0x80] sm:$0xff]   ;;  %3584 = vmatprep.subr.bf16.mxu0 %v4706_v0  ;;  %v4710_v4 = vld [vmem:[%s6711_s29 + $0x88] sm:$0xff]   ;;  %v4713_v7 = vld [vmem:[%s6711_s29 + $0x90] sm:$0xff]  }
   0xa   :  { %v4708_v2 = vld [vmem:[%s6711_s29] sm:$0xff]   ;;  %4067 = vmatprep.subr.bf16.mxu1 %v4707_v1  ;;  %v4711_v5 = vld [vmem:[%s6711_s29 + $0x8] sm:$0xff]   ;;  %v4714_v8 = vld [vmem:[%s6711_s29 + $0x10] sm:$0xff]  }
   0xb   :  { %3585 = vmatpush3.bf16.msra.mxu0 %v4708_v2  ;;  %4068 = vmatpush3.bf16.msra.mxu1 %v4707_v1  ;;  %v4715_v9 = vld [vmem:[%s6711_s29 + $0x58] sm:$0xff]   ;;  %v4718_v12 = vld [vmem:[%s6711_s29 + $0x60] sm:$0xff]   ;;  %v4721_v15 = vld [vmem:[%s6711_s29 + $0x68] sm:$0xff]  }
   0xc   :  { %3586 = vmatprep.subr.bf16.mxu0 %v4709_v3  ;;  %4069 = vmatprep.subr.bf16.mxu1 %v4710_v4  ;;  %v4716_v10 = vld [vmem:[%s6711_s29 + $0x98] sm:$0xff]   ;;  %v4719_v13 = vld [vmem:[%s6711_s29 + $0xa0] sm:$0xff]   ;;  %v4722_v16 = vld [vmem:[%s6711_s29 + $0xa8] sm:$0xff]  }
   0xd   :  { %v4717_v11 = vld [vmem:[%s6711_s29 + $0x18] sm:$0xff]   ;;  %v4720_v14 = vld [vmem:[%s6711_s29 + $0x20] sm:$0xff]   ;;  %v4723_v17 = vld [vmem:[%s6711_s29 + $0x28] sm:$0xff]  }
   0xe   :  { %v4724_v18 = vld [vmem:[%s6711_s29 + $0x70] sm:$0xff]   ;;  %v4727_v21 = vld [vmem:[%s6711_s29 + $0x78] sm:$0xff]   ;;  %v4735_v26 = vld [vmem:[%s6713_s26 + $0x40] sm:$0xff]  }
   0xf   :  { %3587 = vmatpush3.bf16.msra.mxu0 %v4711_v5  ;;  %4070 = vmatpush3.bf16.msra.mxu1 %v4710_v4  ;;  %v4725_v19 = vld [vmem:[%s6711_s29 + $0xb0] sm:$0xff]   ;;  %v4728_v22 = vld [vmem:[%s6711_s29 + $0xb8] sm:$0xff]   ;;  %v5242_v27 = vld [vmem:[%s6712_s20] ss:$12 sps:$4 sm:$0xff]  }
  0x10   :  { %3588 = vmatprep.subr.bf16.mxu0 %v4712_v6  ;;  %4071 = vmatprep.subr.bf16.mxu1 %v4713_v7  ;;  %v4726_v20 = vld [vmem:[%s6711_s29 + $0x30] sm:$0xff]   ;;  %v4729_v25 = vld [vmem:[%s6711_s29 + $0x38] sm:$0xff]   ;;  %v4736_v28 = vld [vmem:[%s6713_s26 + $0x80] sm:$0xff]  }
  0x11   :  { %v5224_v23 = vld [vmem:[%s6712_s20 + $0x4] ss:$12 sps:$4 sm:$0xff]   ;;  %v5229_v24 = vld [vmem:[%s6712_s20 + $0x8] ss:$12 sps:$4 sm:$0xff]   ;;  %v5250_v29 = vld [vmem:[%s6712_s20 + $0x20] ss:$12 sps:$4 sm:$0xff]  }
  0x12   :  { %451 = vmatprep.mubr.bf16.mxu0 %v5224_v23  ;;  %4083 = vmatprep.mubr.bf16.mxu1 %v5229_v24  ;;  %v4737_v30 = vld [vmem:[%s6713_s26] sm:$0xff]   ;;  %v4738_v31 = vld [vmem:[%s6713_s26 + $0x48] sm:$0xff]   ;;  %v4745_v35 = vld [vmem:[%s6713_s26 + $0x50] sm:$0xff]  }
  0x13   :  { %3589 = vmatpush3.bf16.msra.mxu0 %v4714_v8  ;;  %4072 = vmatpush3.bf16.msra.mxu1 %v4713_v7  ;;  %v5261_v32 = vld [vmem:[%s6712_s20 + $0x1c] ss:$12 sps:$4 sm:$0xff]   ;;  %v5266_v33 = vld [vmem:[%s6712_s20 + $0x38] ss:$12 sps:$4 sm:$0xff]   ;;  %v4747_v39 = vld [vmem:[%s6713_s26 + $0x10] sm:$0xff]  }
  0x14   :  { %3590 = vmatprep.subr.bf16.mxu0 %v4715_v9  ;;  %4073 = vmatprep.subr.bf16.mxu1 %v4716_v10  ;;  %v4739_v34 = vld [vmem:[%s6713_s26 + $0x8] sm:$0xff]   ;;  %v5280_v36 = vld [vmem:[%s6712_s20 + $0x18] ss:$12 sps:$4 sm:$0xff]   ;;  %v5289_v38 = vld [vmem:[%s6712_s20 + $0x50] ss:$12 sps:$4 sm:$0xff]  }
  0x15   :  { %v4746_v37 = vld [vmem:[%s6713_s26 + $0x88] sm:$0xff]   ;;  %v4748_v40 = vld [vmem:[%s6713_s26 + $0x58] sm:$0xff]   ;;  %v5300_v41 = vld [vmem:[%s6712_s20 + $0x34] ss:$12 sps:$4 sm:$0xff]  }
  0x16   :  { %v5305_v42 = vld [vmem:[%s6712_s20 + $0x68] ss:$12 sps:$4 sm:$0xff]   ;;  %v4749_v43 = vld [vmem:[%s6713_s26 + $0x18] sm:$0xff]   ;;  %v4755_v44 = vld [vmem:[%s6713_s26 + $0x60] sm:$0xff]  }
  0x17   :  { %3591 = vmatpush3.bf16.msra.mxu0 %v4717_v11  ;;  %4074 = vmatpush3.bf16.msra.mxu1 %v4716_v10  ;;  %v5320_v45 = vld [vmem:[%s6712_s20 + $0x30] ss:$12 sps:$4 sm:$0xff]   ;;  %v5328_v47 = vld [vmem:[%s6712_s20 + $0x80] ss:$12 sps:$4 sm:$0xff]   ;;  %v5344_v51 = vld [vmem:[%s6712_s20 + $0x98] ss:$12 sps:$4 sm:$0xff]  }
  0x18   :  { %3592 = vmatprep.subr.bf16.mxu0 %v4718_v12  ;;  %4075 = vmatprep.subr.bf16.mxu1 %v4719_v13  ;;  %v4756_v46 = vld [vmem:[%s6713_s26 + $0x90] sm:$0xff]   ;;  %v4757_v48 = vld [vmem:[%s6713_s26 + $0x20] sm:$0xff]   ;;  %v4758_v49 = vld [vmem:[%s6713_s26 + $0x68] sm:$0xff]  }
  0x19   :  { %v5339_v50 = vld [vmem:[%s6712_s20 + $0x4c] ss:$12 sps:$4 sm:$0xff]   ;;  %v5356_v53 = vld [vmem:[%s6712_s20 + $0x48] ss:$12 sps:$4 sm:$0xff]   ;;  %v5367_v56 = vld [vmem:[%s6712_s20 + $0xb0] ss:$12 sps:$4 sm:$0xff]  }
  0x1a   :  { %v4759_v52 = vld [vmem:[%s6713_s26 + $0x28] sm:$0xff]   ;;  %v4765_v54 = vld [vmem:[%s6713_s26 + $0x70] sm:$0xff]   ;;  %v4766_v55 = vld [vmem:[%s6713_s26 + $0x98] sm:$0xff]  }
  0x1b   :  { %3593 = vmatpush3.bf16.msra.mxu0 %v4720_v14  ;;  %4076 = vmatpush3.bf16.msra.mxu1 %v4719_v13  ;;  %v4767_v57 = vld [vmem:[%s6713_s26 + $0x30] sm:$0xff]   ;;  %v4768_v58 = vld [vmem:[%s6713_s26 + $0x78] sm:$0xff]   ;;  %v4773_v60 = vld [vmem:[%s6713_s26 + $0xa0] sm:$0xff]  }
  0x1c   :  { %3594 = vmatprep.subr.bf16.mxu0 %v4721_v15  ;;  %4077 = vmatprep.subr.bf16.mxu1 %v4722_v16  ;;  %v5378_v59 = vld [vmem:[%s6712_s20 + $0x64] ss:$12 sps:$4 sm:$0xff]   ;;  %v4769_v61 = vld [vmem:[%s6713_s26 + $0x38] sm:$0xff]   ;;  %v4777_v62 = vld [vmem:[%s6713_s26 + $0xa8] sm:$0xff]  }
  0x1d   :  { %v5399_v0 = vld [vmem:[%s6712_s20 + $0x60] ss:$12 sps:$4 sm:$0xff]   ;;  %v5404_v1 = vld [vmem:[%s6712_s20 + $0x7c] ss:$12 sps:$4 sm:$0xff]   ;;  %v4782_v2 = vld [vmem:[%s6713_s26 + $0xb0] sm:$0xff]  }
  0x1e   :  { %v4783_v3 = vld [vmem:[%s6687_s3 + $0x88] sm:$0xff]   ;;  %v4787_v4 = vld [vmem:[%s6713_s26 + $0xb8] sm:$0xff]   ;;  %v4788_v5 = vld [vmem:[%s6687_s3 + $0x90] sm:$0xff]  }
  0x1f   :  { %3595 = vmatpush3.bf16.msra.mxu0 %v4723_v17  ;;  %4078 = vmatpush3.bf16.msra.mxu1 %v4722_v16  ;;  %v5425_v6 = vld [vmem:[%s6712_s20 + $0x78] ss:$12 sps:$4 sm:$0xff]   ;;  %v5430_v7 = vld [vmem:[%s6712_s20 + $0x94] ss:$12 sps:$4 sm:$0xff]   ;;  %v5445_v10 = vld [vmem:[%s6712_s20 + $0x90] ss:$12 sps:$4 sm:$0xff]  }
  0x20   :  { %3596 = vmatprep.subr.bf16.mxu0 %v4724_v18  ;;  %4079 = vmatprep.subr.bf16.mxu1 %v4725_v19  ;;  %v4789_v8 = vld [vmem:[%s6687_s3 + $0x40] sm:$0xff]   ;;  %v4793_v9 = vld [vmem:[%s6687_s3 + $0x98] sm:$0xff]   ;;  %v4801_v13 = vld [vmem:[%s6687_s3 + $0xa8] sm:$0xff]  }
  0x21   :  { %v4798_v11 = vld [vmem:[%s6687_s3 + $0xa0] sm:$0xff]   ;;  %v5453_v12 = vld [vmem:[%s6712_s20 + $0xac] ss:$12 sps:$4 sm:$0xff]   ;;  %v4804_v14 = vld [vmem:[%s6687_s3 + $0xb0] sm:$0xff]  }
  0x22   :  { %v5468_v15 = vld [vmem:[%s6712_s20 + $0xa8] ss:$12 sps:$4 sm:$0xff]   ;;  %v4807_v16 = vld [vmem:[%s6687_s3 + $0xb8] sm:$0xff]   ;;  %v4790_v17 = vld [vmem:[%s6687_s3] sm:$0xff]  }
  0x23   :  { %3597 = vmatpush3.bf16.msra.mxu0 %v4726_v20  ;;  %4080 = vmatpush3.bf16.msra.mxu1 %v4725_v19  ;;  %v4791_v18 = vld [vmem:[%s6687_s3 + $0x48] sm:$0xff]   ;;  %v6706_v19 = vmov 0.0  }
  0x24   :  { %3598 = vmatprep.subr.bf16.mxu0 %v4727_v21  ;;  %4081 = vmatprep.subr.bf16.mxu1 %v4728_v22  ;;  %v4792_v20 = vld [vmem:[%s6687_s3 + $0x8] sm:$0xff]   ;;  %v4794_v21 = vld [vmem:[%s6687_s3 + $0x50] sm:$0xff]  }
  0x27   :  { %3599 = vmatpush3.bf16.msra.mxu0 %v4729_v25  ;;  %4082 = vmatpush3.bf16.msra.mxu1 %v4728_v22  ;;  %v4795_v22 = vld [vmem:[%s6687_s3 + $0x10] sm:$0xff]   ;;  %v4796_v25 = vld [vmem:[%s6687_s3 + $0x58] sm:$0xff]  }
  0x28   :  { %3664 = vmatprep.subr.bf16.mxu1 %v4735_v26  ;;  %4099 = vmatprep.subr.bf16.mxu0 %v4736_v28  ;;  %v4797_v26 = vld [vmem:[%s6687_s3 + $0x18] sm:$0xff]  }
  0x2a   :  { %452 = vmatmul.mubr.bf16.vlgmr.msra.gmra.mrb[0].mxu0 %v5242_v27  ;;  %4084 = vmatmul.mubr.bf16.vlgmr.msra.gmra.mrb[0].mxu1 %v5250_v29 }
  0x2b   :  { %3665 = vmatpush3.bf16.msra.mxu1 %v4737_v30  ;;  %4100 = vmatpush3.bf16.msra.mxu0 %v4736_v28  ;;  %v4799_v28 = vld [vmem:[%s6687_s3 + $0x60] sm:$0xff]  }
  0x2c   :  { %3666 = vmatprep.subr.bf16.mxu1 %v4738_v31  ;;  %459 = vmatprep.mubr.bf16.mxu0 %v5261_v32  ;;  %v4800_v30 = vld [vmem:[%s6687_s3 + $0x20] sm:$0xff]   ;;  %v4802_v31 = vld [vmem:[%s6687_s3 + $0x68] sm:$0xff]  }
  0x2d   :  { %4087 = vmatprep.mubr.bf16.mxu1 %v5266_v33  ;;  %4101 = vmatprep.subr.bf16.mxu0 %v4746_v37 }
  0x2f   :  { %3667 = vmatpush3.bf16.msra.mxu1 %v4739_v34  ;;  %4102 = vmatpush3.bf16.msra.mxu0 %v4746_v37  ;;  %v4803_v34 = vld [vmem:[%s6687_s3 + $0x28] sm:$0xff]   ;;  %v4806_v37 = vld [vmem:[%s6687_s3 + $0x30] sm:$0xff]  }
  0x30   :  { %3668 = vmatprep.subr.bf16.mxu1 %v4745_v35  ;;  %4103 = vmatprep.subr.bf16.mxu0 %v4756_v46  ;;  %v4805_v35 = vld [vmem:[%s6687_s3 + $0x70] sm:$0xff]  }
  0x32   :  { %460 = vmatmul.mubr.bf16.gmra.mrb[4].mxu0 %v5280_v36  ;;  %4088 = vmatmul.mubr.bf16.gmra.mrb[4].mxu1 %v5289_v38 }
  0x33   :  { %3669 = vmatpush3.bf16.msra.mxu1 %v4747_v39  ;;  %467 = vmatprep.mubr.bf16.mxu0 %v5300_v41  ;;  %v4808_v39 = vld [vmem:[%s6687_s3 + $0x78] sm:$0xff]  }
  0x34   :  { %3670 = vmatprep.subr.bf16.mxu1 %v4748_v40  ;;  %4091 = vmatprep.mubr.bf16.mxu1 %v5305_v42  ;;  %v4809_v40 = vld [vmem:[%s6687_s3 + $0x38] sm:$0xff]  }
  0x35   :  { %4104 = vmatpush3.bf16.msra.mxu0 %v4756_v46  ;;  %v5645_v46 = vld [vmem:[%s6688_s4 + $0x38] sm:$0xff]  }
  0x36   :  { %4105 = vmatprep.subr.bf16.mxu0 %v4766_v55 }
  0x37   :  { %3671 = vmatpush3.bf16.msra.mxu1 %v4749_v43  ;;  %v5542_v43 = vld [vmem:[%s6688_s4] sm:$0xff]  }
  0x38   :  { %3672 = vmatprep.subr.bf16.mxu1 %v4755_v44  ;;  %v5547_v44 = vld [vmem:[%s6689_s5] sm:$0xff]  }
  0x39   :  { %4106 = vmatpush3.bf16.msra.mxu0 %v4766_v55  ;;  %v5713_v55 = vld [vmem:[%s6690_s6 + $0x28] sm:$0xff]  }
  0x3a   :  { %468 = vmatmul.mubr.bf16.gmra.mrb[8].mxu0 %v5320_v45  ;;  %4092 = vmatmul.mubr.bf16.gmra.mrb[8].mxu1 %v5328_v47 }
  0x3b   :  { %3673 = vmatpush3.bf16.msra.mxu1 %v4757_v48  ;;  %475 = vmatprep.mubr.bf16.mxu0 %v5339_v50  ;;  %v5662_v48 = vld [vmem:[%s6690_s6] sm:$0xff]  }
  0x3c   :  { %3674 = vmatprep.subr.bf16.mxu1 %v4758_v49  ;;  %4095 = vmatprep.mubr.bf16.mxu1 %v5344_v51  ;;  %v5669_v49 = vld [vmem:[%s6689_s5 + $0x38] sm:$0xff]  }
  0x3d   :  { %4107 = vmatprep.subr.bf16.mxu0 %v4773_v60 }
  0x3e   :  { %4108 = vmatpush3.bf16.msra.mxu0 %v4773_v60 }
  0x3f   :  { %3675 = vmatpush3.bf16.msra.mxu1 %v4759_v52  ;;  %4109 = vmatprep.subr.bf16.mxu0 %v4777_v62  ;;  %v5689_v52 = vld [vmem:[%s6690_s6 + $0x10] sm:$0xff]  }
  0x40   :  { %3676 = vmatprep.subr.bf16.mxu1 %v4765_v54  ;;  %v5705_v54 = vld [vmem:[%s6690_s6 + $0x20] sm:$0xff]  }
  0x42   :  { %476 = vmatmul.mubr.bf16.gmra.mrb[12].mxu0 %v5356_v53  ;;  %4096 = vmatmul.mubr.bf16.gmra.mrb[12].mxu1 %v5367_v56 }
  0x43   :  { %3677 = vmatpush3.bf16.msra.mxu1 %v4767_v57  ;;  %483 = vmatprep.mubr.bf16.mxu0 %v5378_v59  ;;  %v5729_v57 = vld [vmem:[%s6690_s6 + $0x38] sm:$0xff]  }
  0x44   :  { %3678 = vmatprep.subr.bf16.mxu1 %v4768_v58  ;;  %860 = vmatprep.mubr.bf16.mxu1 %v5224_v23 }
  0x45   :  { %4110 = vmatpush3.bf16.msra.mxu0 %v4777_v62 }
  0x46   :  { %4111 = vmatprep.subr.bf16.mxu0 %v4782_v2 }
  0x47   :  { %3679 = vmatpush3.bf16.msra.mxu1 %v4769_v61  ;;  %v5775_v61 = vld [vmem:[%s6691_s7] ss:$0 sm:$0xff] }
  0x48   :  { %4131 = vmatprep.subr.bf16.mxu1 %v4778_v63 }
  0x49   :  { %4112 = vmatpush3.bf16.msra.mxu0 %v4782_v2 }
  0x4a   :  { %484 = vmatmul.mubr.bf16.gmra.mrb[16].mxu0 %v5399_v0  ;;  %861 = vmatmul.mubr.bf16.vlgmr.msra.gmra.mrb[16].mxu1 %v5242_v27 }
  0x4b   :  { %491 = vmatprep.mubr.bf16.mxu0 %v5404_v1  ;;  %868 = vmatprep.mubr.bf16.mxu1 %v5261_v32 }
  0x4c   :  { %4132 = vmatpush3.bf16.msra.mxu1 %v4778_v63  ;;  %4113 = vmatprep.subr.bf16.mxu0 %v4787_v4 }
  0x4d   :  { %4133 = vmatprep.subr.bf16.mxu1 %v4783_v3  ;;  %4114 = vmatpush3.bf16.msra.mxu0 %v4787_v4 }
  0x4e   :  { %3744 = vmatprep.subr.bf16.mxu0 %v4789_v8 }
  0x50   :  { %4134 = vmatpush3.bf16.msra.mxu1 %v4783_v3 }
  0x51   :  { %4135 = vmatprep.subr.bf16.mxu1 %v4788_v5 }
  0x52   :  { %492 = vmatmul.mubr.bf16.gmra.mrb[20].mxu0 %v5425_v6  ;;  %869 = vmatmul.mubr.bf16.gmra.mrb[20].mxu1 %v5280_v36 }
  0x53   :  { %499 = vmatprep.mubr.bf16.mxu0 %v5430_v7  ;;  %876 = vmatprep.mubr.bf16.mxu1 %v5300_v41 }
  0x54   :  { %4136 = vmatpush3.bf16.msra.mxu1 %v4788_v5 }
  0x55   :  { %4137 = vmatprep.subr.bf16.mxu1 %v4793_v9 }
  0x58   :  { %4138 = vmatpush3.bf16.msra.mxu1 %v4793_v9 }
  0x59   :  { %4139 = vmatprep.subr.bf16.mxu1 %v4798_v11 }
  0x5a   :  { %500 = vmatmul.mubr.bf16.gmra.mrb[24].mxu0 %v5445_v10  ;;  %877 = vmatmul.mubr.bf16.gmra.mrb[24].mxu1 %v5320_v45 }
  0x5b   :  { %507 = vmatprep.mubr.bf16.mxu0 %v5453_v12  ;;  %884 = vmatprep.mubr.bf16.mxu1 %v5339_v50 }
  0x5c   :  { %4140 = vmatpush3.bf16.msra.mxu1 %v4798_v11 }
  0x5d   :  { %4141 = vmatprep.subr.bf16.mxu1 %v4801_v13 }
  0x60   :  { %4142 = vmatpush3.bf16.msra.mxu1 %v4801_v13 }
  0x61   :  { %4143 = vmatprep.subr.bf16.mxu1 %v4804_v14 }
  0x62   :  { %508 = vmatmul.mubr.bf16.gmra.mrb[28].mxu0 %v5468_v15  ;;  %885 = vmatmul.mubr.bf16.gmra.mrb[28].mxu1 %v5356_v53 }
  0x63   :  { %892 = vmatprep.mubr.bf16.mxu1 %v5378_v59  ;;  %4115 = vmatprep.mubr.bf16.mxu0 %v5229_v24 }
  0x64   :  { %4144 = vmatpush3.bf16.msra.mxu1 %v4804_v14 }
  0x65   :  { %4145 = vmatprep.subr.bf16.mxu1 %v4807_v16 }
  0x68   :  { %4146 = vmatpush3.bf16.msra.mxu1 %v4807_v16 }
  0x69   :  { %4163 = vmatprep.subr.bf16.mxu1 %v6706_v19 }
  0x6a   :  { %893 = vmatmul.mubr.bf16.gmra.mrb[32].mxu1 %v5399_v0  ;;  %4116 = vmatmul.mubr.bf16.vlgmr.msra.gmra.mrb[32].mxu0 %v5250_v29 }
  0x6b   :  { %3745 = vmatpush3.bf16.msra.mxu0 %v4790_v17  ;;  %900 = vmatprep.mubr.bf16.mxu1 %v5404_v1 }
  0x6c   :  { %3746 = vmatprep.subr.bf16.mxu0 %v4791_v18  ;;  %4119 = vmatprep.mubr.bf16.mxu0 %v5266_v33 }
  0x6f   :  { %3747 = vmatpush3.bf16.msra.mxu0 %v4792_v20 }
  0x70   :  { %3748 = vmatprep.subr.bf16.mxu0 %v4794_v21 }
  0x72   :  { %901 = vmatmul.mubr.bf16.gmra.mrb[36].mxu1 %v5425_v6  ;;  %4120 = vmatmul.mubr.bf16.gmra.mrb[36].mxu0 %v5289_v38 }
  0x73   :  { %3749 = vmatpush3.bf16.msra.mxu0 %v4795_v22  ;;  %908 = vmatprep.mubr.bf16.mxu1 %v5430_v7 }
  0x74   :  { %3750 = vmatprep.subr.bf16.mxu0 %v4796_v25  ;;  %4123 = vmatprep.mubr.bf16.mxu0 %v5305_v42 }
  0x77   :  { %3751 = vmatpush3.bf16.msra.mxu0 %v4797_v26 }
  0x78   :  { %3752 = vmatprep.subr.bf16.mxu0 %v4799_v28 }
  0x7a   :  { %909 = vmatmul.mubr.bf16.gmra.mrb[40].mxu1 %v5445_v10  ;;  %4124 = vmatmul.mubr.bf16.gmra.mrb[40].mxu0 %v5328_v47 }
  0x7b   :  { %3753 = vmatpush3.bf16.msra.mxu0 %v4800_v30  ;;  %916 = vmatprep.mubr.bf16.mxu1 %v5453_v12 }
  0x7c   :  { %3754 = vmatprep.subr.bf16.mxu0 %v4802_v31  ;;  %4127 = vmatprep.mubr.bf16.mxu0 %v5344_v51 }
  0x7f   :  { %3755 = vmatpush3.bf16.msra.mxu0 %v4803_v34 }
  0x80   :  { %3756 = vmatprep.subr.bf16.mxu0 %v4805_v35 }
  0x82   :  { %917 = vmatmul.mubr.bf16.gmra.mrb[44].mxu1 %v5468_v15  ;;  %4128 = vmatmul.mubr.bf16.gmra.mrb[44].mxu0 %v5367_v56 }
  0x83   :  { %3757 = vmatpush3.bf16.msra.mxu0 %v4806_v37  ;;  %1269 = vmatprep.mubr.bf16.mxu0 %v5224_v23  ;;  %v5557_v23 = vld [vmem:[%s6688_s4 + $0x8] sm:$0xff]  }
  0x84   :  { %3758 = vmatprep.subr.bf16.mxu0 %v4808_v39  ;;  %4147 = vmatprep.mubr.bf16.mxu1 %v5229_v24  ;;  %v5562_v24 = vld [vmem:[%s6689_s5 + $0x8] sm:$0xff]  }
  0x87   :  { %3759 = vmatpush3.bf16.msra.mxu0 %v4809_v40 }
  0x88   :  { %4183 = vmatprep.subr.bf16.mxu0 %v6706_v19 }
  0x8a   :  { %1270 = vmatmul.mubr.bf16.vlgmr.msra.gmra.mrb[48].mxu0 %v5242_v27  ;;  %4148 = vmatmul.mubr.bf16.vlgmr.msra.gmra.mrb[48].mxu1 %v5250_v29  ;;  %v5572_v27 = vld [vmem:[%s6688_s4 + $0x10] sm:$0xff]  }
  0x8b   :  { %4164 = vmatpush3.bf16.msra.mxu1 %v5542_v43  ;;  %4184 = vmatpush3.bf16.msra.mxu0 %v5547_v44  ;;  %v5580_v29 = vld [vmem:[%s6689_s5 + $0x10] sm:$0xff]  }
  0x8c   :  { %4165 = vmatprep.subr.bf16.mxu1 %v6706_v19  ;;  %1277 = vmatprep.mubr.bf16.mxu0 %v5261_v32  ;;  %v5588_v32 = vld [vmem:[%s6688_s4 + $0x18] sm:$0xff]  }
  0x8d   :  { %4151 = vmatprep.mubr.bf16.mxu1 %v5266_v33  ;;  %4185 = vmatprep.subr.bf16.mxu0 %v6706_v19  ;;  %v5597_v33 = vld [vmem:[%s6689_s5 + $0x18] sm:$0xff]  }
  0x8f   :  { %4166 = vmatpush3.bf16.msra.mxu1 %v5557_v23  ;;  %4186 = vmatpush3.bf16.msra.mxu0 %v5562_v24 }
  0x90   :  { %4167 = vmatprep.subr.bf16.mxu1 %v6706_v19  ;;  %4187 = vmatprep.subr.bf16.mxu0 %v6706_v19 }
  0x92   :  { %1278 = vmatmul.mubr.bf16.gmra.mrb[52].mxu0 %v5280_v36  ;;  %4152 = vmatmul.mubr.bf16.gmra.mrb[52].mxu1 %v5289_v38  ;;  %v5604_v36 = vld [vmem:[%s6688_s4 + $0x20] sm:$0xff]  }
  0x93   :  { %4168 = vmatpush3.bf16.msra.mxu1 %v5572_v27  ;;  %1285 = vmatprep.mubr.bf16.mxu0 %v5300_v41  ;;  %v5613_v38 = vld [vmem:[%s6689_s5 + $0x20] sm:$0xff]   ;;  %v5619_v41 = vld [vmem:[%s6688_s4 + $0x28] sm:$0xff]  }
  0x94   :  { %4169 = vmatprep.subr.bf16.mxu1 %v6706_v19  ;;  %4155 = vmatprep.mubr.bf16.mxu1 %v5305_v42  ;;  %v5630_v42 = vld [vmem:[%s6688_s4 + $0x30] sm:$0xff]  }
  0x95   :  { %4188 = vmatpush3.bf16.msra.mxu0 %v5580_v29 }
  0x96   :  { %4189 = vmatprep.subr.bf16.mxu0 %v6706_v19 }
  0x97   :  { %4170 = vmatpush3.bf16.msra.mxu1 %v5588_v32 }
  0x98   :  { %4171 = vmatprep.subr.bf16.mxu1 %v6706_v19 }
  0x99   :  { %4190 = vmatpush3.bf16.msra.mxu0 %v5597_v33 }
  0x9a   :  { %1286 = vmatmul.mubr.bf16.gmra.mrb[56].mxu0 %v5320_v45  ;;  %4156 = vmatmul.mubr.bf16.gmra.mrb[56].mxu1 %v5328_v47  ;;  %v5637_v45 = vld [vmem:[%s6689_s5 + $0x28] sm:$0xff]   ;;  %v5655_v47 = vld [vmem:[%s6689_s5 + $0x30] sm:$0xff]  }
  0x9b   :  { %4172 = vmatpush3.bf16.msra.mxu1 %v5604_v36  ;;  %1293 = vmatprep.mubr.bf16.mxu0 %v5339_v50  ;;  %v5056_v50 = vmov 0  }
  0x9c   :  { %4173 = vmatprep.subr.bf16.mxu1 %v6706_v19  ;;  %4159 = vmatprep.mubr.bf16.mxu1 %v5344_v51  ;;  %v5676_v51 = vld [vmem:[%s6690_s6 + $0x8] sm:$0xff]  }
  0x9d   :  { %4191 = vmatprep.subr.bf16.mxu0 %v6706_v19 }
  0x9e   :  { %4192 = vmatpush3.bf16.msra.mxu0 %v5613_v38 }
  0x9f   :  { %4174 = vmatpush3.bf16.msra.mxu1 %v5619_v41  ;;  %4193 = vmatprep.subr.bf16.mxu0 %v6706_v19 }
  0xa0   :  { %4175 = vmatprep.subr.bf16.mxu1 %v6706_v19 }
  0xa2   :  { %1294 = vmatmul.mubr.bf16.gmra.mrb[60].mxu0 %v5356_v53  ;;  %4160 = vmatmul.mubr.bf16.gmra.mrb[60].mxu1 %v5367_v56  ;;  %v5697_v53 = vld [vmem:[%s6690_s6 + $0x18] sm:$0xff]   ;;  %v5721_v56 = vld [vmem:[%s6690_s6 + $0x30] sm:$0xff]  }
  0xa3   :  { %4176 = vmatpush3.bf16.msra.mxu1 %v5630_v42  ;;  %1301 = vmatprep.mubr.bf16.mxu0 %v5378_v59 }
  0xa4   :  { %4177 = vmatprep.subr.bf16.mxu1 %v6706_v19  ;;  %4179 = vmatprep.mubr.msk.bf16.mxu1 %vm5055_vm0, %v6706_v19 }
  0xa5   :  { %4194 = vmatpush3.bf16.msra.mxu0 %v5637_v45 }
  0xa6   :  { %4195 = vmatprep.subr.bf16.mxu0 %v6706_v19 }
  0xa7   :  { %4178 = vmatpush3.bf16.msra.mxu1 %v5645_v46 }
  0xa8   :  { %4203 = vmatprep.subr.bf16.mxu1 %v6706_v19 }
  0xa9   :  { %4196 = vmatpush3.bf16.msra.mxu0 %v5655_v47 }
  0xaa   :  { %1302 = vmatmul.mubr.bf16.gmra.mrb[64].mxu0 %v5399_v0  ;;  %4180 = vmatmul.mubr.bf16.vlgmr.msra.gmra.mrb[64].mxu1 %v5056_v50 }
  0xab   :  { %4204 = vmatpush3.bf16.msra.mxu1 %v5662_v48  ;;  %1309 = vmatprep.mubr.bf16.mxu0 %v5404_v1 }
  0xac   :  { %4205 = vmatprep.subr.bf16.mxu1 %v6706_v19  ;;  %4197 = vmatprep.subr.bf16.mxu0 %v6706_v19 }
  0xad   :  { %4198 = vmatpush3.bf16.msra.mxu0 %v5669_v49  ;;  %4219 = vmatprep.mubr.msk.bf16.mxu1 %vm5055_vm0, %v6706_v19 }
  0xae   :  { %4223 = vmatprep.subr.bf16.mxu0 %v6706_v19 }
  0xaf   :  { %4206 = vmatpush3.bf16.msra.mxu1 %v5676_v51 }
  0xb0   :  { %4207 = vmatprep.subr.bf16.mxu1 %v6706_v19 }
  0xb2   :  { %1310 = vmatmul.mubr.bf16.gmra.mrb[68].mxu0 %v5425_v6 }
  0xb3   :  { %4208 = vmatpush3.bf16.msra.mxu1 %v5689_v52  ;;  %1317 = vmatprep.mubr.bf16.mxu0 %v5430_v7 }
  0xb4   :  { %4209 = vmatprep.subr.bf16.mxu1 %v6706_v19 }
  0xb7   :  { %4210 = vmatpush3.bf16.msra.mxu1 %v5697_v53 }
  0xb8   :  { %4211 = vmatprep.subr.bf16.mxu1 %v6706_v19 }
  0xba   :  { %1318 = vmatmul.mubr.bf16.gmra.mrb[72].mxu0 %v5445_v10 }
  0xbb   :  { %4212 = vmatpush3.bf16.msra.mxu1 %v5705_v54  ;;  %1325 = vmatprep.mubr.bf16.mxu0 %v5453_v12 }
  0xbc   :  { %4213 = vmatprep.subr.bf16.mxu1 %v6706_v19 }
  0xbf   :  { %4214 = vmatpush3.bf16.msra.mxu1 %v5713_v55 }
  0xc0   :  { %4215 = vmatprep.subr.bf16.mxu1 %v6706_v19 }
  0xc2   :  { %1326 = vmatmul.mubr.bf16.gmra.mrb[76].mxu0 %v5468_v15 }
  0xc3   :  { %4216 = vmatpush3.bf16.msra.mxu1 %v5721_v56  ;;  %4199 = vmatprep.mubr.msk.bf16.mxu0 %vm5055_vm0, %v6706_v19 }
  0xc4   :  { %4217 = vmatprep.subr.bf16.mxu1 %v6706_v19 }
  0xc7   :  { %4218 = vmatpush3.bf16.msra.mxu1 %v5729_v57 }
  0xc8   :  { %4243 = vmatprep.subr.bf16.mxu1 %v6706_v19 }
  0xca   :  { %4220 = vmatmul.mubr.bf16.vlgmr.msra.gmra.mrb[68].mxu1 %v5056_v50  ;;  %4200 = vmatmul.mubr.bf16.vlgmr.msra.gmra.mrb[80].mxu0 %v5056_v50 }
  0xcb   :  { %4224 = vmatpush3.bf16.msra.mxu0 %v5542_v43  ;;  %4244 = vmatpush3.bf16.msra.mxu1 %v5547_v44 }
  0xcc   :  { %4225 = vmatprep.subr.bf16.mxu0 %v6706_v19  ;;  %4245 = vmatprep.subr.bf16.mxu1 %v6706_v19 }
  0xcd   :  { %4239 = vmatprep.mubr.msk.bf16.mxu0 %vm5055_vm0, %v6706_v19  ;;  %4259 = vmatprep.mubr.msk.bf16.mxu1 %vm5055_vm0, %v6706_v19 }
  0xcf   :  { %4226 = vmatpush3.bf16.msra.mxu0 %v5557_v23  ;;  %4246 = vmatpush3.bf16.msra.mxu1 %v5562_v24 }
  0xd0   :  { %4227 = vmatprep.subr.bf16.mxu0 %v6706_v19  ;;  %4247 = vmatprep.subr.bf16.mxu1 %v6706_v19 }
  0xd3   :  { %4228 = vmatpush3.bf16.msra.mxu0 %v5572_v27  ;;  %4248 = vmatpush3.bf16.msra.mxu1 %v5580_v29 }
  0xd4   :  { %4229 = vmatprep.subr.bf16.mxu0 %v6706_v19  ;;  %4249 = vmatprep.subr.bf16.mxu1 %v6706_v19 }
  0xd7   :  { %4230 = vmatpush3.bf16.msra.mxu0 %v5588_v32  ;;  %4250 = vmatpush3.bf16.msra.mxu1 %v5597_v33 }
  0xd8   :  { %4231 = vmatprep.subr.bf16.mxu0 %v6706_v19  ;;  %4251 = vmatprep.subr.bf16.mxu1 %v6706_v19 }
  0xdb   :  { %4232 = vmatpush3.bf16.msra.mxu0 %v5604_v36  ;;  %4252 = vmatpush3.bf16.msra.mxu1 %v5613_v38 }
  0xdc   :  { %4233 = vmatprep.subr.bf16.mxu0 %v6706_v19  ;;  %4253 = vmatprep.subr.bf16.mxu1 %v6706_v19 }
  0xdf   :  { %4234 = vmatpush3.bf16.msra.mxu0 %v5619_v41  ;;  %4254 = vmatpush3.bf16.msra.mxu1 %v5637_v45 }
  0xe0   :  { %4235 = vmatprep.subr.bf16.mxu0 %v6706_v19  ;;  %4255 = vmatprep.subr.bf16.mxu1 %v6706_v19 }
  0xe3   :  { %4236 = vmatpush3.bf16.msra.mxu0 %v5630_v42  ;;  %4256 = vmatpush3.bf16.msra.mxu1 %v5655_v47 }
  0xe4   :  { %4237 = vmatprep.subr.bf16.mxu0 %v6706_v19  ;;  %4257 = vmatprep.subr.bf16.mxu1 %v6706_v19 }
  0xe7   :  { %4238 = vmatpush3.bf16.msra.mxu0 %v5645_v46  ;;  %4258 = vmatpush3.bf16.msra.mxu1 %v5669_v49 }
  0xe8   :  { %4263 = vmatprep.subr.bf16.mxu0 %v6706_v19  ;;  %4283 = vmatprep.subr.bf16.mxu1 %v6706_v19 }
  0xfd   :  { %v3600_v58 = vpop.f32.mrb[0].mxu0  ;;  %v4085_v59 = vpop.f32.mrb[0].mxu1 }
  0xfe   :  { %v3601_v60 = vpop.f32.mrb[1].mxu0  ;;  %v550_v62 = vpop.f32.mrb[1].mxu1 }
  0xff   :  { %v3602_v63 = vadd.f32 %v3601_v60, %v3600_v58  ;;  %v3603_v0 = vpop.f32.mrb[2].mxu0  ;;  %v4086_v1 = vpop.f32.mrb[2].mxu1 }
 0x100   :  { %v3604_v2 = vpop.f32.mrb[3].mxu0  ;;  %v553_v3 = vpop.f32.mrb[3].mxu1 }
 0x101   :  { %v3605_v4 = vadd.f32 %v3604_v2, %v3603_v0  ;;  %v454_v5 = vadd.f32 %v3602_v63, %v5775_v61 }
 0x103   :  { %v5778_v6 = vadd.f32 %v550_v62, %v454_v5  ;;  %v457_v7 = vadd.f32 %v3605_v4, %v5775_v61 }
 0x105   :  { %v5781_v8 = vadd.f32 %v553_v3, %v457_v7  ;;  %v3606_v9 = vpop.f32.mrb[4].mxu0  ;;  %v4089_v10 = vpop.f32.mrb[4].mxu1 }
 0x106   :  { %v3607_v11 = vpop.f32.mrb[5].mxu0  ;;  %v566_v12 = vpop.f32.mrb[5].mxu1 }
 0x107   :  { %v3608_v13 = vadd.f32 %v3607_v11, %v3606_v9  ;;  %v3609_v14 = vpop.f32.mrb[6].mxu0  ;;  %v4090_v15 = vpop.f32.mrb[6].mxu1 }
 0x108   :  { %v3610_v16 = vpop.f32.mrb[7].mxu0  ;;  %v569_v17 = vpop.f32.mrb[7].mxu1 }
 0x109   :  { %v462_v18 = vadd.f32 %v3608_v13, %v5775_v61  ;;  %v3611_v20 = vadd.f32 %v3610_v16, %v3609_v14 }
 0x10b   :  { %v465_v21 = vadd.f32 %v3611_v20, %v5775_v61  ;;  %v5785_v22 = vadd.f32 %v4085_v59, %v462_v18 }
 0x10d   :  { %v3612_v25 = vpop.f32.mrb[8].mxu0  ;;  %v4093_v26 = vpop.f32.mrb[8].mxu1  ;;  %v5787_v28 = vadd.f32 %v4086_v1, %v465_v21 }
 0x10e   :  { %v3613_v30 = vpop.f32.mrb[9].mxu0  ;;  %v582_v31 = vpop.f32.mrb[9].mxu1 }
 0x10f   :  { %v3614_v34 = vadd.f32 %v3613_v30, %v3612_v25  ;;  %v3615_v35 = vpop.f32.mrb[10].mxu0  ;;  %v4094_v37 = vpop.f32.mrb[10].mxu1 }
 0x110   :  { %v3616_v39 = vpop.f32.mrb[11].mxu0  ;;  %v585_v40 = vpop.f32.mrb[11].mxu1 }
 0x111   :  { %v3617_v44 = vadd.f32 %v3616_v39, %v3615_v35  ;;  %v470_v24 = vadd.f32 %v3614_v34, %v5775_v61 }
 0x113   :  { %v5790_v29 = vadd.f32 %v566_v12, %v470_v24  ;;  %v473_v50 = vadd.f32 %v3617_v44, %v5775_v61 }
 0x115   :  { %v5793_v58 = vadd.f32 %v569_v17, %v473_v50  ;;  %v3618_v59 = vpop.f32.mrb[12].mxu0  ;;  %v5795_v60 = vpop.f32.mrb[12].mxu1 }
 0x116   :  { %v3619_v62 = vpop.f32.mrb[13].mxu0  ;;  %v5797_v63 = vpop.f32.mrb[13].mxu1 }
 0x117   :  { %6714 = vst [vmem:[#allocation5_spill] sm:$0xff] %v5793_v58  ;;  %v3620_v0 = vadd.f32 %v3619_v62, %v3618_v59  ;;  %v3621_v1 = vpop.f32.mrb[14].mxu0  ;;  %v5799_v2 = vpop.f32.mrb[14].mxu1 }
 0x118   :  { %v3622_v3 = vpop.f32.mrb[15].mxu0  ;;  %v601_v4 = vpop.f32.mrb[15].mxu1 }
 0x119   :  { %v478_v5 = vadd.f32 %v3620_v0, %v5775_v61  ;;  %v3623_v7 = vadd.f32 %v3622_v3, %v3621_v1 }
 0x11b   :  { %v481_v9 = vadd.f32 %v3623_v7, %v5775_v61  ;;  %v5803_v11 = vadd.f32 %v4089_v10, %v478_v5 }
 0x11d   :  { %6715 = vst [vmem:[#allocation6_spill] sm:$0xff] %v5803_v11  ;;  %v3624_v12 = vpop.f32.mrb[16].mxu0  ;;  %v3680_v13 = vpop.f32.mrb[16].mxu1  ;;  %v5805_v14 = vadd.f32 %v4090_v15, %v481_v9 }
 0x11e   :  { %v3625_v16 = vpop.f32.mrb[17].mxu0  ;;  %v3681_v17 = vpop.f32.mrb[17].mxu1 }
 0x11f   :  { %6716 = vst [vmem:[#allocation7_spill] sm:$0xff] %v5805_v14  ;;  %v3626_v18 = vadd.f32 %v3625_v16, %v3624_v12  ;;  %v3627_v20 = vpop.f32.mrb[18].mxu0  ;;  %v5807_v21 = vadd.f32 %v3681_v17, %v3680_v13  ;;  %v3683_v25 = vpop.f32.mrb[18].mxu1  ;;  %v5820_v13 = vld [vmem:[%s6692_s8] ss:$0 sm:$0xff] }
 0x120   :  { %v3628_v30 = vpop.f32.mrb[19].mxu0  ;;  %v3684_v34 = vpop.f32.mrb[19].mxu1 }
 0x121   :  { %v486_v35 = vadd.f32 %v3626_v18, %v5775_v61  ;;  %v3629_v39 = vadd.f32 %v3628_v30, %v3627_v20  ;;  %v5810_v44 = vadd.f32 %v3684_v34, %v3683_v25 }
 0x123   :  { %v489_v10 = vadd.f32 %v3629_v39, %v5775_v61  ;;  %v5813_v24 = vadd.f32 %v582_v31, %v486_v35 }
 0x125   :  { %6717 = vst [vmem:[#allocation8_spill] sm:$0xff] %v5813_v24  ;;  %v3630_v15 = vpop.f32.mrb[20].mxu0  ;;  %v3686_v50 = vpop.f32.mrb[20].mxu1  ;;  %v5815_v59 = vadd.f32 %v585_v40, %v489_v10 }
 0x126   :  { %v3631_v62 = vpop.f32.mrb[21].mxu0  ;;  %v3687_v0 = vpop.f32.mrb[21].mxu1 }
 0x127   :  { %6718 = vst [vmem:[#allocation9_spill] sm:$0xff] %v5815_v59  ;;  %v3632_v1 = vadd.f32 %v3631_v62, %v3630_v15  ;;  %v3633_v3 = vpop.f32.mrb[22].mxu0  ;;  %v3688_v5 = vadd.f32 %v3687_v0, %v3686_v50  ;;  %v3689_v7 = vpop.f32.mrb[22].mxu1 }
 0x128   :  { %v3634_v9 = vpop.f32.mrb[23].mxu0  ;;  %v3690_v12 = vpop.f32.mrb[23].mxu1 }
 0x129   :  { %v494_v31 = vadd.f32 %v3632_v1, %v5775_v61  ;;  %v3635_v16 = vadd.f32 %v3634_v9, %v3633_v3  ;;  %v3691_v17 = vadd.f32 %v3690_v12, %v3689_v7  ;;  %v871_v40 = vadd.f32 %v3688_v5, %v5820_v13 }
 0x12b   :  { %v497_v18 = vadd.f32 %v3635_v16, %v5775_v61  ;;  %v874_v20 = vadd.f32 %v3691_v17, %v5820_v13  ;;  %v5826_v25 = vadd.f32 %v4093_v26, %v494_v31 }
 0x12d   :  { %6719 = vst [vmem:[#allocation10_spill] sm:$0xff] %v5826_v25  ;;  %v3636_v30 = vpop.f32.mrb[24].mxu0  ;;  %v3692_v34 = vpop.f32.mrb[24].mxu1  ;;  %v5828_v35 = vadd.f32 %v4094_v37, %v497_v18 }
 0x12e   :  { %v3637_v39 = vpop.f32.mrb[25].mxu0  ;;  %v3693_v10 = vpop.f32.mrb[25].mxu1 }
 0x12f   :  { %6720 = vst [vmem:[#allocation11_spill] sm:$0xff] %v5828_v35  ;;  %v3638_v15 = vadd.f32 %v3637_v39, %v3636_v30  ;;  %v3639_v50 = vpop.f32.mrb[26].mxu0  ;;  %v3694_v62 = vadd.f32 %v3693_v10, %v3692_v34  ;;  %v3695_v0 = vpop.f32.mrb[26].mxu1 }
 0x130   :  { %v3640_v1 = vpop.f32.mrb[27].mxu0  ;;  %v3696_v3 = vpop.f32.mrb[27].mxu1 }
 0x131   :  { %v502_v5 = vadd.f32 %v3638_v15, %v5775_v61  ;;  %v3641_v7 = vadd.f32 %v3640_v1, %v3639_v50  ;;  %v3697_v9 = vadd.f32 %v3696_v3, %v3695_v0  ;;  %v879_v12 = vadd.f32 %v3694_v62, %v5820_v13 }
 0x133   :  { %v505_v26 = vadd.f32 %v3641_v7, %v5775_v61  ;;  %v882_v31 = vadd.f32 %v3697_v9, %v5820_v13  ;;  %v5835_v37 = vadd.f32 %v5797_v63, %v502_v5 }
 0x135   :  { %6721 = vst [vmem:[#allocation12_spill] sm:$0xff] %v5835_v37  ;;  %v3642_v16 = vpop.f32.mrb[28].mxu0  ;;  %v3698_v17 = vpop.f32.mrb[28].mxu1  ;;  %v5837_v18 = vadd.f32 %v601_v4, %v505_v26 }
 0x136   :  { %v3643_v30 = vpop.f32.mrb[29].mxu0  ;;  %v3699_v34 = vpop.f32.mrb[29].mxu1 }
 0x137   :  { %6722 = vst [vmem:[#allocation13_spill] sm:$0xff] %v5837_v18  ;;  %v3644_v39 = vadd.f32 %v3643_v30, %v3642_v16  ;;  %v3645_v10 = vpop.f32.mrb[30].mxu0  ;;  %v3700_v15 = vadd.f32 %v3699_v34, %v3698_v17  ;;  %v3701_v50 = vpop.f32.mrb[30].mxu1  ;;  %v863_v16 = vadd.f32 %v5807_v21, %v5820_v13 }
 0x138   :  { %v3646_v0 = vpop.f32.mrb[31].mxu0  ;;  %v3702_v1 = vpop.f32.mrb[31].mxu1 }
 0x139   :  { %v510_v62 = vadd.f32 %v3644_v39, %v5775_v61  ;;  %v3647_v3 = vadd.f32 %v3646_v0, %v3645_v10  ;;  %v3703_v7 = vadd.f32 %v3702_v1, %v3701_v50  ;;  %v887_v9 = vadd.f32 %v3700_v15, %v5820_v13 }
 0x13a   :  { %v866_v50 = vadd.f32 %v5810_v44, %v5820_v13 }
 0x13b   :  { %v513_v63 = vadd.f32 %v3647_v3, %v5775_v61  ;;  %v890_v5 = vadd.f32 %v3703_v7, %v5820_v13  ;;  %v5844_v4 = vadd.f32 %v5795_v60, %v510_v62 }
 0x13d   :  { %6723 = vst [vmem:[#allocation14_spill] sm:$0xff] %v5844_v4  ;;  %v4117_v26 = vpop.f32.mrb[32].mxu0  ;;  %v3704_v17 = vpop.f32.mrb[32].mxu1  ;;  %v5849_v30 = vadd.f32 %v5799_v2, %v513_v63 }
 0x13e   :  { %v5851_v34 = vadd.f32 %v4117_v26, %v871_v40  ;;  %v959_v39 = vpop.f32.mrb[33].mxu0  ;;  %v3705_v10 = vpop.f32.mrb[33].mxu1 }
 0x13f   :  { %6724 = vst [vmem:[#allocation15_spill] sm:$0xff] %v5849_v30  ;;  %v5853_v15 = vadd.f32 %v959_v39, %v863_v16  ;;  %v4118_v61 = vpop.f32.mrb[34].mxu0  ;;  %v3706_v60 = vadd.f32 %v3705_v10, %v3704_v17  ;;  %v3707_v0 = vpop.f32.mrb[34].mxu1 }
 0x140   :  { %v5857_v1 = vadd.f32 %v4118_v61, %v874_v20  ;;  %v962_v62 = vpop.f32.mrb[35].mxu0  ;;  %v3708_v21 = vpop.f32.mrb[35].mxu1 }
 0x141   :  { %v5859_v3 = vadd.f32 %v962_v62, %v866_v50  ;;  %v3709_v2 = vadd.f32 %v3708_v21, %v3707_v0  ;;  %v895_v40 = vadd.f32 %v3706_v60, %v5820_v13 }
 0x143   :  { %v898_v7 = vadd.f32 %v3709_v2, %v5820_v13 }
 0x145   :  { %v4121_v63 = vpop.f32.mrb[36].mxu0  ;;  %v3710_v26 = vpop.f32.mrb[36].mxu1 }
 0x146   :  { %v5863_v16 = vadd.f32 %v4121_v63, %v887_v9  ;;  %v975_v39 = vpop.f32.mrb[37].mxu0  ;;  %v3711_v19 = vpop.f32.mrb[37].mxu1 }
 0x147   :  { %v5865_v44 = vadd.f32 %v975_v39, %v879_v12  ;;  %v4122_v17 = vpop.f32.mrb[38].mxu0  ;;  %v3712_v20 = vadd.f32 %v3711_v19, %v3710_v26  ;;  %v3713_v10 = vpop.f32.mrb[38].mxu1 }
 0x148   :  { %6725 = vst [vmem:[#allocation16_spill] sm:$0xff] %v5863_v16  ;;  %v5867_v61 = vadd.f32 %v4122_v17, %v890_v5  ;;  %v978_v50 = vpop.f32.mrb[39].mxu0  ;;  %v3714_v62 = vpop.f32.mrb[39].mxu1 }
 0x149   :  { %v5869_v0 = vadd.f32 %v978_v50, %v882_v31  ;;  %v3715_v60 = vadd.f32 %v3714_v62, %v3713_v10  ;;  %v903_v21 = vadd.f32 %v3712_v20, %v5820_v13 }
 0x14a   :  { %6726 = vst [vmem:[#allocation17_spill] sm:$0xff] %v5867_v61 }
 0x14b   :  { %6727 = vst [vmem:[#allocation18_spill] sm:$0xff] %v5869_v0  ;;  %v906_v2 = vadd.f32 %v3715_v60, %v5820_v13 }
 0x14d   :  { %v4125_v9 = vpop.f32.mrb[40].mxu0  ;;  %v3716_v63 = vpop.f32.mrb[40].mxu1 }
 0x14e   :  { %v5873_v30 = vadd.f32 %v4125_v9, %v903_v21  ;;  %v991_v12 = vpop.f32.mrb[41].mxu0  ;;  %v3717_v39 = vpop.f32.mrb[41].mxu1 }
 0x14f   :  { %v5875_v4 = vadd.f32 %v991_v12, %v895_v40  ;;  %v4126_v19 = vpop.f32.mrb[42].mxu0  ;;  %v3718_v5 = vadd.f32 %v3717_v39, %v3716_v63  ;;  %v3719_v26 = vpop.f32.mrb[42].mxu1 }
 0x150   :  { %6728 = vst [vmem:[#allocation19_spill] sm:$0xff] %v5873_v30  ;;  %v5877_v17 = vadd.f32 %v4126_v19, %v906_v2  ;;  %v994_v31 = vpop.f32.mrb[43].mxu0  ;;  %v3720_v50 = vpop.f32.mrb[43].mxu1 }
 0x151   :  { %6729 = vst [vmem:[#allocation20_spill] sm:$0xff] %v5875_v4  ;;  %v5879_v10 = vadd.f32 %v994_v31, %v898_v7  ;;  %v3721_v20 = vadd.f32 %v3720_v50, %v3719_v26  ;;  %v911_v62 = vadd.f32 %v3718_v5, %v5820_v13 }
 0x152   :  { %6730 = vst [vmem:[#allocation21_spill] sm:$0xff] %v5877_v17 }
 0x153   :  { %6731 = vst [vmem:[#allocation22_spill] sm:$0xff] %v5879_v10  ;;  %v914_v60 = vadd.f32 %v3721_v20, %v5820_v13 }
 0x155   :  { %v3722_v21 = vpop.f32.mrb[44].mxu1  ;;  %v4129_v9 = vpop.f32.mrb[44].mxu0 }
 0x156   :  { %v3723_v18 = vpop.f32.mrb[45].mxu1  ;;  %v1007_v37 = vpop.f32.mrb[45].mxu0 }
 0x157   :  { %v3724_v40 = vadd.f32 %v3723_v18, %v3722_v21  ;;  %v5883_v12 = vadd.f32 %v1007_v37, %v911_v62  ;;  %v3725_v63 = vpop.f32.mrb[46].mxu1  ;;  %v4130_v39 = vpop.f32.mrb[46].mxu0  ;;  %v5896_v37 = vld [vmem:[%s6693_s9] ss:$0 sm:$0xff] }
 0x158   :  { %v3726_v2 = vpop.f32.mrb[47].mxu1  ;;  %v1010_v19 = vpop.f32.mrb[47].mxu0 }
 0x159   :  { %6732 = vst [vmem:[#allocation23_spill] sm:$0xff] %v5883_v12  ;;  %v919_v17 = vadd.f32 %v3724_v40, %v5820_v13  ;;  %v3727_v7 = vadd.f32 %v3726_v2, %v3725_v63  ;;  %v5886_v31 = vadd.f32 %v1010_v19, %v914_v60 }
 0x15b   :  { %6733 = vst [vmem:[#allocation24_spill] sm:$0xff] %v5886_v31  ;;  %v922_v5 = vadd.f32 %v3727_v7, %v5820_v13  ;;  %v5889_v26 = vadd.f32 %v4129_v9, %v919_v17 }
 0x15d   :  { %6734 = vst [vmem:[#allocation25_spill] sm:$0xff] %v5889_v26  ;;  %v3760_v50 = vpop.f32.mrb[48].mxu0  ;;  %v4149_v20 = vpop.f32.mrb[48].mxu1  ;;  %v5891_v35 = vadd.f32 %v4130_v39, %v922_v5 }
 0x15e   :  { %v3761_v18 = vpop.f32.mrb[49].mxu0  ;;  %v1368_v62 = vpop.f32.mrb[49].mxu1 }
 0x15f   :  { %6735 = vst [vmem:[#allocation26_spill] sm:$0xff] %v5891_v35  ;;  %v3762_v21 = vadd.f32 %v3761_v18, %v3760_v50  ;;  %v3763_v40 = vpop.f32.mrb[50].mxu0  ;;  %v4150_v63 = vpop.f32.mrb[50].mxu1 }
 0x160   :  { %v3764_v60 = vpop.f32.mrb[51].mxu0  ;;  %v1371_v2 = vpop.f32.mrb[51].mxu1 }
 0x161   :  { %v3765_v19 = vadd.f32 %v3764_v60, %v3763_v40  ;;  %v1272_v13 = vadd.f32 %v3762_v21, %v5896_v37 }
 0x163   :  { %v5899_v17 = vadd.f32 %v1368_v62, %v1272_v13  ;;  %v1275_v9 = vadd.f32 %v3765_v19, %v5896_v37 }
 0x165   :  { %v5902_v39 = vadd.f32 %v1371_v2, %v1275_v9  ;;  %v3766_v7 = vpop.f32.mrb[52].mxu0  ;;  %v4153_v5 = vpop.f32.mrb[52].mxu1 }
 0x166   :  { %v3767_v35 = vpop.f32.mrb[53].mxu0  ;;  %v1384_v26 = vpop.f32.mrb[53].mxu1 }
 0x167   :  { %v3768_v31 = vadd.f32 %v3767_v35, %v3766_v7  ;;  %v3769_v12 = vpop.f32.mrb[54].mxu0  ;;  %v4154_v50 = vpop.f32.mrb[54].mxu1 }
 0x168   :  { %v3770_v18 = vpop.f32.mrb[55].mxu0  ;;  %v1387_v30 = vpop.f32.mrb[55].mxu1 }
 0x169   :  { %v1280_v25 = vadd.f32 %v3768_v31, %v5896_v37  ;;  %v3771_v40 = vadd.f32 %v3770_v18, %v3769_v12 }
 0x16b   :  { %v5905_v60 = vadd.f32 %v4149_v20, %v1280_v25  ;;  %v1283_v62 = vadd.f32 %v3771_v40, %v5896_v37 }
 0x16d   :  { %v5908_v21 = vadd.f32 %v4150_v63, %v1283_v62  ;;  %v3772_v2 = vpop.f32.mrb[56].mxu0  ;;  %v4157_v19 = vpop.f32.mrb[56].mxu1 }
 0x16e   :  { %v3773_v13 = vpop.f32.mrb[57].mxu0  ;;  %v1400_v9 = vpop.f32.mrb[57].mxu1 }
 0x16f   :  { %v3774_v10 = vadd.f32 %v3773_v13, %v3772_v2  ;;  %v3775_v59 = vpop.f32.mrb[58].mxu0  ;;  %v4158_v35 = vpop.f32.mrb[58].mxu1 }
 0x170   :  { %v3776_v7 = vpop.f32.mrb[59].mxu0  ;;  %v1403_v4 = vpop.f32.mrb[59].mxu1 }
 0x171   :  { %v3777_v24 = vadd.f32 %v3776_v7, %v3775_v59  ;;  %v1288_v61 = vadd.f32 %v3774_v10, %v5896_v37 }
 0x173   :  { %v5911_v31 = vadd.f32 %v1384_v26, %v1288_v61  ;;  %v1291_v25 = vadd.f32 %v3777_v24, %v5896_v37 }
 0x175   :  { %6736 = vst [vmem:[#allocation27_spill] sm:$0xff] %v5911_v31  ;;  %v5914_v12 = vadd.f32 %v1387_v30, %v1291_v25  ;;  %v3778_v20 = vpop.f32.mrb[60].mxu0  ;;  %v5916_v63 = vpop.f32.mrb[60].mxu1 }
 0x176   :  { %v3779_v18 = vpop.f32.mrb[61].mxu0  ;;  %v1416_v40 = vpop.f32.mrb[61].mxu1 }
 0x177   :  { %6737 = vst [vmem:[#allocation28_spill] sm:$0xff] %v5914_v12  ;;  %v3780_v62 = vadd.f32 %v3779_v18, %v3778_v20  ;;  %v3781_v2 = vpop.f32.mrb[62].mxu0  ;;  %v5918_v13 = vpop.f32.mrb[62].mxu1 }
 0x178   :  { %v3782_v14 = vpop.f32.mrb[63].mxu0  ;;  %v1419_v16 = vpop.f32.mrb[63].mxu1 }
 0x179   :  { %v1296_v59 = vadd.f32 %v3780_v62, %v5896_v37  ;;  %v3783_v10 = vadd.f32 %v3782_v14, %v3781_v2 }
 0x17b   :  { %v5921_v61 = vadd.f32 %v4153_v5, %v1296_v59  ;;  %v1299_v24 = vadd.f32 %v3783_v10, %v5896_v37 }
 0x17d   :  { %v5924_v30 = vadd.f32 %v4154_v50, %v1299_v24  ;;  %v3784_v26 = vpop.f32.mrb[64].mxu0  ;;  %v1584_v7 = vpop.f32.mrb[64].mxu1 }
 0x17e   :  { %v1682_v25 = vadd.f32 %v1584_v7, %v5778_v6  ;;  %v3785_v11 = vpop.f32.mrb[65].mxu0  ;;  %v4181_v20 = vpop.f32.mrb[65].mxu1 }
 0x17f   :  { %v3786_v18 = vadd.f32 %v3785_v11, %v3784_v26  ;;  %v3787_v12 = vpop.f32.mrb[66].mxu0  ;;  %v1587_v31 = vpop.f32.mrb[66].mxu1 }
 0x180   :  { %v3517_v0 = vmul.f32 -1.442695, %v1682_v25  ;;  %v1683_v58 = vadd.f32 %v1587_v31, %v5781_v8  ;;  %v3788_v62 = vpop.f32.mrb[67].mxu0  ;;  %v4182_v14 = vpop.f32.mrb[67].mxu1 }
 0x181   :  { %v1304_v5 = vadd.f32 %v3786_v18, %v5896_v37  ;;  %v3789_v2 = vadd.f32 %v3788_v62, %v3787_v12 }
 0x182   :  { %v3518_v59 = vmul.f32 -1.442695, %v1683_v58  ;;  %4858 = vpow2.f32 %v3517_v0 }
 0x183   :  { %v5929_v50 = vadd.f32 %v1400_v9, %v1304_v5  ;;  %v1307_v10 = vadd.f32 %v3789_v2, %v5896_v37 }
 0x184   :  { %4860 = vpow2.f32 %v3518_v59 }
 0x185   :  { %v5932_v6 = vadd.f32 %v1403_v4, %v1307_v10  ;;  %v3790_v24 = vpop.f32.mrb[68].mxu0 }
 0x186   :  { %v3791_v11 = vpop.f32.mrb[69].mxu0 }
 0x187   :  { %v3792_v26 = vadd.f32 %v3791_v11, %v3790_v24  ;;  %v3793_v7 = vpop.f32.mrb[70].mxu0 }
 0x188   :  { %v3794_v25 = vpop.f32.mrb[71].mxu0 }
 0x189   :  { %v1312_v8 = vadd.f32 %v3792_v26, %v5896_v37  ;;  %v3795_v31 = vadd.f32 %v3794_v25, %v3793_v7 }
 0x18b   :  { %v5935_v20 = vadd.f32 %v4157_v19, %v1312_v8  ;;  %v1315_v58 = vadd.f32 %v3795_v31, %v5896_v37 }
 0x18c   :  { %v4859_v18 = vpop.eup %4858 }
 0x18d   :  { %v5938_v9 = vadd.f32 %v4158_v35, %v1315_v58  ;;  %v3796_v12 = vpop.f32.mrb[72].mxu0  ;;  %v1690_v2 = vadd.f32 1.0, %v4859_v18 }
 0x18e   :  { %v3797_v0 = vpop.f32.mrb[73].mxu0  ;;  %v4861_v14 = vpop.eup %4860 }
 0x18f   :  { %v3798_v4 = vadd.f32 %v3797_v0, %v3796_v12  ;;  %v3799_v62 = vpop.f32.mrb[74].mxu0  ;;  %v1691_v24 = vadd.f32 1.0, %v4861_v14  ;;  %4862 = vrcp.f32 %v1690_v2  ;;  %v5954_v0 = vld [vmem:[%s6694_s10] ss:$0 sm:$0xff] }
 0x190   :  { %v3800_v5 = vpop.f32.mrb[75].mxu0 }
 0x191   :  { %v1320_v59 = vadd.f32 %v3798_v4, %v5896_v37  ;;  %v3801_v10 = vadd.f32 %v3800_v5, %v3799_v62  ;;  %4864 = vrcp.f32 %v1691_v24 }
 0x193   :  { %v5941_v11 = vadd.f32 %v1416_v40, %v1320_v59  ;;  %v1323_v19 = vadd.f32 %v3801_v10, %v5896_v37 }
 0x195   :  { %v5944_v26 = vadd.f32 %v1419_v16, %v1323_v19  ;;  %v3802_v35 = vpop.f32.mrb[76].mxu0 }
 0x196   :  { %v3803_v7 = vpop.f32.mrb[77].mxu0 }
 0x197   :  { %v3804_v25 = vadd.f32 %v3803_v7, %v3802_v35  ;;  %v3805_v8 = vpop.f32.mrb[78].mxu0 }
 0x198   :  { %v3806_v31 = vpop.f32.mrb[79].mxu0 }
 0x199   :  { %v1328_v58 = vadd.f32 %v3804_v25, %v5896_v37  ;;  %v3807_v12 = vadd.f32 %v3806_v31, %v3805_v8 }
 0x19b   :  { %v5948_v18 = vadd.f32 %v5916_v63, %v1328_v58  ;;  %v1331_v40 = vadd.f32 %v3807_v12, %v5896_v37  ;;  %v4863_v63 = vpop.eup %4862 }
 0x19c   :  { %v4865_v8 = vpop.eup %4864 }
 0x19d   :  { %v5957_v16 = vadd.f32 %v5918_v13, %v1331_v40  ;;  %v1796_v4 = vpop.f32.mrb[68].mxu1  ;;  %v1673_v62 = vpop.f32.mrb[80].mxu0 }
 0x19e   :  { %v1797_v14 = vadd.f32 %v5954_v0, %v1796_v4  ;;  %v1698_v5 = vadd.f32 %v1673_v62, %v5853_v15  ;;  %v4221_v2 = vpop.f32.mrb[69].mxu1  ;;  %v4201_v59 = vpop.f32.mrb[81].mxu0 }
 0x19f   :  { %v1799_v10 = vpop.f32.mrb[70].mxu1  ;;  %v1676_v24 = vpop.f32.mrb[82].mxu0 }
 0x1a0   :  { %v1803_v37 = vmul.f32 %v4863_v63, %v1797_v14  ;;  %v3519_v19 = vmul.f32 -1.442695, %v1698_v5  ;;  %v1800_v35 = vadd.f32 %v5954_v0, %v1799_v10  ;;  %v1699_v7 = vadd.f32 %v1676_v24, %v5859_v3  ;;  %v4202_v25 = vpop.f32.mrb[83].mxu0  ;;  %v4222_v13 = vpop.f32.mrb[71].mxu1 }
 0x1a1   :  { %v6738_v25 = vmov 0.0  }
 0x1a2   :  { %v1805_v31 = vadd.f32 %v1803_v37, %v5899_v17  ;;  %4866 = vpow2.f32 %v3519_v19  ;;  %v1804_v58 = vmul.f32 %v4865_v8, %v1800_v35  ;;  %v3520_v12 = vmul.f32 -1.442695, %v1699_v7 }
 0x1a4   :  { %v1806_v15 = vadd.f32 %v1804_v58, %v5902_v39  ;;  %4868 = vpow2.f32 %v3520_v12 }
 0x1ac   :  { %v4867_v40 = vpop.eup %4866 }
 0x1ad   :  { %v1706_v4 = vadd.f32 1.0, %v4867_v40 }
 0x1ae   :  { %v4869_v62 = vpop.eup %4868 }
 0x1af   :  { %4870 = vrcp.f32 %v1706_v4  ;;  %v1707_v14 = vadd.f32 1.0, %v4869_v62 }
 0x1b0   :  { %4872 = vtanh.f32 %v1805_v31 }
 0x1b1   :  { %4874 = vrcp.f32 %v1707_v14 }
 0x1b2   :  { %4876 = vtanh.f32 %v1806_v15 }
 0x1b9   :  { %v4871_v3 = vpop.eup %4870 }
 0x1ba   :  { %v1809_v5 = vsub.f32 1.0, %v4871_v3  ;;  %v4873_v2 = vpop.eup %4872  ;;  %v1813_v17 = vmul.f32 0.0, %v4871_v3 }
 0x1bb   :  { %v4875_v59 = vpop.eup %4874 }
 0x1bc   :  { %v1811_v63 = vmul.f32 %v4873_v2, %v1809_v5  ;;  %v1810_v10 = vsub.f32 1.0, %v4875_v59  ;;  %v4877_v24 = vpop.eup %4876  ;;  %v1814_v19 = vmul.f32 0.0, %v4875_v59 }
 0x1be   :  { %v5965_v37 = vadd.f32 %v1813_v17, %v1811_v63  ;;  %v1812_v39 = vmul.f32 %v4877_v24, %v1810_v10 }
 0x1c0   :  { %v5967_v35 = vadd.f32 %v1814_v19, %v1812_v39 }
 0x1c2   :  { %v1817_v7 = vpack.c.bf16 %v5967_v35, %v5965_v37 }
 0x1c4   :  { %4240 = vmatmul.mubr.bf16.vlgmr.msra.gmra.mrb[84].mxu0 %v1817_v7  ;;  %4260 = vmatmul.mubr.bf16.vlgmr.msra.gmra.mrb[72].mxu1 %v1817_v7 }
 0x1c5   :  { %4264 = vmatpush3.bf16.msra.mxu0 %v5662_v48  ;;  %4279 = vmatprep.mubr.msk.bf16.mxu0 %vm5055_vm0, %v6738_v25 }
 0x1c6   :  { %4265 = vmatprep.subr.bf16.mxu0 %v6738_v25  ;;  %4284 = vmatpush3.bf16.msra.mxu1 %v5542_v43  ;;  %v6010_v43 = vld [vmem:[%s6689_s5] sm:$0xff]  }
 0x1c7   :  { %4285 = vmatprep.subr.bf16.mxu1 %v6738_v25  ;;  %4299 = vmatprep.mubr.msk.bf16.mxu1 %vm5055_vm0, %v6738_v25 }
 0x1c9   :  { %4266 = vmatpush3.bf16.msra.mxu0 %v5676_v51 }
 0x1ca   :  { %4267 = vmatprep.subr.bf16.mxu0 %v6738_v25  ;;  %4286 = vmatpush3.bf16.msra.mxu1 %v5557_v23  ;;  %v6019_v23 = vld [vmem:[%s6689_s5 + $0x8] sm:$0xff]  }
 0x1cb   :  { %4287 = vmatprep.subr.bf16.mxu1 %v6738_v25 }
 0x1cd   :  { %4268 = vmatpush3.bf16.msra.mxu0 %v5689_v52 }
 0x1ce   :  { %4269 = vmatprep.subr.bf16.mxu0 %v6738_v25  ;;  %4288 = vmatpush3.bf16.msra.mxu1 %v5572_v27  ;;  %v6026_v27 = vld [vmem:[%s6689_s5 + $0x10] sm:$0xff]  }
 0x1cf   :  { %4289 = vmatprep.subr.bf16.mxu1 %v6738_v25 }
 0x1d1   :  { %4270 = vmatpush3.bf16.msra.mxu0 %v5697_v53 }
 0x1d2   :  { %4271 = vmatprep.subr.bf16.mxu0 %v6738_v25  ;;  %4290 = vmatpush3.bf16.msra.mxu1 %v5588_v32 }
 0x1d3   :  { %4291 = vmatprep.subr.bf16.mxu1 %v6738_v25 }
 0x1d5   :  { %4272 = vmatpush3.bf16.msra.mxu0 %v5705_v54 }
 0x1d6   :  { %4273 = vmatprep.subr.bf16.mxu0 %v6738_v25  ;;  %4292 = vmatpush3.bf16.msra.mxu1 %v5604_v36 }
 0x1d7   :  { %4293 = vmatprep.subr.bf16.mxu1 %v6738_v25 }
 0x1d9   :  { %4274 = vmatpush3.bf16.msra.mxu0 %v5713_v55 }
 0x1da   :  { %4275 = vmatprep.subr.bf16.mxu0 %v6738_v25  ;;  %4294 = vmatpush3.bf16.msra.mxu1 %v5619_v41 }
 0x1db   :  { %4295 = vmatprep.subr.bf16.mxu1 %v6738_v25 }
 0x1dd   :  { %4276 = vmatpush3.bf16.msra.mxu0 %v5721_v56 }
 0x1de   :  { %4277 = vmatprep.subr.bf16.mxu0 %v6738_v25  ;;  %4296 = vmatpush3.bf16.msra.mxu1 %v5630_v42 }
 0x1df   :  { %4297 = vmatprep.subr.bf16.mxu1 %v6738_v25 }
 0x1e1   :  { %4278 = vmatpush3.bf16.msra.mxu0 %v5729_v57 }
 0x1e2   :  { %4303 = vmatprep.subr.bf16.mxu0 %v6738_v25  ;;  %4298 = vmatpush3.bf16.msra.mxu1 %v5645_v46 }
 0x1e3   :  { %4323 = vmatprep.subr.bf16.mxu1 %v6738_v25 }
 0x1e4   :  { %4280 = vmatmul.mubr.bf16.vlgmr.msra.gmra.mrb[88].mxu0 %v1817_v7 }
 0x1e5   :  { %4304 = vmatpush3.bf16.msra.mxu0 %v6010_v43  ;;  %4319 = vmatprep.mubr.msk.bf16.mxu0 %vm5055_vm0, %v6738_v25 }
 0x1e6   :  { %4305 = vmatprep.subr.bf16.mxu0 %v6738_v25 }
 0x1e9   :  { %4306 = vmatpush3.bf16.msra.mxu0 %v6019_v23 }
 0x1ea   :  { %4307 = vmatprep.subr.bf16.mxu0 %v6738_v25 }
 0x1ed   :  { %4308 = vmatpush3.bf16.msra.mxu0 %v6026_v27 }
 0x1ee   :  { %4309 = vmatprep.subr.bf16.mxu0 %v6738_v25 }
 0x1f1   :  { %4310 = vmatpush3.bf16.msra.mxu0 %v5597_v33 }
 0x1f2   :  { %4311 = vmatprep.subr.bf16.mxu0 %v6738_v25 }
 0x1f5   :  { %4312 = vmatpush3.bf16.msra.mxu0 %v5613_v38 }
 0x1f6   :  { %4313 = vmatprep.subr.bf16.mxu0 %v6738_v25 }
 0x1f9   :  { %4314 = vmatpush3.bf16.msra.mxu0 %v5637_v45 }
 0x1fa   :  { %4315 = vmatprep.subr.bf16.mxu0 %v6738_v25 }
 0x1fd   :  { %4316 = vmatpush3.bf16.msra.mxu0 %v5655_v47 }
 0x1fe   :  { %4317 = vmatprep.subr.bf16.mxu0 %v6738_v25 }
 0x201   :  { %4318 = vmatpush3.bf16.msra.mxu0 %v5669_v49 }
 0x202   :  { %4343 = vmatprep.subr.bf16.mxu0 %v6738_v25 }
 0x297   :  { %v1852_v32 = vpop.f32.mrb[84].mxu0  ;;  %v1893_v33 = vpop.f32.mrb[72].mxu1 }
 0x298   :  { %v1903_v36 = vadd.f32 %v1852_v32, %v5785_v22  ;;  %v1920_v38 = vadd.f32 %v1893_v33, %v5851_v34  ;;  %v4241_v41 = vpop.f32.mrb[85].mxu0  ;;  %v4261_v42 = vpop.f32.mrb[73].mxu1 }
 0x299   :  { %v1855_v46 = vpop.f32.mrb[86].mxu0  ;;  %v1896_v45 = vpop.f32.mrb[74].mxu1  ;;  %v6059_v41 = vld [vmem:[%s6690_s6] sm:$0xff]   ;;  %v6084_v42 = vld [vmem:[%s6688_s4 + $0x8] sm:$0xff]  }
 0x29a   :  { %v3529_v48 = vmul.f32 -1.442695, %v1903_v36  ;;  %v1904_v51 = vadd.f32 %v1855_v46, %v5787_v28  ;;  %v1921_v47 = vadd.f32 %v1896_v45, %v5857_v1  ;;  %v4242_v52 = vpop.f32.mrb[87].mxu0  ;;  %v4262_v53 = vpop.f32.mrb[75].mxu1  ;;  %v3531_v54 = vmul.f32 -1.442695, %v1920_v38 }
 0x29b   :  { %v6091_v46 = vld [vmem:[%s6690_s6 + $0x10] sm:$0xff]   ;;  %v6126_v52 = vld [vmem:[%s6688_s4 + $0x20] sm:$0xff]   ;;  %v6133_v53 = vld [vmem:[%s6690_s6 + $0x28] sm:$0xff]  }
 0x29c   :  { %v3530_v49 = vmul.f32 -1.442695, %v1904_v51  ;;  %4878 = vpow2.f32 %v3529_v48  ;;  %v3532_v55 = vmul.f32 -1.442695, %v1921_v47  ;;  %v6098_v45 = vld [vmem:[%s6688_s4 + $0x10] sm:$0xff]   ;;  %v6105_v48 = vld [vmem:[%s6690_s6 + $0x18] sm:$0xff]  }
 0x29d   :  { %v6112_v51 = vld [vmem:[%s6688_s4 + $0x18] sm:$0xff]   ;;  %v6119_v47 = vld [vmem:[%s6690_s6 + $0x20] sm:$0xff]  }
 0x29e   :  { %4880 = vpow2.f32 %v3530_v49  ;;  %v6140_v49 = vld [vmem:[%s6688_s4 + $0x28] sm:$0xff]  }
 0x29f   :  { %4882 = vpow2.f32 %v3531_v54  ;;  %v6147_v54 = vld [vmem:[%s6690_s6 + $0x30] sm:$0xff]  }
 0x2a0   :  { %4884 = vpow2.f32 %v3532_v55  ;;  %v6154_v55 = vld [vmem:[%s6688_s4 + $0x30] sm:$0xff]  }
 0x2a6   :  { %v4879_v56 = vpop.eup %4878 }
 0x2a7   :  { %v1911_v22 = vadd.f32 1.0, %v4879_v56  ;;  %v6161_v56 = vld [vmem:[%s6690_s6 + $0x38] sm:$0xff]  }
 0x2a8   :  { %v4881_v57 = vpop.eup %4880 }
 0x2a9   :  { %v1912_v34 = vadd.f32 1.0, %v4881_v57  ;;  %4886 = vrcp.f32 %v1911_v22  ;;  %v4883_v13 = vpop.eup %4882  ;;  %v6168_v57 = vld [vmem:[%s6688_s4 + $0x38] sm:$0xff]  }
 0x2aa   :  { %v4885_v8 = vpop.eup %4884  ;;  %v1928_v28 = vadd.f32 1.0, %v4883_v13  ;;  %v6183_v22 = vld [vmem:[%s6689_s5 + $0x18] sm:$0xff]   ;;  %v6197_v13 = vld [vmem:[%s6689_s5 + $0x28] sm:$0xff]  }
 0x2ab   :  { %4888 = vrcp.f32 %v1912_v34  ;;  %v1929_v1 = vadd.f32 1.0, %v4885_v8  ;;  %v6190_v34 = vld [vmem:[%s6689_s5 + $0x20] sm:$0xff]   ;;  %v6204_v8 = vld [vmem:[%s6689_s5 + $0x30] sm:$0xff]  }
 0x2ac   :  { %4890 = vrcp.f32 %v1928_v28  ;;  %v6211_v28 = vld [vmem:[%s6689_s5 + $0x38] sm:$0xff]  }
 0x2ad   :  { %4892 = vrcp.f32 %v1929_v1 }
 0x2b3   :  { %v4887_v15 = vpop.eup %4886 }
 0x2b5   :  { %v4889_v3 = vpop.eup %4888 }
 0x2b6   :  { %v4891_v63 = vpop.eup %4890 }
 0x2b7   :  { %v1971_v31 = vpop.f32.mrb[88].mxu0  ;;  %v4893_v17 = vpop.eup %4892  ;;  %v1984_v10 = vsub.f32 1.0, %v4891_v63  ;;  %v1988_v7 = vmul.f32 %v4891_v63, %v5965_v37  ;;  %v6068_v37 = vld [vmem:[%s6688_s4] sm:$0xff]  }
 0x2b8   :  { %v1972_v58 = vadd.f32 %v5954_v0, %v1971_v31  ;;  %v4281_v12 = vpop.f32.mrb[89].mxu0  ;;  %v1985_v39 = vsub.f32 1.0, %v4893_v17  ;;  %v1989_v36 = vmul.f32 %v4893_v17, %v5967_v35  ;;  %v6077_v35 = vld [vmem:[%s6690_s6 + $0x8] sm:$0xff]  }
 0x2b9   :  { %v1974_v40 = vpop.f32.mrb[90].mxu0 }
 0x2ba   :  { %v1978_v4 = vmul.f32 %v4887_v15, %v1972_v58  ;;  %v1975_v62 = vadd.f32 %v5954_v0, %v1974_v40  ;;  %v4282_v14 = vpop.f32.mrb[91].mxu0 }
 0x2bc   :  { %v1980_v5 = vadd.f32 %v1978_v4, %v5905_v60  ;;  %v1979_v2 = vmul.f32 %v4889_v3, %v1975_v62  ;;  %v6739_v3 = vld [vmem:[#allocation5_spill] sm:$0xff] }
 0x2be   :  { %4894 = vtanh.f32 %v1980_v5  ;;  %v1981_v59 = vadd.f32 %v1979_v2, %v5908_v21  ;;  %v6740_v2 = vld [vmem:[#allocation18_spill] sm:$0xff] }
 0x2c0   :  { %4896 = vtanh.f32 %v1981_v59 }
 0x2c8   :  { %v4895_v24 = vpop.eup %4894 }
 0x2c9   :  { %v1986_v19 = vmul.f32 %v4895_v24, %v1984_v10 }
 0x2ca   :  { %v4897_v32 = vpop.eup %4896 }
 0x2cb   :  { %v1987_v33 = vmul.f32 %v4897_v32, %v1985_v39  ;;  %v6050_v38 = vadd.f32 %v1988_v7, %v1986_v19 }
 0x2cd   :  { %v6052_v60 = vadd.f32 %v1989_v36, %v1987_v33 }
 0x2cf   :  { %v1992_v21 = vpack.c.bf16 %v6052_v60, %v6050_v38 }
 0x2d1   :  { %4300 = vmatmul.mubr.bf16.vlgmr.msra.gmra.mrb[76].mxu1 %v1992_v21  ;;  %4320 = vmatmul.mubr.bf16.vlgmr.msra.gmra.mrb[92].mxu0 %v1992_v21 }
 0x2d2   :  { %4324 = vmatpush3.bf16.msra.mxu1 %v6059_v41  ;;  %4339 = vmatprep.mubr.msk.bf16.mxu1 %vm5055_vm0, %v6738_v25 }
 0x2d3   :  { %4325 = vmatprep.subr.bf16.mxu1 %v6738_v25  ;;  %4344 = vmatpush3.bf16.msra.mxu0 %v6068_v37 }
 0x2d4   :  { %4345 = vmatprep.subr.bf16.mxu0 %v6738_v25  ;;  %4359 = vmatprep.mubr.msk.bf16.mxu0 %vm5055_vm0, %v6738_v25 }
 0x2d6   :  { %4326 = vmatpush3.bf16.msra.mxu1 %v6077_v35 }
 0x2d7   :  { %4327 = vmatprep.subr.bf16.mxu1 %v6738_v25  ;;  %4346 = vmatpush3.bf16.msra.mxu0 %v6084_v42 }
 0x2d8   :  { %4347 = vmatprep.subr.bf16.mxu0 %v6738_v25 }
 0x2da   :  { %4328 = vmatpush3.bf16.msra.mxu1 %v6091_v46 }
 0x2db   :  { %4329 = vmatprep.subr.bf16.mxu1 %v6738_v25  ;;  %4348 = vmatpush3.bf16.msra.mxu0 %v6098_v45 }
 0x2dc   :  { %4349 = vmatprep.subr.bf16.mxu0 %v6738_v25 }
 0x2de   :  { %4330 = vmatpush3.bf16.msra.mxu1 %v6105_v48 }
 0x2df   :  { %4331 = vmatprep.subr.bf16.mxu1 %v6738_v25  ;;  %4350 = vmatpush3.bf16.msra.mxu0 %v6112_v51 }
 0x2e0   :  { %4351 = vmatprep.subr.bf16.mxu0 %v6738_v25 }
 0x2e2   :  { %4332 = vmatpush3.bf16.msra.mxu1 %v6119_v47 }
 0x2e3   :  { %4333 = vmatprep.subr.bf16.mxu1 %v6738_v25  ;;  %4352 = vmatpush3.bf16.msra.mxu0 %v6126_v52 }
 0x2e4   :  { %4353 = vmatprep.subr.bf16.mxu0 %v6738_v25 }
 0x2e6   :  { %4334 = vmatpush3.bf16.msra.mxu1 %v6133_v53 }
 0x2e7   :  { %4335 = vmatprep.subr.bf16.mxu1 %v6738_v25  ;;  %4354 = vmatpush3.bf16.msra.mxu0 %v6140_v49 }
 0x2e8   :  { %4355 = vmatprep.subr.bf16.mxu0 %v6738_v25 }
 0x2ea   :  { %4336 = vmatpush3.bf16.msra.mxu1 %v6147_v54 }
 0x2eb   :  { %4337 = vmatprep.subr.bf16.mxu1 %v6738_v25  ;;  %4356 = vmatpush3.bf16.msra.mxu0 %v6154_v55 }
 0x2ec   :  { %4357 = vmatprep.subr.bf16.mxu0 %v6738_v25 }
 0x2ee   :  { %4338 = vmatpush3.bf16.msra.mxu1 %v6161_v56 }
 0x2ef   :  { %4363 = vmatprep.subr.bf16.mxu1 %v6738_v25  ;;  %4358 = vmatpush3.bf16.msra.mxu0 %v6168_v57 }
 0x2f0   :  { %4383 = vmatprep.subr.bf16.mxu0 %v6738_v25 }
 0x2f1   :  { %4340 = vmatmul.mubr.bf16.vlgmr.msra.gmra.mrb[80].mxu1 %v1992_v21 }
 0x2f2   :  { %4364 = vmatpush3.bf16.msra.mxu1 %v6010_v43  ;;  %4379 = vmatprep.mubr.msk.bf16.mxu1 %vm5055_vm0, %v6738_v25 }
 0x2f3   :  { %4365 = vmatprep.subr.bf16.mxu1 %v6738_v25 }
 0x2f6   :  { %4366 = vmatpush3.bf16.msra.mxu1 %v6019_v23 }
 0x2f7   :  { %4367 = vmatprep.subr.bf16.mxu1 %v6738_v25 }
 0x2fa   :  { %4368 = vmatpush3.bf16.msra.mxu1 %v6026_v27 }
 0x2fb   :  { %4369 = vmatprep.subr.bf16.mxu1 %v6738_v25 }
 0x2fe   :  { %4370 = vmatpush3.bf16.msra.mxu1 %v6183_v22 }
 0x2ff   :  { %4371 = vmatprep.subr.bf16.mxu1 %v6738_v25 }
 0x302   :  { %4372 = vmatpush3.bf16.msra.mxu1 %v6190_v34 }
 0x303   :  { %4373 = vmatprep.subr.bf16.mxu1 %v6738_v25 }
 0x306   :  { %4374 = vmatpush3.bf16.msra.mxu1 %v6197_v13 }
 0x307   :  { %4375 = vmatprep.subr.bf16.mxu1 %v6738_v25 }
 0x30a   :  { %4376 = vmatpush3.bf16.msra.mxu1 %v6204_v8 }
 0x30b   :  { %4377 = vmatprep.subr.bf16.mxu1 %v6738_v25 }
 0x30e   :  { %4378 = vmatpush3.bf16.msra.mxu1 %v6211_v28 }
 0x30f   :  { %4403 = vmatprep.subr.bf16.mxu1 %v6738_v25 }
 0x3a4   :  { %v2027_v31 = vpop.f32.mrb[76].mxu1  ;;  %v2068_v1 = vpop.f32.mrb[92].mxu0 }
 0x3a5   :  { %v2078_v58 = vadd.f32 %v2027_v31, %v5790_v29  ;;  %v2095_v12 = vadd.f32 %v2068_v1, %v5865_v44  ;;  %v4301_v15 = vpop.f32.mrb[77].mxu1  ;;  %v4321_v40 = vpop.f32.mrb[93].mxu0 }
 0x3a6   :  { %v2030_v4 = vpop.f32.mrb[78].mxu1  ;;  %v2071_v62 = vpop.f32.mrb[94].mxu0 }
 0x3a7   :  { %v3533_v14 = vmul.f32 -1.442695, %v2078_v58  ;;  %v2079_v5 = vadd.f32 %v2030_v4, %v6739_v3  ;;  %v2096_v59 = vadd.f32 %v2071_v62, %v6740_v2  ;;  %v4302_v63 = vpop.f32.mrb[79].mxu1  ;;  %v4322_v17 = vpop.f32.mrb[95].mxu0  ;;  %v3535_v24 = vmul.f32 -1.442695, %v2095_v12 }
 0x3a8   :  { %v6741_v3 = vld [vmem:[#allocation27_spill] sm:$0xff] }
 0x3a9   :  { %v3534_v10 = vmul.f32 -1.442695, %v2079_v5  ;;  %4898 = vpow2.f32 %v3533_v14  ;;  %v3536_v39 = vmul.f32 -1.442695, %v2096_v59  ;;  %v6742_v59 = vld [vmem:[#allocation28_spill] sm:$0xff] }
 0x3ab   :  { %4900 = vpow2.f32 %v3534_v10 }
 0x3ac   :  { %4902 = vpow2.f32 %v3535_v24 }
 0x3ad   :  { %4904 = vpow2.f32 %v3536_v39 }
 0x3b3   :  { %v4899_v19 = vpop.eup %4898 }
 0x3b4   :  { %v2086_v44 = vadd.f32 1.0, %v4899_v19 }
 0x3b5   :  { %v4901_v29 = vpop.eup %4900 }
 0x3b6   :  { %v2087_v7 = vadd.f32 1.0, %v4901_v29  ;;  %4906 = vrcp.f32 %v2086_v44  ;;  %v4903_v32 = vpop.eup %4902 }
 0x3b7   :  { %v4905_v33 = vpop.eup %4904  ;;  %v2103_v36 = vadd.f32 1.0, %v4903_v32 }
 0x3b8   :  { %4908 = vrcp.f32 %v2087_v7  ;;  %v2104_v31 = vadd.f32 1.0, %v4905_v33 }
 0x3b9   :  { %4910 = vrcp.f32 %v2103_v36 }
 0x3ba   :  { %4912 = vrcp.f32 %v2104_v31 }
 0x3c0   :  { %v4907_v15 = vpop.eup %4906 }
 0x3c2   :  { %v4909_v14 = vpop.eup %4908 }
 0x3c3   :  { %v4911_v17 = vpop.eup %4910 }
 0x3c4   :  { %v2146_v21 = vpop.f32.mrb[80].mxu1  ;;  %v4913_v10 = vpop.eup %4912  ;;  %v2159_v24 = vsub.f32 1.0, %v4911_v17  ;;  %v2163_v44 = vmul.f32 %v4911_v17, %v6050_v38 }
 0x3c5   :  { %v2147_v1 = vadd.f32 %v5954_v0, %v2146_v21  ;;  %v4341_v58 = vpop.f32.mrb[81].mxu1  ;;  %v2160_v19 = vsub.f32 1.0, %v4913_v10  ;;  %v2164_v33 = vmul.f32 %v4913_v10, %v6052_v60 }
 0x3c6   :  { %v2149_v40 = vpop.f32.mrb[82].mxu1 }
 0x3c7   :  { %v2153_v12 = vmul.f32 %v4907_v15, %v2147_v1  ;;  %v2150_v4 = vadd.f32 %v5954_v0, %v2149_v40  ;;  %v4342_v62 = vpop.f32.mrb[83].mxu1  ;;  %v6743_v1 = vld [vmem:[#allocation6_spill] sm:$0xff]  ;;  %v6744_v15 = vld [vmem:[#allocation16_spill] sm:$0xff] }
 0x3c9   :  { %v2155_v5 = vadd.f32 %v2153_v12, %v6741_v3  ;;  %v2154_v2 = vmul.f32 %v4909_v14, %v2150_v4 }
 0x3cb   :  { %4914 = vtanh.f32 %v2155_v5  ;;  %v2156_v63 = vadd.f32 %v2154_v2, %v6742_v59  ;;  %v6745_v5 = vld [vmem:[#allocation7_spill] sm:$0xff]  ;;  %v6746_v59 = vld [vmem:[#allocation17_spill] sm:$0xff] }
 0x3cd   :  { %4916 = vtanh.f32 %v2156_v63 }
 0x3d5   :  { %v4915_v39 = vpop.eup %4914 }
 0x3d6   :  { %v2161_v29 = vmul.f32 %v4915_v39, %v2159_v24 }
 0x3d7   :  { %v4917_v7 = vpop.eup %4916 }
 0x3d8   :  { %v2162_v32 = vmul.f32 %v4917_v7, %v2160_v19  ;;  %v6225_v36 = vadd.f32 %v2163_v44, %v2161_v29 }
 0x3da   :  { %v6227_v21 = vadd.f32 %v2164_v33, %v2162_v32 }
 0x3dc   :  { %v2167_v31 = vpack.c.bf16 %v6227_v21, %v6225_v36 }
 0x3de   :  { %4360 = vmatmul.mubr.bf16.vlgmr.msra.gmra.mrb[96].mxu0 %v2167_v31  ;;  %4380 = vmatmul.mubr.bf16.vlgmr.msra.gmra.mrb[84].mxu1 %v2167_v31 }
 0x3df   :  { %4384 = vmatpush3.bf16.msra.mxu0 %v6059_v41  ;;  %4399 = vmatprep.mubr.msk.bf16.mxu0 %vm5055_vm0, %v6738_v25 }
 0x3e0   :  { %4385 = vmatprep.subr.bf16.mxu0 %v6738_v25  ;;  %4404 = vmatpush3.bf16.msra.mxu1 %v6068_v37 }
 0x3e1   :  { %4405 = vmatprep.subr.bf16.mxu1 %v6738_v25  ;;  %4419 = vmatprep.mubr.msk.bf16.mxu1 %vm5055_vm0, %v6738_v25 }
 0x3e3   :  { %4386 = vmatpush3.bf16.msra.mxu0 %v6077_v35 }
 0x3e4   :  { %4387 = vmatprep.subr.bf16.mxu0 %v6738_v25  ;;  %4406 = vmatpush3.bf16.msra.mxu1 %v6084_v42 }
 0x3e5   :  { %4407 = vmatprep.subr.bf16.mxu1 %v6738_v25 }
 0x3e7   :  { %4388 = vmatpush3.bf16.msra.mxu0 %v6091_v46 }
 0x3e8   :  { %4389 = vmatprep.subr.bf16.mxu0 %v6738_v25  ;;  %4408 = vmatpush3.bf16.msra.mxu1 %v6098_v45 }
 0x3e9   :  { %4409 = vmatprep.subr.bf16.mxu1 %v6738_v25 }
 0x3eb   :  { %4390 = vmatpush3.bf16.msra.mxu0 %v6105_v48 }
 0x3ec   :  { %4391 = vmatprep.subr.bf16.mxu0 %v6738_v25  ;;  %4410 = vmatpush3.bf16.msra.mxu1 %v6112_v51 }
 0x3ed   :  { %4411 = vmatprep.subr.bf16.mxu1 %v6738_v25 }
 0x3ef   :  { %4392 = vmatpush3.bf16.msra.mxu0 %v6119_v47 }
 0x3f0   :  { %4393 = vmatprep.subr.bf16.mxu0 %v6738_v25  ;;  %4412 = vmatpush3.bf16.msra.mxu1 %v6126_v52 }
 0x3f1   :  { %4413 = vmatprep.subr.bf16.mxu1 %v6738_v25 }
 0x3f3   :  { %4394 = vmatpush3.bf16.msra.mxu0 %v6133_v53 }
 0x3f4   :  { %4395 = vmatprep.subr.bf16.mxu0 %v6738_v25  ;;  %4414 = vmatpush3.bf16.msra.mxu1 %v6140_v49 }
 0x3f5   :  { %4415 = vmatprep.subr.bf16.mxu1 %v6738_v25 }
 0x3f7   :  { %4396 = vmatpush3.bf16.msra.mxu0 %v6147_v54 }
 0x3f8   :  { %4397 = vmatprep.subr.bf16.mxu0 %v6738_v25  ;;  %4416 = vmatpush3.bf16.msra.mxu1 %v6154_v55 }
 0x3f9   :  { %4417 = vmatprep.subr.bf16.mxu1 %v6738_v25 }
 0x3fb   :  { %4398 = vmatpush3.bf16.msra.mxu0 %v6161_v56 }
 0x3fc   :  { %4423 = vmatprep.subr.bf16.mxu0 %v6738_v25  ;;  %4418 = vmatpush3.bf16.msra.mxu1 %v6168_v57 }
 0x3fd   :  { %4443 = vmatprep.subr.bf16.mxu1 %v6738_v25 }
 0x3fe   :  { %4400 = vmatmul.mubr.bf16.vlgmr.msra.gmra.mrb[100].mxu0 %v2167_v31 }
 0x3ff   :  { %4424 = vmatpush3.bf16.msra.mxu0 %v6010_v43  ;;  %4439 = vmatprep.mubr.msk.bf16.mxu0 %vm5055_vm0, %v6738_v25 }
 0x400   :  { %4425 = vmatprep.subr.bf16.mxu0 %v6738_v25 }
 0x403   :  { %4426 = vmatpush3.bf16.msra.mxu0 %v6019_v23 }
 0x404   :  { %4427 = vmatprep.subr.bf16.mxu0 %v6738_v25 }
 0x407   :  { %4428 = vmatpush3.bf16.msra.mxu0 %v6026_v27 }
 0x408   :  { %4429 = vmatprep.subr.bf16.mxu0 %v6738_v25 }
 0x40b   :  { %4430 = vmatpush3.bf16.msra.mxu0 %v6183_v22 }
 0x40c   :  { %4431 = vmatprep.subr.bf16.mxu0 %v6738_v25 }
 0x40f   :  { %4432 = vmatpush3.bf16.msra.mxu0 %v6190_v34 }
 0x410   :  { %4433 = vmatprep.subr.bf16.mxu0 %v6738_v25 }
 0x413   :  { %4434 = vmatpush3.bf16.msra.mxu0 %v6197_v13 }
 0x414   :  { %4435 = vmatprep.subr.bf16.mxu0 %v6738_v25 }
 0x417   :  { %4436 = vmatpush3.bf16.msra.mxu0 %v6204_v8 }
 0x418   :  { %4437 = vmatprep.subr.bf16.mxu0 %v6738_v25 }
 0x41b   :  { %4438 = vmatpush3.bf16.msra.mxu0 %v6211_v28 }
 0x41c   :  { %4463 = vmatprep.subr.bf16.mxu0 %v6738_v25 }
 0x4b1   :  { %v2202_v38 = vpop.f32.mrb[96].mxu0  ;;  %v2243_v60 = vpop.f32.mrb[84].mxu1 }
 0x4b2   :  { %v2253_v58 = vadd.f32 %v2202_v38, %v6743_v1  ;;  %v2270_v40 = vadd.f32 %v2243_v60, %v6744_v15  ;;  %v4361_v12 = vpop.f32.mrb[97].mxu0  ;;  %v4381_v4 = vpop.f32.mrb[85].mxu1 }
 0x4b3   :  { %v2205_v62 = vpop.f32.mrb[98].mxu0  ;;  %v2246_v14 = vpop.f32.mrb[86].mxu1 }
 0x4b4   :  { %v3537_v3 = vmul.f32 -1.442695, %v2253_v58  ;;  %v2254_v2 = vadd.f32 %v2205_v62, %v6745_v5  ;;  %v2271_v63 = vadd.f32 %v2246_v14, %v6746_v59  ;;  %v4362_v17 = vpop.f32.mrb[99].mxu0  ;;  %v4382_v10 = vpop.f32.mrb[87].mxu1  ;;  %v3539_v39 = vmul.f32 -1.442695, %v2270_v40 }
 0x4b6   :  { %v3538_v24 = vmul.f32 -1.442695, %v2254_v2  ;;  %4918 = vpow2.f32 %v3537_v3  ;;  %v3540_v19 = vmul.f32 -1.442695, %v2271_v63 }
 0x4b8   :  { %4920 = vpow2.f32 %v3538_v24 }
 0x4b9   :  { %4922 = vpow2.f32 %v3539_v39 }
 0x4ba   :  { %4924 = vpow2.f32 %v3540_v19 }
 0x4c0   :  { %v4919_v29 = vpop.eup %4918 }
 0x4c1   :  { %v2261_v7 = vadd.f32 1.0, %v4919_v29 }
 0x4c2   :  { %v4921_v44 = vpop.eup %4920 }
 0x4c3   :  { %v2262_v32 = vadd.f32 1.0, %v4921_v44  ;;  %4926 = vrcp.f32 %v2261_v7  ;;  %v4923_v33 = vpop.eup %4922 }
 0x4c4   :  { %v4925_v31 = vpop.eup %4924  ;;  %v2278_v38 = vadd.f32 1.0, %v4923_v33 }
 0x4c5   :  { %4928 = vrcp.f32 %v2262_v32  ;;  %v2279_v1 = vadd.f32 1.0, %v4925_v31  ;;  %v6747_v31 = vld [vmem:[#allocation8_spill] sm:$0xff] }
 0x4c6   :  { %4930 = vrcp.f32 %v2278_v38 }
 0x4c7   :  { %4932 = vrcp.f32 %v2279_v1 }
 0x4cd   :  { %v4927_v12 = vpop.eup %4926 }
 0x4cf   :  { %v4929_v3 = vpop.eup %4928 }
 0x4d0   :  { %v4931_v63 = vpop.eup %4930 }
 0x4d1   :  { %v2321_v60 = vpop.f32.mrb[100].mxu0  ;;  %v4933_v17 = vpop.eup %4932  ;;  %v2334_v10 = vsub.f32 1.0, %v4931_v63  ;;  %v2338_v29 = vmul.f32 %v4931_v63, %v6225_v36 }
 0x4d2   :  { %v2322_v58 = vadd.f32 %v5954_v0, %v2321_v60  ;;  %v4401_v15 = vpop.f32.mrb[101].mxu0  ;;  %v2335_v39 = vsub.f32 1.0, %v4933_v17  ;;  %v2339_v32 = vmul.f32 %v4933_v17, %v6227_v21  ;;  %v6748_v60 = vld [vmem:[#allocation20_spill] sm:$0xff] }
 0x4d3   :  { %v2324_v4 = vpop.f32.mrb[102].mxu0 }
 0x4d4   :  { %v2328_v40 = vmul.f32 %v4927_v12, %v2322_v58  ;;  %v2325_v62 = vadd.f32 %v5954_v0, %v2324_v4  ;;  %v4402_v14 = vpop.f32.mrb[103].mxu0 }
 0x4d6   :  { %v2330_v5 = vadd.f32 %v2328_v40, %v5921_v61  ;;  %v2329_v2 = vmul.f32 %v4929_v3, %v2325_v62  ;;  %v6749_v62 = vld [vmem:[#allocation9_spill] sm:$0xff]  ;;  %v6750_v3 = vld [vmem:[#allocation22_spill] sm:$0xff] }
 0x4d8   :  { %4934 = vtanh.f32 %v2330_v5  ;;  %v2331_v59 = vadd.f32 %v2329_v2, %v5924_v30 }
 0x4da   :  { %4936 = vtanh.f32 %v2331_v59 }
 0x4e2   :  { %v4935_v24 = vpop.eup %4934 }
 0x4e3   :  { %v2336_v19 = vmul.f32 %v4935_v24, %v2334_v10 }
 0x4e4   :  { %v4937_v44 = vpop.eup %4936 }
 0x4e5   :  { %v2337_v7 = vmul.f32 %v4937_v44, %v2335_v39  ;;  %v6295_v33 = vadd.f32 %v2338_v29, %v2336_v19 }
 0x4e7   :  { %v6297_v61 = vadd.f32 %v2339_v32, %v2337_v7 }
 0x4e9   :  { %v2342_v30 = vpack.c.bf16 %v6297_v61, %v6295_v33 }
 0x4eb   :  { %4420 = vmatmul.mubr.bf16.vlgmr.msra.gmra.mrb[88].mxu1 %v2342_v30  ;;  %4440 = vmatmul.mubr.bf16.vlgmr.msra.gmra.mrb[104].mxu0 %v2342_v30 }
 0x4ec   :  { %4444 = vmatpush3.bf16.msra.mxu1 %v6059_v41  ;;  %4459 = vmatprep.mubr.msk.bf16.mxu1 %vm5055_vm0, %v6738_v25 }
 0x4ed   :  { %4445 = vmatprep.subr.bf16.mxu1 %v6738_v25  ;;  %4464 = vmatpush3.bf16.msra.mxu0 %v6068_v37 }
 0x4ee   :  { %4465 = vmatprep.subr.bf16.mxu0 %v6738_v25  ;;  %4479 = vmatprep.mubr.msk.bf16.mxu0 %vm5055_vm0, %v6738_v25 }
 0x4f0   :  { %4446 = vmatpush3.bf16.msra.mxu1 %v6077_v35 }
 0x4f1   :  { %4447 = vmatprep.subr.bf16.mxu1 %v6738_v25  ;;  %4466 = vmatpush3.bf16.msra.mxu0 %v6084_v42 }
 0x4f2   :  { %4467 = vmatprep.subr.bf16.mxu0 %v6738_v25 }
 0x4f4   :  { %4448 = vmatpush3.bf16.msra.mxu1 %v6091_v46 }
 0x4f5   :  { %4449 = vmatprep.subr.bf16.mxu1 %v6738_v25  ;;  %4468 = vmatpush3.bf16.msra.mxu0 %v6098_v45 }
 0x4f6   :  { %4469 = vmatprep.subr.bf16.mxu0 %v6738_v25 }
 0x4f8   :  { %4450 = vmatpush3.bf16.msra.mxu1 %v6105_v48 }
 0x4f9   :  { %4451 = vmatprep.subr.bf16.mxu1 %v6738_v25  ;;  %4470 = vmatpush3.bf16.msra.mxu0 %v6112_v51 }
 0x4fa   :  { %4471 = vmatprep.subr.bf16.mxu0 %v6738_v25 }
 0x4fc   :  { %4452 = vmatpush3.bf16.msra.mxu1 %v6119_v47 }
 0x4fd   :  { %4453 = vmatprep.subr.bf16.mxu1 %v6738_v25  ;;  %4472 = vmatpush3.bf16.msra.mxu0 %v6126_v52 }
 0x4fe   :  { %4473 = vmatprep.subr.bf16.mxu0 %v6738_v25 }
 0x500   :  { %4454 = vmatpush3.bf16.msra.mxu1 %v6133_v53 }
 0x501   :  { %4455 = vmatprep.subr.bf16.mxu1 %v6738_v25  ;;  %4474 = vmatpush3.bf16.msra.mxu0 %v6140_v49 }
 0x502   :  { %4475 = vmatprep.subr.bf16.mxu0 %v6738_v25 }
 0x504   :  { %4456 = vmatpush3.bf16.msra.mxu1 %v6147_v54 }
 0x505   :  { %4457 = vmatprep.subr.bf16.mxu1 %v6738_v25  ;;  %4476 = vmatpush3.bf16.msra.mxu0 %v6154_v55 }
 0x506   :  { %4477 = vmatprep.subr.bf16.mxu0 %v6738_v25 }
 0x508   :  { %4458 = vmatpush3.bf16.msra.mxu1 %v6161_v56 }
 0x509   :  { %4483 = vmatprep.subr.bf16.mxu1 %v6738_v25  ;;  %4478 = vmatpush3.bf16.msra.mxu0 %v6168_v57 }
 0x50a   :  { %4503 = vmatprep.subr.bf16.mxu0 %v6738_v25 }
 0x50b   :  { %4460 = vmatmul.mubr.bf16.vlgmr.msra.gmra.mrb[92].mxu1 %v2342_v30 }
 0x50c   :  { %4484 = vmatpush3.bf16.msra.mxu1 %v6010_v43  ;;  %4499 = vmatprep.mubr.msk.bf16.mxu1 %vm5055_vm0, %v6738_v25 }
 0x50d   :  { %4485 = vmatprep.subr.bf16.mxu1 %v6738_v25 }
 0x510   :  { %4486 = vmatpush3.bf16.msra.mxu1 %v6019_v23 }
 0x511   :  { %4487 = vmatprep.subr.bf16.mxu1 %v6738_v25 }
 0x514   :  { %4488 = vmatpush3.bf16.msra.mxu1 %v6026_v27 }
 0x515   :  { %4489 = vmatprep.subr.bf16.mxu1 %v6738_v25 }
 0x518   :  { %4490 = vmatpush3.bf16.msra.mxu1 %v6183_v22 }
 0x519   :  { %4491 = vmatprep.subr.bf16.mxu1 %v6738_v25 }
 0x51c   :  { %4492 = vmatpush3.bf16.msra.mxu1 %v6190_v34 }
 0x51d   :  { %4493 = vmatprep.subr.bf16.mxu1 %v6738_v25 }
 0x520   :  { %4494 = vmatpush3.bf16.msra.mxu1 %v6197_v13 }
 0x521   :  { %4495 = vmatprep.subr.bf16.mxu1 %v6738_v25 }
 0x524   :  { %4496 = vmatpush3.bf16.msra.mxu1 %v6204_v8 }
 0x525   :  { %4497 = vmatprep.subr.bf16.mxu1 %v6738_v25 }
 0x528   :  { %4498 = vmatpush3.bf16.msra.mxu1 %v6211_v28 }
 0x529   :  { %4523 = vmatprep.subr.bf16.mxu1 %v6738_v25 }
 0x5be   :  { %v2377_v36 = vpop.f32.mrb[88].mxu1  ;;  %v2418_v21 = vpop.f32.mrb[104].mxu0 }
 0x5bf   :  { %v2428_v38 = vadd.f32 %v2377_v36, %v6747_v31  ;;  %v2445_v1 = vadd.f32 %v2418_v21, %v6748_v60  ;;  %v4421_v58 = vpop.f32.mrb[89].mxu1  ;;  %v4441_v15 = vpop.f32.mrb[105].mxu0 }
 0x5c0   :  { %v2380_v12 = vpop.f32.mrb[90].mxu1  ;;  %v2421_v4 = vpop.f32.mrb[106].mxu0 }
 0x5c1   :  { %v3541_v40 = vmul.f32 -1.442695, %v2428_v38  ;;  %v2429_v14 = vadd.f32 %v2380_v12, %v6749_v62  ;;  %v2446_v5 = vadd.f32 %v2421_v4, %v6750_v3  ;;  %v4422_v2 = vpop.f32.mrb[91].mxu1  ;;  %v4442_v59 = vpop.f32.mrb[107].mxu0  ;;  %v3543_v17 = vmul.f32 -1.442695, %v2445_v1 }
 0x5c3   :  { %v3542_v63 = vmul.f32 -1.442695, %v2429_v14  ;;  %4938 = vpow2.f32 %v3541_v40  ;;  %v3544_v10 = vmul.f32 -1.442695, %v2446_v5 }
 0x5c5   :  { %4940 = vpow2.f32 %v3542_v63 }
 0x5c6   :  { %4942 = vpow2.f32 %v3543_v17 }
 0x5c7   :  { %4944 = vpow2.f32 %v3544_v10 }
 0x5cd   :  { %v4939_v24 = vpop.eup %4938 }
 0x5ce   :  { %v2436_v19 = vadd.f32 1.0, %v4939_v24 }
 0x5cf   :  { %v4941_v39 = vpop.eup %4940 }
 0x5d0   :  { %v2437_v29 = vadd.f32 1.0, %v4941_v39  ;;  %4946 = vrcp.f32 %v2436_v19  ;;  %v4943_v44 = vpop.eup %4942 }
 0x5d1   :  { %v4945_v7 = vpop.eup %4944  ;;  %v2453_v32 = vadd.f32 1.0, %v4943_v44 }
 0x5d2   :  { %4948 = vrcp.f32 %v2437_v29  ;;  %v2454_v36 = vadd.f32 1.0, %v4945_v7 }
 0x5d3   :  { %4950 = vrcp.f32 %v2453_v32 }
 0x5d4   :  { %4952 = vrcp.f32 %v2454_v36  ;;  %v6753_v36 = vld [vmem:[#allocation11_spill] sm:$0xff] }
 0x5da   :  { %v4947_v38 = vpop.eup %4946 }
 0x5dc   :  { %v4949_v12 = vpop.eup %4948 }
 0x5dd   :  { %v4951_v14 = vpop.eup %4950 }
 0x5de   :  { %v2496_v30 = vpop.f32.mrb[92].mxu1  ;;  %v4953_v3 = vpop.eup %4952  ;;  %v2509_v5 = vsub.f32 1.0, %v4951_v14  ;;  %v2513_v17 = vmul.f32 %v4951_v14, %v6295_v33 }
 0x5df   :  { %v2497_v21 = vadd.f32 %v5954_v0, %v2496_v30  ;;  %v4461_v31 = vpop.f32.mrb[93].mxu1  ;;  %v2510_v59 = vsub.f32 1.0, %v4953_v3  ;;  %v2514_v24 = vmul.f32 %v4953_v3, %v6297_v61  ;;  %v6752_v61 = vld [vmem:[#allocation19_spill] sm:$0xff] }
 0x5e0   :  { %v2499_v60 = vpop.f32.mrb[94].mxu1  ;;  %v6754_v31 = vld [vmem:[#allocation21_spill] sm:$0xff] }
 0x5e1   :  { %v2503_v1 = vmul.f32 %v4947_v38, %v2497_v21  ;;  %v2500_v58 = vadd.f32 %v5954_v0, %v2499_v60  ;;  %v4462_v15 = vpop.f32.mrb[95].mxu1 }
 0x5e3   :  { %v2505_v4 = vadd.f32 %v2503_v1, %v5929_v50  ;;  %v2504_v40 = vmul.f32 %v4949_v12, %v2500_v58 }
 0x5e5   :  { %4954 = vtanh.f32 %v2505_v4  ;;  %v2506_v62 = vadd.f32 %v2504_v40, %v5932_v6 }
 0x5e7   :  { %4956 = vtanh.f32 %v2506_v62 }
 0x5ef   :  { %v4955_v2 = vpop.eup %4954 }
 0x5f0   :  { %v2511_v63 = vmul.f32 %v4955_v2, %v2509_v5 }
 0x5f1   :  { %v4957_v10 = vpop.eup %4956 }
 0x5f2   :  { %v2512_v0 = vmul.f32 %v4957_v10, %v2510_v59  ;;  %v6365_v39 = vadd.f32 %v2513_v17, %v2511_v63  ;;  %v6432_v17 = vld [vmem:[%s6694_s10] ss:$0 sm:$0xff] }
 0x5f4   :  { %v6367_v50 = vadd.f32 %v2514_v24, %v2512_v0 }
 0x5f6   :  { %v2517_v6 = vpack.c.bf16 %v6367_v50, %v6365_v39 }
 0x5f8   :  { %4480 = vmatmul.mubr.bf16.vlgmr.msra.gmra.mrb[108].mxu0 %v2517_v6  ;;  %4500 = vmatmul.mubr.bf16.vlgmr.msra.gmra.mrb[96].mxu1 %v2517_v6 }
 0x5f9   :  { %4504 = vmatpush3.bf16.msra.mxu0 %v6059_v41  ;;  %4519 = vmatprep.mubr.msk.bf16.mxu0 %vm5055_vm0, %v6738_v25 }
 0x5fa   :  { %4505 = vmatprep.subr.bf16.mxu0 %v6738_v25  ;;  %4524 = vmatpush3.bf16.msra.mxu1 %v6068_v37 }
 0x5fb   :  { %4525 = vmatprep.subr.bf16.mxu1 %v6738_v25  ;;  %4539 = vmatprep.mubr.msk.bf16.mxu1 %vm5055_vm0, %v6738_v25 }
 0x5fd   :  { %4506 = vmatpush3.bf16.msra.mxu0 %v6077_v35 }
 0x5fe   :  { %4507 = vmatprep.subr.bf16.mxu0 %v6738_v25  ;;  %4526 = vmatpush3.bf16.msra.mxu1 %v6084_v42 }
 0x5ff   :  { %4527 = vmatprep.subr.bf16.mxu1 %v6738_v25 }
 0x601   :  { %4508 = vmatpush3.bf16.msra.mxu0 %v6091_v46 }
 0x602   :  { %4509 = vmatprep.subr.bf16.mxu0 %v6738_v25  ;;  %4528 = vmatpush3.bf16.msra.mxu1 %v6098_v45 }
 0x603   :  { %4529 = vmatprep.subr.bf16.mxu1 %v6738_v25 }
 0x605   :  { %4510 = vmatpush3.bf16.msra.mxu0 %v6105_v48 }
 0x606   :  { %4511 = vmatprep.subr.bf16.mxu0 %v6738_v25  ;;  %4530 = vmatpush3.bf16.msra.mxu1 %v6112_v51 }
 0x607   :  { %4531 = vmatprep.subr.bf16.mxu1 %v6738_v25 }
 0x609   :  { %4512 = vmatpush3.bf16.msra.mxu0 %v6119_v47 }
 0x60a   :  { %4513 = vmatprep.subr.bf16.mxu0 %v6738_v25  ;;  %4532 = vmatpush3.bf16.msra.mxu1 %v6126_v52 }
 0x60b   :  { %4533 = vmatprep.subr.bf16.mxu1 %v6738_v25 }
 0x60d   :  { %4514 = vmatpush3.bf16.msra.mxu0 %v6133_v53 }
 0x60e   :  { %4515 = vmatprep.subr.bf16.mxu0 %v6738_v25  ;;  %4534 = vmatpush3.bf16.msra.mxu1 %v6140_v49 }
 0x60f   :  { %4535 = vmatprep.subr.bf16.mxu1 %v6738_v25 }
 0x611   :  { %4516 = vmatpush3.bf16.msra.mxu0 %v6147_v54 }
 0x612   :  { %4517 = vmatprep.subr.bf16.mxu0 %v6738_v25  ;;  %4536 = vmatpush3.bf16.msra.mxu1 %v6154_v55 }
 0x613   :  { %4537 = vmatprep.subr.bf16.mxu1 %v6738_v25 }
 0x615   :  { %4518 = vmatpush3.bf16.msra.mxu0 %v6161_v56 }
 0x616   :  { %4543 = vmatprep.subr.bf16.mxu0 %v6738_v25  ;;  %4538 = vmatpush3.bf16.msra.mxu1 %v6168_v57 }
 0x617   :  { %4563 = vmatprep.subr.bf16.mxu1 %v6738_v25 }
 0x618   :  { %4520 = vmatmul.mubr.bf16.vlgmr.msra.gmra.mrb[112].mxu0 %v2517_v6 }
 0x619   :  { %4544 = vmatpush3.bf16.msra.mxu0 %v6010_v43  ;;  %4559 = vmatprep.mubr.msk.bf16.mxu0 %vm5055_vm0, %v6738_v25 }
 0x61a   :  { %4545 = vmatprep.subr.bf16.mxu0 %v6738_v25 }
 0x61d   :  { %4546 = vmatpush3.bf16.msra.mxu0 %v6019_v23 }
 0x61e   :  { %4547 = vmatprep.subr.bf16.mxu0 %v6738_v25 }
 0x621   :  { %4548 = vmatpush3.bf16.msra.mxu0 %v6026_v27  ;;  %v6751_v27 = vld [vmem:[#allocation10_spill] sm:$0xff] }
 0x622   :  { %4549 = vmatprep.subr.bf16.mxu0 %v6738_v25 }
 0x625   :  { %4550 = vmatpush3.bf16.msra.mxu0 %v6183_v22 }
 0x626   :  { %4551 = vmatprep.subr.bf16.mxu0 %v6738_v25 }
 0x629   :  { %4552 = vmatpush3.bf16.msra.mxu0 %v6190_v34 }
 0x62a   :  { %4553 = vmatprep.subr.bf16.mxu0 %v6738_v25 }
 0x62d   :  { %4554 = vmatpush3.bf16.msra.mxu0 %v6197_v13 }
 0x62e   :  { %4555 = vmatprep.subr.bf16.mxu0 %v6738_v25 }
 0x631   :  { %4556 = vmatpush3.bf16.msra.mxu0 %v6204_v8 }
 0x632   :  { %4557 = vmatprep.subr.bf16.mxu0 %v6738_v25 }
 0x635   :  { %4558 = vmatpush3.bf16.msra.mxu0 %v6211_v28 }
 0x636   :  { %4583 = vmatprep.subr.bf16.mxu0 %v6738_v25 }
 0x6cb   :  { %v2552_v43 = vpop.f32.mrb[108].mxu0  ;;  %v2593_v23 = vpop.f32.mrb[96].mxu1 }
 0x6cc   :  { %v2603_v33 = vadd.f32 %v2552_v43, %v6751_v27  ;;  %v2620_v19 = vadd.f32 %v2593_v23, %v6752_v61  ;;  %v4481_v29 = vpop.f32.mrb[109].mxu0  ;;  %v4501_v44 = vpop.f32.mrb[97].mxu1 }
 0x6cd   :  { %v2555_v7 = vpop.f32.mrb[110].mxu0  ;;  %v2596_v32 = vpop.f32.mrb[98].mxu1 }
 0x6ce   :  { %v3545_v30 = vmul.f32 -1.442695, %v2603_v33  ;;  %v2604_v21 = vadd.f32 %v2555_v7, %v6753_v36  ;;  %v2621_v38 = vadd.f32 %v2596_v32, %v6754_v31  ;;  %v4482_v60 = vpop.f32.mrb[111].mxu0  ;;  %v4502_v1 = vpop.f32.mrb[99].mxu1  ;;  %v3547_v15 = vmul.f32 -1.442695, %v2620_v19 }
 0x6d0   :  { %v3546_v58 = vmul.f32 -1.442695, %v2604_v21  ;;  %4958 = vpow2.f32 %v3545_v30  ;;  %v3548_v12 = vmul.f32 -1.442695, %v2621_v38 }
 0x6d2   :  { %4960 = vpow2.f32 %v3546_v58 }
 0x6d3   :  { %4962 = vpow2.f32 %v3547_v15 }
 0x6d4   :  { %4964 = vpow2.f32 %v3548_v12 }
 0x6da   :  { %v4959_v4 = vpop.eup %4958 }
 0x6db   :  { %v2611_v62 = vadd.f32 1.0, %v4959_v4 }
 0x6dc   :  { %v4961_v40 = vpop.eup %4960 }
 0x6dd   :  { %v2612_v14 = vadd.f32 1.0, %v4961_v40  ;;  %4966 = vrcp.f32 %v2611_v62  ;;  %v4963_v3 = vpop.eup %4962 }
 0x6de   :  { %v4965_v5 = vpop.eup %4964  ;;  %v2628_v2 = vadd.f32 1.0, %v4963_v3 }
 0x6df   :  { %4968 = vrcp.f32 %v2612_v14  ;;  %v2629_v63 = vadd.f32 1.0, %v4965_v5 }
 0x6e0   :  { %4970 = vrcp.f32 %v2628_v2 }
 0x6e1   :  { %4972 = vrcp.f32 %v2629_v63 }
 0x6e7   :  { %v4967_v24 = vpop.eup %4966 }
 0x6e9   :  { %v4969_v33 = vpop.eup %4968 }
 0x6ea   :  { %v4971_v44 = vpop.eup %4970 }
 0x6eb   :  { %v2671_v59 = vpop.f32.mrb[112].mxu0  ;;  %v4973_v7 = vpop.eup %4972  ;;  %v2684_v32 = vsub.f32 1.0, %v4971_v44  ;;  %v2688_v31 = vmul.f32 %v4971_v44, %v6365_v39 }
 0x6ec   :  { %v2672_v10 = vadd.f32 %v6432_v17, %v2671_v59  ;;  %v4521_v0 = vpop.f32.mrb[113].mxu0  ;;  %v2685_v36 = vsub.f32 1.0, %v4973_v7  ;;  %v2689_v1 = vmul.f32 %v4973_v7, %v6367_v50 }
 0x6ed   :  { %v2674_v6 = vpop.f32.mrb[114].mxu0 }
 0x6ee   :  { %v2678_v43 = vmul.f32 %v4967_v24, %v2672_v10  ;;  %v2675_v23 = vadd.f32 %v6432_v17, %v2674_v6  ;;  %v4522_v27 = vpop.f32.mrb[115].mxu0 }
 0x6f0   :  { %v2680_v61 = vadd.f32 %v2678_v43, %v5935_v20  ;;  %v2679_v19 = vmul.f32 %v4969_v33, %v2675_v23 }
 0x6f2   :  { %4974 = vtanh.f32 %v2680_v61  ;;  %v2681_v29 = vadd.f32 %v2679_v19, %v5938_v9 }
 0x6f4   :  { %4976 = vtanh.f32 %v2681_v29 }
 0x6fc   :  { %v4975_v30 = vpop.eup %4974 }
 0x6fd   :  { %v2686_v21 = vmul.f32 %v4975_v30, %v2684_v32 }
 0x6fe   :  { %v4977_v38 = vpop.eup %4976 }
 0x6ff   :  { %v2687_v60 = vmul.f32 %v4977_v38, %v2685_v36  ;;  %v6440_v58 = vadd.f32 %v2688_v31, %v2686_v21 }
 0x701   :  { %v6442_v20 = vadd.f32 %v2689_v1, %v2687_v60  ;;  %v5046_v1 = vld [vmem:[%s6690_s6] sm:$0xff]  }
 0x703   :  { %v2692_v9 = vpack.c.bf16 %v6442_v20, %v6440_v58 }
 0x705   :  { %4540 = vmatmul.mubr.bf16.vlgmr.msra.gmra.mrb[100].mxu1 %v2692_v9  ;;  %4560 = vmatmul.mubr.bf16.vlgmr.msra.gmra.mrb[116].mxu0 %v2692_v9 }
 0x706   :  { %4564 = vmatpush3.bf16.msra.mxu1 %v6059_v41  ;;  %4579 = vmatprep.mubr.msk.bf16.mxu1 %vm5055_vm0, %v6738_v25  ;;  %v5043_v41 = vld [vmem:[%s6689_s5] sm:$0xff]  }
 0x707   :  { %4565 = vmatprep.subr.bf16.mxu1 %v6738_v25  ;;  %4584 = vmatpush3.bf16.msra.mxu0 %v6068_v37  ;;  %v5044_v37 = vld [vmem:[%s6689_s5 + $0x8] sm:$0xff]  }
 0x708   :  { %4585 = vmatprep.subr.bf16.mxu0 %v6738_v25  ;;  %4599 = vmatprep.mubr.msk.bf16.mxu0 %vm5055_vm0, %v6738_v25 }
 0x70a   :  { %4566 = vmatpush3.bf16.msra.mxu1 %v6077_v35  ;;  %v5045_v35 = vld [vmem:[%s6689_s5 + $0x10] sm:$0xff]  }
 0x70b   :  { %4567 = vmatprep.subr.bf16.mxu1 %v6738_v25  ;;  %4586 = vmatpush3.bf16.msra.mxu0 %v6084_v42 }
 0x70c   :  { %4587 = vmatprep.subr.bf16.mxu0 %v6738_v25 }
 0x70e   :  { %4568 = vmatpush3.bf16.msra.mxu1 %v6091_v46 }
 0x70f   :  { %4569 = vmatprep.subr.bf16.mxu1 %v6738_v25  ;;  %4588 = vmatpush3.bf16.msra.mxu0 %v6098_v45  ;;  %v6755_v45 = vld [vmem:[#allocation12_spill] sm:$0xff] }
 0x710   :  { %4589 = vmatprep.subr.bf16.mxu0 %v6738_v25 }
 0x712   :  { %4570 = vmatpush3.bf16.msra.mxu1 %v6105_v48 }
 0x713   :  { %4571 = vmatprep.subr.bf16.mxu1 %v6738_v25  ;;  %4590 = vmatpush3.bf16.msra.mxu0 %v6112_v51  ;;  %v6756_v51 = vld [vmem:[#allocation23_spill] sm:$0xff] }
 0x714   :  { %4591 = vmatprep.subr.bf16.mxu0 %v6738_v25 }
 0x716   :  { %4572 = vmatpush3.bf16.msra.mxu1 %v6119_v47 }
 0x717   :  { %4573 = vmatprep.subr.bf16.mxu1 %v6738_v25  ;;  %4592 = vmatpush3.bf16.msra.mxu0 %v6126_v52 }
 0x718   :  { %4593 = vmatprep.subr.bf16.mxu0 %v6738_v25 }
 0x71a   :  { %4574 = vmatpush3.bf16.msra.mxu1 %v6133_v53 }
 0x71b   :  { %4575 = vmatprep.subr.bf16.mxu1 %v6738_v25  ;;  %4594 = vmatpush3.bf16.msra.mxu0 %v6140_v49 }
 0x71c   :  { %4595 = vmatprep.subr.bf16.mxu0 %v6738_v25 }
 0x71e   :  { %4576 = vmatpush3.bf16.msra.mxu1 %v6147_v54 }
 0x71f   :  { %4577 = vmatprep.subr.bf16.mxu1 %v6738_v25  ;;  %4596 = vmatpush3.bf16.msra.mxu0 %v6154_v55 }
 0x720   :  { %4597 = vmatprep.subr.bf16.mxu0 %v6738_v25 }
 0x722   :  { %4578 = vmatpush3.bf16.msra.mxu1 %v6161_v56  ;;  %v6757_v56 = vld [vmem:[#allocation13_spill] sm:$0xff] }
 0x723   :  { %4603 = vmatprep.subr.bf16.mxu1 %v6738_v25  ;;  %4598 = vmatpush3.bf16.msra.mxu0 %v6168_v57 }
 0x724   :  { %4623 = vmatprep.subr.bf16.mxu0 %v6738_v25 }
 0x725   :  { %4580 = vmatmul.mubr.bf16.vlgmr.msra.gmra.mrb[104].mxu1 %v2692_v9  ;;  %v5049_v9 = vld [vmem:[%s6690_s6 + $0x18] sm:$0xff]  }
 0x726   :  { %4604 = vmatpush3.bf16.msra.mxu1 %v5043_v41  ;;  %4619 = vmatprep.mubr.msk.bf16.mxu1 %vm5055_vm0, %v6738_v25  ;;  %v5050_v41 = vld [vmem:[%s6690_s6 + $0x20] sm:$0xff]  }
 0x727   :  { %4605 = vmatprep.subr.bf16.mxu1 %v6738_v25 }
 0x72a   :  { %4606 = vmatpush3.bf16.msra.mxu1 %v5044_v37  ;;  %v5051_v37 = vld [vmem:[%s6690_s6 + $0x28] sm:$0xff]  }
 0x72b   :  { %4607 = vmatprep.subr.bf16.mxu1 %v6738_v25 }
 0x72e   :  { %4608 = vmatpush3.bf16.msra.mxu1 %v5045_v35  ;;  %v5052_v35 = vld [vmem:[%s6690_s6 + $0x30] sm:$0xff]  }
 0x72f   :  { %4609 = vmatprep.subr.bf16.mxu1 %v6738_v25 }
 0x732   :  { %4610 = vmatpush3.bf16.msra.mxu1 %v6183_v22  ;;  %v6758_v22 = vld [vmem:[#allocation24_spill] sm:$0xff] }
 0x733   :  { %4611 = vmatprep.subr.bf16.mxu1 %v6738_v25 }
 0x736   :  { %4612 = vmatpush3.bf16.msra.mxu1 %v6190_v34 }
 0x737   :  { %4613 = vmatprep.subr.bf16.mxu1 %v6738_v25 }
 0x73a   :  { %4614 = vmatpush3.bf16.msra.mxu1 %v6197_v13 }
 0x73b   :  { %4615 = vmatprep.subr.bf16.mxu1 %v6738_v25 }
 0x73e   :  { %4616 = vmatpush3.bf16.msra.mxu1 %v6204_v8 }
 0x73f   :  { %4617 = vmatprep.subr.bf16.mxu1 %v6738_v25 }
 0x742   :  { %4618 = vmatpush3.bf16.msra.mxu1 %v6211_v28 }
 0x743   :  { %4643 = vmatprep.subr.bf16.mxu1 %v6738_v25 }
 0x7d8   :  { %v2727_v42 = vpop.f32.mrb[100].mxu1  ;;  %v2768_v46 = vpop.f32.mrb[116].mxu0 }
 0x7d9   :  { %v2778_v48 = vadd.f32 %v2727_v42, %v6755_v45  ;;  %v2795_v47 = vadd.f32 %v2768_v46, %v6756_v51  ;;  %v4541_v52 = vpop.f32.mrb[101].mxu1  ;;  %v4561_v53 = vpop.f32.mrb[117].mxu0  ;;  %v5053_v42 = vld [vmem:[%s6690_s6 + $0x38] sm:$0xff]   ;;  %v4834_v46 = vld [vmem:[%s6695_s11] sm:$0xff]   ;;  %v4835_v45 = vld [vmem:[%s6695_s11 + $0x8] sm:$0xff]  }
 0x7da   :  { %v2730_v49 = vpop.f32.mrb[102].mxu1  ;;  %v2771_v54 = vpop.f32.mrb[118].mxu0  ;;  %v4837_v51 = vld [vmem:[%s6695_s11 + $0x18] sm:$0xff]   ;;  %v4839_v52 = vld [vmem:[%s6695_s11 + $0x28] sm:$0xff]   ;;  %v4840_v53 = vld [vmem:[%s6695_s11 + $0x30] sm:$0xff]  }
 0x7db   :  { %v3549_v55 = vmul.f32 -1.442695, %v2778_v48  ;;  %v2779_v57 = vadd.f32 %v2730_v49, %v6757_v56  ;;  %v2796_v34 = vadd.f32 %v2771_v54, %v6758_v22  ;;  %v4542_v13 = vpop.f32.mrb[103].mxu1  ;;  %v4562_v8 = vpop.f32.mrb[119].mxu0  ;;  %v3551_v39 = vmul.f32 -1.442695, %v2795_v47 }
 0x7dc   :  { %v4836_v48 = vld [vmem:[%s6695_s11 + $0x10] sm:$0xff]   ;;  %v4838_v47 = vld [vmem:[%s6695_s11 + $0x20] sm:$0xff]   ;;  %v4841_v49 = vld [vmem:[%s6695_s11 + $0x38] sm:$0xff]  }
 0x7dd   :  { %v3550_v28 = vmul.f32 -1.442695, %v2779_v57  ;;  %4978 = vpow2.f32 %v3549_v55  ;;  %v3552_v50 = vmul.f32 -1.442695, %v2796_v34  ;;  %v4842_v54 = vld [vmem:[%s6696_s14] sm:$0xff]   ;;  %v4843_v55 = vld [vmem:[%s6696_s14 + $0x8] sm:$0xff]  }
 0x7de   :  { %v4844_v56 = vld [vmem:[%s6696_s14 + $0x10] sm:$0xff]   ;;  %v4845_v57 = vld [vmem:[%s6696_s14 + $0x18] sm:$0xff]   ;;  %v4846_v22 = vld [vmem:[%s6696_s14 + $0x20] sm:$0xff]  }
 0x7df   :  { %4980 = vpow2.f32 %v3550_v28  ;;  %v6759_v8 = vld [vmem:[#allocation14_spill] sm:$0xff] }
 0x7e0   :  { %4982 = vpow2.f32 %v3551_v39  ;;  %v6760_v39 = vld [vmem:[#allocation25_spill] sm:$0xff] }
 0x7e1   :  { %4984 = vpow2.f32 %v3552_v50 }
 0x7e7   :  { %v4979_v15 = vpop.eup %4978 }
 0x7e8   :  { %v2786_v4 = vadd.f32 1.0, %v4979_v15 }
 0x7e9   :  { %v4981_v12 = vpop.eup %4980 }
 0x7ea   :  { %v2787_v40 = vadd.f32 1.0, %v4981_v12  ;;  %4986 = vrcp.f32 %v2786_v4  ;;  %v4983_v62 = vpop.eup %4982 }
 0x7eb   :  { %v4985_v14 = vpop.eup %4984  ;;  %v2803_v3 = vadd.f32 1.0, %v4983_v62 }
 0x7ec   :  { %4988 = vrcp.f32 %v2787_v40  ;;  %v2804_v2 = vadd.f32 1.0, %v4985_v14  ;;  %v6761_v14 = vld [vmem:[#allocation15_spill] sm:$0xff] }
 0x7ed   :  { %4990 = vrcp.f32 %v2803_v3 }
 0x7ee   :  { %4992 = vrcp.f32 %v2804_v2 }
 0x7f4   :  { %v4987_v10 = vpop.eup %4986 }
 0x7f6   :  { %v4989_v23 = vpop.eup %4988 }
 0x7f7   :  { %v4991_v19 = vpop.eup %4990 }
 0x7f8   :  { %v2846_v5 = vpop.f32.mrb[104].mxu1  ;;  %v4993_v29 = vpop.eup %4992  ;;  %v2859_v44 = vsub.f32 1.0, %v4991_v19  ;;  %v2863_v36 = vmul.f32 %v4991_v19, %v6440_v58  ;;  %v5047_v58 = vld [vmem:[%s6690_s6 + $0x8] sm:$0xff]  }
 0x7f9   :  { %v2847_v59 = vadd.f32 %v6432_v17, %v2846_v5  ;;  %v4581_v63 = vpop.f32.mrb[105].mxu1  ;;  %v2860_v32 = vsub.f32 1.0, %v4993_v29  ;;  %v2864_v38 = vmul.f32 %v4993_v29, %v6442_v20  ;;  %v5048_v20 = vld [vmem:[%s6690_s6 + $0x10] sm:$0xff]   ;;  %v6762_v5 = vld [vmem:[#allocation26_spill] sm:$0xff] }
 0x7fa   :  { %v2849_v0 = vpop.f32.mrb[106].mxu1 }
 0x7fb   :  { %v2853_v24 = vmul.f32 %v4987_v10, %v2847_v59  ;;  %v2850_v6 = vadd.f32 %v6432_v17, %v2849_v0  ;;  %v4582_v43 = vpop.f32.mrb[107].mxu1 }
 0x7fd   :  { %v2855_v27 = vadd.f32 %v2853_v24, %v5941_v11  ;;  %v2854_v33 = vmul.f32 %v4989_v23, %v2850_v6 }
 0x7ff   :  { %4994 = vtanh.f32 %v2855_v27  ;;  %v2856_v61 = vadd.f32 %v2854_v33, %v5944_v26 }
 0x801   :  { %4996 = vtanh.f32 %v2856_v61 }
 0x809   :  { %v4995_v7 = vpop.eup %4994 }
 0x80a   :  { %v2861_v30 = vmul.f32 %v4995_v7, %v2859_v44 }
 0x80b   :  { %v4997_v21 = vpop.eup %4996 }
 0x80c   :  { %v2862_v31 = vmul.f32 %v4997_v21, %v2860_v32  ;;  %v6516_v60 = vadd.f32 %v2863_v36, %v2861_v30 }
 0x80e   :  { %v6518_v11 = vadd.f32 %v2864_v38, %v2862_v31 }
 0x810   :  { %v2867_v26 = vpack.c.bf16 %v6518_v11, %v6516_v60 }
 0x812   :  { %4600 = vmatmul.mubr.bf16.vlgmr.msra.gmra.mrb[120].mxu0 %v2867_v26  ;;  %4620 = vmatmul.mubr.bf16.vlgmr.msra.gmra.mrb[108].mxu1 %v2867_v26 }
 0x813   :  { %4624 = vmatpush3.bf16.msra.mxu0 %v5046_v1  ;;  %4639 = vmatprep.mubr.msk.bf16.mxu0 %vm5055_vm0, %v6738_v25 }
 0x814   :  { %4625 = vmatprep.subr.bf16.mxu0 %v6738_v25  ;;  %4659 = vmatprep.mubr.msk.bf16.mxu1 %vm5055_vm0, %v6738_v25 }
 0x815   :  { %4644 = vmatpush3.bf16.msra.mxu1 %v4834_v46 }
 0x816   :  { %4645 = vmatprep.subr.bf16.mxu1 %v6738_v25 }
 0x817   :  { %4626 = vmatpush3.bf16.msra.mxu0 %v5047_v58 }
 0x818   :  { %4627 = vmatprep.subr.bf16.mxu0 %v6738_v25 }
 0x819   :  { %4646 = vmatpush3.bf16.msra.mxu1 %v4835_v45 }
 0x81a   :  { %4647 = vmatprep.subr.bf16.mxu1 %v6738_v25 }
 0x81b   :  { %4628 = vmatpush3.bf16.msra.mxu0 %v5048_v20 }
 0x81c   :  { %4629 = vmatprep.subr.bf16.mxu0 %v6738_v25 }
 0x81d   :  { %4648 = vmatpush3.bf16.msra.mxu1 %v4836_v48 }
 0x81e   :  { %4649 = vmatprep.subr.bf16.mxu1 %v6738_v25 }
 0x81f   :  { %4630 = vmatpush3.bf16.msra.mxu0 %v5049_v9 }
 0x820   :  { %4631 = vmatprep.subr.bf16.mxu0 %v6738_v25 }
 0x821   :  { %4650 = vmatpush3.bf16.msra.mxu1 %v4837_v51 }
 0x822   :  { %4651 = vmatprep.subr.bf16.mxu1 %v6738_v25 }
 0x823   :  { %4632 = vmatpush3.bf16.msra.mxu0 %v5050_v41 }
 0x824   :  { %4633 = vmatprep.subr.bf16.mxu0 %v6738_v25 }
 0x825   :  { %4652 = vmatpush3.bf16.msra.mxu1 %v4838_v47 }
 0x826   :  { %4653 = vmatprep.subr.bf16.mxu1 %v6738_v25 }
 0x827   :  { %4634 = vmatpush3.bf16.msra.mxu0 %v5051_v37 }
 0x828   :  { %4635 = vmatprep.subr.bf16.mxu0 %v6738_v25 }
 0x829   :  { %4654 = vmatpush3.bf16.msra.mxu1 %v4839_v52 }
 0x82a   :  { %4655 = vmatprep.subr.bf16.mxu1 %v6738_v25 }
 0x82b   :  { %4636 = vmatpush3.bf16.msra.mxu0 %v5052_v35 }
 0x82c   :  { %4637 = vmatprep.subr.bf16.mxu0 %v6738_v25 }
 0x82d   :  { %4656 = vmatpush3.bf16.msra.mxu1 %v4840_v53  ;;  %v4850_v53 = vld [vmem:[%s6697_s16] sm:$0xff]  }
 0x82e   :  { %4657 = vmatprep.subr.bf16.mxu1 %v6738_v25 }
 0x82f   :  { %4638 = vmatpush3.bf16.msra.mxu0 %v5053_v42 }
 0x830   :  { %4663 = vmatprep.subr.bf16.mxu0 %v6738_v25 }
 0x831   :  { %4658 = vmatpush3.bf16.msra.mxu1 %v4841_v49  ;;  %v4851_v49 = vld [vmem:[%s6697_s16 + $0x8] sm:$0xff]  }
 0x832   :  { %4640 = vmatmul.mubr.bf16.vlgmr.msra.gmra.mrb[124].mxu0 %v2867_v26  ;;  %4683 = vmatprep.subr.bf16.mxu1 %v6738_v25 }
 0x833   :  { %4679 = vmatprep.mubr.msk.bf16.mxu0 %vm5055_vm0, %v6738_v25  ;;  %4664 = vmatpush3.bf16.msra.mxu0 %v4842_v54  ;;  %v4852_v54 = vld [vmem:[%s6697_s16 + $0x10] sm:$0xff]  }
 0x834   :  { %4665 = vmatprep.subr.bf16.mxu0 %v6738_v25 }
 0x837   :  { %4666 = vmatpush3.bf16.msra.mxu0 %v4843_v55  ;;  %v4853_v55 = vld [vmem:[%s6697_s16 + $0x18] sm:$0xff]  }
 0x838   :  { %4667 = vmatprep.subr.bf16.mxu0 %v6738_v25 }
 0x83b   :  { %4668 = vmatpush3.bf16.msra.mxu0 %v4844_v56  ;;  %v4854_v56 = vld [vmem:[%s6697_s16 + $0x20] sm:$0xff]  }
 0x83c   :  { %4669 = vmatprep.subr.bf16.mxu0 %v6738_v25 }
 0x83f   :  { %4670 = vmatpush3.bf16.msra.mxu0 %v4845_v57  ;;  %v4855_v57 = vld [vmem:[%s6697_s16 + $0x28] sm:$0xff]  }
 0x840   :  { %4671 = vmatprep.subr.bf16.mxu0 %v6738_v25 }
 0x843   :  { %4672 = vmatpush3.bf16.msra.mxu0 %v4846_v22  ;;  %v3160_v22 = vlaneseq }
 0x844   :  { %4673 = vmatprep.subr.bf16.mxu0 %v6738_v25 }
 0x8e5   :  { %v2902_v34 = vpop.f32.mrb[120].mxu0  ;;  %v2943_v13 = vpop.f32.mrb[108].mxu1 }
 0x8e6   :  { %v2953_v28 = vadd.f32 %v2902_v34, %v6759_v8  ;;  %v2970_v50 = vadd.f32 %v2943_v13, %v6760_v39  ;;  %v4601_v15 = vpop.f32.mrb[121].mxu0  ;;  %v4621_v12 = vpop.f32.mrb[109].mxu1  ;;  %v3161_v34 = vshrl.u32 %v3160_v22, 7  ;;  %v3042_v13 = vld [vmem:[%s6698_s13] sm:$0x1] }
 0x8e7   :  { %v2905_v4 = vpop.f32.mrb[122].mxu0  ;;  %v2946_v40 = vpop.f32.mrb[110].mxu1  ;;  %v3557_v8 = vld [vmem:[%s6699_s12] ss:$0 sm:$0xff] }
 0x8e8   :  { %v3553_v62 = vmul.f32 -1.442695, %v2953_v28  ;;  %v2954_v3 = vadd.f32 %v2905_v4, %v6761_v14  ;;  %v2971_v2 = vadd.f32 %v2946_v40, %v6762_v5  ;;  %v4602_v59 = vpop.f32.mrb[123].mxu0  ;;  %v4622_v63 = vpop.f32.mrb[111].mxu1  ;;  %v3555_v0 = vmul.f32 -1.442695, %v2970_v50 }
 0x8e9   :  { %v3043_v28 = vmax.f32 %v3042_v13, 0.0  ;;  %v3162_v39 = vsub.s32 0, %v3161_v34 }
 0x8ea   :  { %v3554_v10 = vmul.f32 -1.442695, %v2954_v3  ;;  %4998 = vpow2.f32 %v3553_v62  ;;  %v3556_v24 = vmul.f32 -1.442695, %v2971_v2 }
 0x8eb   :  { %v3163_v62 = vrot.slane %v3043_v28, %v3162_v39 }
 0x8ec   :  { %5000 = vpow2.f32 %v3554_v10  ;;  %v4856_v10 = vld [vmem:[%s6697_s16 + $0x30] sm:$0xff]  }
 0x8ed   :  { %5002 = vpow2.f32 %v3555_v0  ;;  %v4857_v0 = vld [vmem:[%s6697_s16 + $0x38] sm:$0xff]  }
 0x8ee   :  { %5004 = vpow2.f32 %v3556_v24  ;;  %v3566_v24 = vld [vmem:[%s6700_s15] ss:$0 sm:$0xff] }
 0x8f4   :  { %v4999_v6 = vpop.eup %4998 }
 0x8f5   :  { %v2961_v23 = vadd.f32 1.0, %v4999_v6 }
 0x8f6   :  { %v5001_v43 = vpop.eup %5000 }
 0x8f7   :  { %v2962_v27 = vadd.f32 1.0, %v5001_v43  ;;  %5006 = vrcp.f32 %v2961_v23  ;;  %v5003_v33 = vpop.eup %5002 }
 0x8f8   :  { %v5005_v61 = vpop.eup %5004  ;;  %v2978_v19 = vadd.f32 1.0, %v5003_v33 }
 0x8f9   :  { %5008 = vrcp.f32 %v2962_v27  ;;  %v2979_v44 = vadd.f32 1.0, %v5005_v61 }
 0x8fa   :  { %5010 = vrcp.f32 %v2978_v19 }
 0x8fb   :  { %5012 = vrcp.f32 %v2979_v44 }
 0x901   :  { %v5007_v30 = vpop.eup %5006 }
 0x903   :  { %v5009_v26 = vpop.eup %5008 }
 0x904   :  { %v5011_v9 = vpop.eup %5010 }
 0x905   :  { %v3021_v29 = vpop.f32.mrb[124].mxu0  ;;  %v5013_v41 = vpop.eup %5012  ;;  %v3034_v37 = vsub.f32 1.0, %v5011_v9  ;;  %v3038_v45 = vmul.f32 %v5011_v9, %v6516_v60  ;;  %v4848_v60 = vld [vmem:[%s6696_s14 + $0x30] sm:$0xff]  }
 0x906   :  { %v3022_v7 = vadd.f32 %v6432_v17, %v3021_v29  ;;  %v4641_v32 = vpop.f32.mrb[125].mxu0  ;;  %v3035_v42 = vsub.f32 1.0, %v5013_v41  ;;  %v3039_v51 = vmul.f32 %v5013_v41, %v6518_v11  ;;  %v4849_v11 = vld [vmem:[%s6696_s14 + $0x38] sm:$0xff]  }
 0x907   :  { %v3024_v36 = vpop.f32.mrb[126].mxu0 }
 0x908   :  { %v3028_v21 = vmul.f32 %v5007_v30, %v3022_v7  ;;  %v3025_v31 = vadd.f32 %v6432_v17, %v3024_v36  ;;  %v4642_v38 = vpop.f32.mrb[127].mxu0 }
 0x90a   :  { %v3030_v1 = vadd.f32 %v3028_v21, %v5948_v18  ;;  %v3029_v58 = vmul.f32 %v5009_v26, %v3025_v31 }
 0x90c   :  { %5014 = vtanh.f32 %v3030_v1  ;;  %v3031_v20 = vadd.f32 %v3029_v58, %v5957_v16  ;;  %v4847_v16 = vld [vmem:[%s6696_s14 + $0x28] sm:$0xff]  }
 0x90d   :  { %4674 = vmatpush3.bf16.msra.mxu0 %v4847_v16 }
 0x90e   :  { %5016 = vtanh.f32 %v3031_v20  ;;  %4675 = vmatprep.subr.bf16.mxu0 %v6738_v25 }
 0x911   :  { %4676 = vmatpush3.bf16.msra.mxu0 %v4848_v60 }
 0x912   :  { %4677 = vmatprep.subr.bf16.mxu0 %v6738_v25 }
 0x915   :  { %4678 = vmatpush3.bf16.msra.mxu0 %v4849_v11 }
 0x916   :  { %v5015_v35 = vpop.eup %5014 }
 0x917   :  { %v3036_v46 = vmul.f32 %v5015_v35, %v3034_v37 }
 0x918   :  { %v5017_v48 = vpop.eup %5016 }
 0x919   :  { %v3037_v17 = vmul.f32 %v5017_v48, %v3035_v42  ;;  %v3040_v47 = vadd.f32 %v3038_v45, %v3036_v46 }
 0x91b   :  { %v3041_v52 = vadd.f32 %v3039_v51, %v3037_v17 }
 0x91d   :  { %v3044_v18 = vpack.c.bf16 %v3041_v52, %v3040_v47 }
 0x91f   :  { %4660 = vmatmul.mubr.bf16.vlgmr.msra.gmra.mrb[112].mxu1 %v3044_v18 }
 0x920   :  { %4699 = vmatprep.mubr.msk.bf16.mxu1 %vm5055_vm0, %v6738_v25  ;;  %4684 = vmatpush3.bf16.msra.mxu1 %v4850_v53 }
 0x921   :  { %4685 = vmatprep.subr.bf16.mxu1 %v6738_v25 }
 0x924   :  { %4686 = vmatpush3.bf16.msra.mxu1 %v4851_v49 }
 0x925   :  { %4687 = vmatprep.subr.bf16.mxu1 %v6738_v25 }
 0x928   :  { %4688 = vmatpush3.bf16.msra.mxu1 %v4852_v54 }
 0x929   :  { %4689 = vmatprep.subr.bf16.mxu1 %v6738_v25 }
 0x92c   :  { %4690 = vmatpush3.bf16.msra.mxu1 %v4853_v55 }
 0x92d   :  { %4691 = vmatprep.subr.bf16.mxu1 %v6738_v25 }
 0x930   :  { %4692 = vmatpush3.bf16.msra.mxu1 %v4854_v56 }
 0x931   :  { %4693 = vmatprep.subr.bf16.mxu1 %v6738_v25 }
 0x934   :  { %4694 = vmatpush3.bf16.msra.mxu1 %v4855_v57 }
 0x935   :  { %4695 = vmatprep.subr.bf16.mxu1 %v6738_v25 }
 0x938   :  { %4696 = vmatpush3.bf16.msra.mxu1 %v4856_v10 }
 0x939   :  { %4697 = vmatprep.subr.bf16.mxu1 %v6738_v25  ;;  %v3575_v25 = vld [vmem:[%s6701_s17] ss:$0 sm:$0xff] }
 0x93c   :  { %4698 = vmatpush3.bf16.msra.mxu1 %v4857_v0 }
 0x9f2   :  { %v3150_v50 = vpop.f32.mrb[112].mxu1 }
 0x9f3   :  { %v3151_v15 = vadd.f32 %v3557_v8, %v3150_v50  ;;  %v4661_v12 = vpop.f32.mrb[113].mxu1 }
 0x9f4   :  { %v3153_v4 = vpop.f32.mrb[114].mxu1 }
 0x9f5   :  { %v3157_v40 = vmax.f32 %v3151_v15, 0.0  ;;  %v3154_v14 = vadd.f32 %v3557_v8, %v3153_v4  ;;  %v4662_v3 = vpop.f32.mrb[115].mxu1 }
 0x9f7   :  { %v3158_v5 = vmax.f32 %v3154_v14, 0.0  ;;  %v3165_v2 = vmul.f32 %v3163_v62, %v3157_v40 }
 0x9f9   :  { %v3166_v59 = vmul.f32 %v3163_v62, %v3158_v5 }
 0x9fb   :  { %v3167_v63 = vpack.c.bf16 %v3166_v59, %v3165_v2 }
 0x9fd   :  { %4680 = vmatmul.mubr.bf16.vlgmr.msra.gmra.mrb[128].mxu0 %v3167_v63 }
 0xad0   :  { %v3273_v6 = vpop.f32.mrb[128].mxu0 }
 0xad1   :  { %v3274_v43 = vadd.f32 %v3566_v24, %v3273_v6  ;;  %v4681_v23 = vpop.f32.mrb[129].mxu0 }
 0xad2   :  { %v3276_v27 = vpop.f32.mrb[130].mxu0 }
 0xad3   :  { %v3277_v33 = vadd.f32 %v3566_v24, %v3276_v27  ;;  %v4682_v61 = vpop.f32.mrb[131].mxu0  ;;  %v3280_v19 = vmax.f32 %v3274_v43, 0.0 }
 0xad5   :  { %v3281_v29 = vmax.f32 %v3277_v33, 0.0 }
 0xad7   :  { %v3282_v44 = vpack.c.bf16 %v3281_v29, %v3280_v19 }
 0xad9   :  { %4700 = vmatmul.mubr.bf16.vlgmr.msra.gmra.mrb[116].mxu1 %v3282_v44 }
 0xbac   :  { %v3388_v7 = vpop.f32.mrb[116].mxu1 }
 0xbad   :  { %v3389_v32 = vadd.f32 %v3575_v25, %v3388_v7  ;;  %v4701_v30 = vpop.f32.mrb[117].mxu1 }
 0xbae   :  { %v3391_v36 = vpop.f32.mrb[118].mxu1 }
 0xbaf   :  { %3395 = vst [vmem:[%s6702_s18] sm:$0xff] %v3389_v32  ;;  %v3392_v21 = vadd.f32 %v3575_v25, %v3391_v36  ;;  %v4702_v31 = vpop.f32.mrb[119].mxu1 }
 0xbb1   :  { %3396 = vst [vmem:[%s6702_s18 + $0x8] sm:$0xff] %v3392_v21 }

</bundles_post_ra>
